<compile_context>
chip_gen: v5e
topology: v5e:2x2
jax: 0.10.0
libtpu: 0.0.40
codegen_flags: <defaults>
</compile_context>

<pallas_src>
import functools

import jax
import jax.numpy as jnp
from jax import lax
from jax.experimental import pallas as pl
from jax.experimental.pallas import tpu as pltpu


def _reflect_edge(x, axis, lo, hi):
    """Pieces for ReflectionPad along `axis` with (lo, hi) pad widths.

    Uses block slices (+ one lax.rev when the pad is wider than one) instead
    of per-row/per-column slice lists.  Returns the list of pieces to
    concatenate along `axis`.
    """
    size = x.shape[axis]
    parts = []
    if lo > 0:
        blk = lax.slice_in_dim(x, 1, lo + 1, axis=axis)          # rows 1..lo
        parts.append(blk if lo == 1 else lax.rev(blk, (axis,)))  # -> lo..1
    parts.append(x)
    if hi > 0:
        blk = lax.slice_in_dim(x, size - 1 - hi, size - 1, axis=axis)
        parts.append(blk if hi == 1 else lax.rev(blk, (axis,)))  # -> size-2..
    return parts


def _conv2d_same_kernel(x_ref, w_ref, b_ref, o_ref, patches_ref, *, ksize):
    """One batch-block per grid step.

    x_ref:       (B_blk, H, W, Cin)    unpadded channels-last input block
    w_ref:       (Cout, K*K*Cin)       weight, taps flattened (kh, kw, cin)
    b_ref:       (Cout, 1)             bias (f32)
    o_ref:       (B_blk, Cout, H*W)    output block (lane axis = H*W)
    patches_ref: (B_blk*H*W, K*K*Cin)  persistent VMEM im2col scratch
    """
    K = ksize
    B, H, W, Cin = x_ref.shape
    HW = H * W
    ka = K // 2
    kb = ka - 1 if K % 2 == 0 else ka

    x = x_ref[...]                                          # (B, H, W, Cin)

    # ---- reflection padding in VMEM (block slices, no padded HBM copy) ----
    parts_h = _reflect_edge(x, axis=1, lo=ka, hi=kb)
    xh = jnp.concatenate(parts_h, axis=1) if len(parts_h) > 1 else x
    parts_w = _reflect_edge(xh, axis=2, lo=ka, hi=kb)
    xp = jnp.concatenate(parts_w, axis=2) if len(parts_w) > 1 else xh
    # xp: (B, H+K-1, W+K-1, Cin)

    # ---- im2col into persistent VMEM scratch (no lane-axis concatenate) ---
    # Column order (kh, kw, cin) matches the weight flattening done in the
    # wrapper.  The (B, H, W, Cin) -> (B*H*W, Cin) reshape only collapses
    # leading dims (lane dim kept), so it is layout-cheap.
    cdt = patches_ref.dtype
    for kh in range(K):
        for kw in range(K):
            tap = kh * K + kw
            blk = xp[:, kh:kh + H, kw:kw + W, :].reshape(B * HW, Cin)
            patches_ref[:, tap * Cin:(tap + 1) * Cin] = blk.astype(cdt)

    # ---- single MXU contraction, f32 accumulation ---------------------------
    # (Cout, KKC) contracted with (B*HW, KKC) on KKC -> (Cout, B*HW).
    out_t = lax.dot_general(
        w_ref[...], patches_ref[...],
        dimension_numbers=(((1,), (1,)), ((), ())),
        preferred_element_type=jnp.float32)                 # (Cout, B*HW)
    out_t = out_t + b_ref[...]                              # bias once, f32

    # ---- per-image lane-dense stores (H*W lanes, unmasked when %128==0) ----
    for b in range(B):
        o_ref[b] = out_t[:, b * HW:(b + 1) * HW].astype(o_ref.dtype)


def conv2d_same_nhwc(x_nhwc, weight_oihw, bias, kernel_size, *,
                     block_batch=8, compute_dtype=jnp.float32):
    """Reflection-pad 'same' conv, channels-last input (no transpose pass).

    x_nhwc:      (N, H, W, Cin)
    weight_oihw: (Cout, Cin, K, K)   (PyTorch conv weight layout)
    bias:        (Cout,)
    returns      (N, Cout, H, W)
    """
    N, H, W, Cin = x_nhwc.shape
    Cout = weight_oihw.shape[0]
    K = kernel_size
    KKC = K * K * Cin

    # Largest divisor of N that is <= block_batch: amortizes per-grid-step
    # overhead and keeps DMA blocks reasonably fat.  (On v7x prefer enough
    # grid steps (>=2 per TensorCore) once N is realistic.)
    B_blk = 1
    for cand in range(min(N, block_batch), 0, -1):
        if N % cand == 0:
            B_blk = cand
            break

    # Weight flattened to (Cout, K*K*Cin), tap order (kh, kw, cin), cast to
    # the MXU compute dtype.  Bias stays f32 (added to the f32 accumulator).
    w2 = jnp.transpose(weight_oihw, (0, 2, 3, 1)).reshape(Cout, KKC)
    w2 = w2.astype(compute_dtype)
    b2 = bias.reshape(Cout, 1).astype(jnp.float32)

    kernel = functools.partial(_conv2d_same_kernel, ksize=K)

    out = pl.pallas_call(
        kernel,
        out_shape=jax.ShapeDtypeStruct((N, Cout, H * W), x_nhwc.dtype),
        grid_spec=pltpu.PrefetchScalarGridSpec(
            num_scalar_prefetch=0,
            grid=(N // B_blk,),
            in_specs=[
                pl.BlockSpec((B_blk, H, W, Cin), lambda n: (n, 0, 0, 0)),
                pl.BlockSpec((Cout, KKC), lambda n: (0, 0)),
                pl.BlockSpec((Cout, 1), lambda n: (0, 0)),
            ],
            out_specs=pl.BlockSpec((B_blk, Cout, H * W), lambda n: (n, 0, 0)),
            scratch_shapes=[pltpu.VMEM((B_blk * H * W, KKC), compute_dtype)],
        ),
        compiler_params=pltpu.CompilerParams(
            dimension_semantics=("parallel",)),
        # NOTE: at realistic sizes raise vmem_limit_bytes here (v5e/v6e have
        # 128 MiB physical VMEM vs. the small scoped default).
    )(x_nhwc, w2, b2)

    # (N, Cout, H*W) is already NCHW up to a metadata-only reshape.
    return out.reshape(N, Cout, H, W)


def conv2d_same(x_nchw, weight_oihw, bias, kernel_size, *,
                block_batch=8, compute_dtype=jnp.float32):
    """PyTorch-interface wrapper: NCHW in, NCHW out (matches Conv2dSame)."""
    # Interface glue only: channels-last callers should use conv2d_same_nhwc
    # and skip this HBM transpose entirely.
    x_nhwc = jnp.transpose(x_nchw, (0, 2, 3, 1))
    return conv2d_same_nhwc(x_nhwc, weight_oihw, bias, kernel_size,
                            block_batch=block_batch,
                            compute_dtype=compute_dtype)


def _reference(x_nchw, weight_oihw, bias, kernel_size):
    K = kernel_size
    ka = K // 2
    kb = ka - 1 if K % 2 == 0 else ka
    x_pad = jnp.pad(x_nchw, ((0, 0), (0, 0), (ka, kb), (ka, kb)),
                    mode="reflect")
    out = lax.conv_general_dilated(
        x_pad, weight_oihw, window_strides=(1, 1), padding="VALID",
        dimension_numbers=("NCHW", "OIHW", "NCHW"),
        precision=lax.Precision.HIGHEST)
    return out + bias.reshape(1, -1, 1, 1)


if __name__ == "__main__":
    # Small shapes consistent with the module: Conv2dSame(4, 8, kernel_size=3)
    N, Cin, H, W = 2, 4, 16, 16
    Cout, K = 8, 3

    key = jax.random.PRNGKey(0)
    k1, k2, k3 = jax.random.split(key, 3)
    x = jax.random.normal(k1, (N, Cin, H, W), dtype=jnp.float32)
    # Deterministic synthetic parameters (mirror Conv2d weight/bias shapes).
    weight = jax.random.normal(k2, (Cout, Cin, K, K), dtype=jnp.float32) * 0.1
    bias = jax.random.normal(k3, (Cout,), dtype=jnp.float32) * 0.1

    ref = jax.block_until_ready(_reference(x, weight, bias, K))

    # 1) f32 MXU path, PyTorch NCHW interface (exact semantics).
    out = jax.block_until_ready(conv2d_same(x, weight, bias, K))
    assert out.shape == (N, Cout, H, W), out.shape
    assert jnp.allclose(out, ref, atol=1e-4, rtol=1e-4), "f32 NCHW mismatch"

    # 2) channels-last entry point (no input HBM transpose pass).
    x_nhwc = jnp.transpose(x, (0, 2, 3, 1))
    out_nhwc = jax.block_until_ready(
        conv2d_same_nhwc(x_nhwc, weight, bias, K))
    assert jnp.allclose(out_nhwc, ref, atol=1e-4, rtol=1e-4), "NHWC mismatch"

    # 3) bf16 MXU path (recommended at realistic channel counts) — looser tol.
    out_bf16 = jax.block_until_ready(
        conv2d_same(x, weight, bias, K, compute_dtype=jnp.bfloat16))
    assert jnp.allclose(out_bf16, ref, atol=5e-2, rtol=5e-2), "bf16 mismatch"

    print("KERNEL_OK")
</pallas_src>

<mosaic_0001>
module attributes {stable_mosaic.version = 11 : i64} {
  func.func @_conv2d_same_kernel(%arg0: i32, %arg1: memref<2x16x16x4xf32, #tpu.memory_space<vmem>>, %arg2: memref<8x36xf32, #tpu.memory_space<vmem>>, %arg3: memref<8x1xf32, #tpu.memory_space<vmem>>, %arg4: memref<2x8x256xf32, #tpu.memory_space<vmem>>, %arg5: memref<512x36xf32, #tpu.memory_space<vmem>>) attributes {dimension_semantics = [#tpu.dimension_semantics<parallel>], iteration_bounds = array<i64: 1>, scalar_prefetch = 0 : i64, scratch_operands = 1 : i64, tpu.core_type = #tpu.core_type<tc>, window_params = [{transform_indices = @transform_0, window_bounds = array<i64: 2, 16, 16, 4>}, {pipeline_mode = #tpu.pipeline_mode<synchronous>, transform_indices = @transform_1, window_bounds = array<i64: 8, 36>}, {pipeline_mode = #tpu.pipeline_mode<synchronous>, transform_indices = @transform_2, window_bounds = array<i64: 8, 1>}, {transform_indices = @transform_3, window_bounds = array<i64: 2, 8, 256>}]} {
    %c0 = arith.constant 0 : index
    %c0_0 = arith.constant 0 : index
    %c0_1 = arith.constant 0 : index
    %c0_2 = arith.constant 0 : index
    %0 = vector.load %arg1[%c0, %c0_0, %c0_1, %c0_2] : memref<2x16x16x4xf32, #tpu.memory_space<vmem>>, vector<2x16x16x4xf32>
    %1 = vector.extract_strided_slice %0 {offsets = [0, 1, 0, 0], sizes = [2, 1, 16, 4], strides = [1, 1, 1, 1]} : vector<2x16x16x4xf32> to vector<2x1x16x4xf32>
    %2 = vector.extract_strided_slice %0 {offsets = [0, 14, 0, 0], sizes = [2, 1, 16, 4], strides = [1, 1, 1, 1]} : vector<2x16x16x4xf32> to vector<2x1x16x4xf32>
    %3 = tpu.concatenate %1, %0, %2 in 1 : vector<2x1x16x4xf32>, vector<2x16x16x4xf32>, vector<2x1x16x4xf32> -> vector<2x18x16x4xf32>
    %4 = vector.extract_strided_slice %3 {offsets = [0, 0, 1, 0], sizes = [2, 18, 1, 4], strides = [1, 1, 1, 1]} : vector<2x18x16x4xf32> to vector<2x18x1x4xf32>
    %5 = vector.extract_strided_slice %3 {offsets = [0, 0, 14, 0], sizes = [2, 18, 1, 4], strides = [1, 1, 1, 1]} : vector<2x18x16x4xf32> to vector<2x18x1x4xf32>
    %6 = tpu.concatenate %4, %3, %5 in 2 : vector<2x18x1x4xf32>, vector<2x18x16x4xf32>, vector<2x18x1x4xf32> -> vector<2x18x18x4xf32>
    %7 = vector.extract_strided_slice %6 {offsets = [0, 0, 0, 0], sizes = [2, 16, 16, 4], strides = [1, 1, 1, 1]} : vector<2x18x18x4xf32> to vector<2x16x16x4xf32>
    %8 = vector.shape_cast %7 : vector<2x16x16x4xf32> to vector<512x4xf32>
    %c0_3 = arith.constant 0 : index
    %c0_4 = arith.constant 0 : index
    %9 = vector.load %arg5[%c0_3, %c0_4] : memref<512x36xf32, #tpu.memory_space<vmem>>, vector<512x4xf32>
    tpu.vector_store %arg5[%c0_3, %c0_4], %8 {strides = array<i32>} : memref<512x36xf32, #tpu.memory_space<vmem>>, vector<512x4xf32>,
    %10 = vector.extract_strided_slice %6 {offsets = [0, 0, 1, 0], sizes = [2, 16, 16, 4], strides = [1, 1, 1, 1]} : vector<2x18x18x4xf32> to vector<2x16x16x4xf32>
    %11 = vector.shape_cast %10 : vector<2x16x16x4xf32> to vector<512x4xf32>
    %c0_5 = arith.constant 0 : index
    %c4 = arith.constant 4 : index
    %12 = vector.load %arg5[%c0_5, %c4] : memref<512x36xf32, #tpu.memory_space<vmem>>, vector<512x4xf32>
    tpu.vector_store %arg5[%c0_5, %c4], %11 {strides = array<i32>} : memref<512x36xf32, #tpu.memory_space<vmem>>, vector<512x4xf32>,
    %13 = vector.extract_strided_slice %6 {offsets = [0, 0, 2, 0], sizes = [2, 16, 16, 4], strides = [1, 1, 1, 1]} : vector<2x18x18x4xf32> to vector<2x16x16x4xf32>
    %14 = vector.shape_cast %13 : vector<2x16x16x4xf32> to vector<512x4xf32>
    %c0_6 = arith.constant 0 : index
    %c8 = arith.constant 8 : index
    %15 = vector.load %arg5[%c0_6, %c8] : memref<512x36xf32, #tpu.memory_space<vmem>>, vector<512x4xf32>
    tpu.vector_store %arg5[%c0_6, %c8], %14 {strides = array<i32>} : memref<512x36xf32, #tpu.memory_space<vmem>>, vector<512x4xf32>,
    %16 = vector.extract_strided_slice %6 {offsets = [0, 1, 0, 0], sizes = [2, 16, 16, 4], strides = [1, 1, 1, 1]} : vector<2x18x18x4xf32> to vector<2x16x16x4xf32>
    %17 = vector.shape_cast %16 : vector<2x16x16x4xf32> to vector<512x4xf32>
    %c0_7 = arith.constant 0 : index
    %c12 = arith.constant 12 : index
    %18 = vector.load %arg5[%c0_7, %c12] : memref<512x36xf32, #tpu.memory_space<vmem>>, vector<512x4xf32>
    tpu.vector_store %arg5[%c0_7, %c12], %17 {strides = array<i32>} : memref<512x36xf32, #tpu.memory_space<vmem>>, vector<512x4xf32>,
    %19 = vector.extract_strided_slice %6 {offsets = [0, 1, 1, 0], sizes = [2, 16, 16, 4], strides = [1, 1, 1, 1]} : vector<2x18x18x4xf32> to vector<2x16x16x4xf32>
    %20 = vector.shape_cast %19 : vector<2x16x16x4xf32> to vector<512x4xf32>
    %c0_8 = arith.constant 0 : index
    %c16 = arith.constant 16 : index
    %21 = vector.load %arg5[%c0_8, %c16] : memref<512x36xf32, #tpu.memory_space<vmem>>, vector<512x4xf32>
    tpu.vector_store %arg5[%c0_8, %c16], %20 {strides = array<i32>} : memref<512x36xf32, #tpu.memory_space<vmem>>, vector<512x4xf32>,
    %22 = vector.extract_strided_slice %6 {offsets = [0, 1, 2, 0], sizes = [2, 16, 16, 4], strides = [1, 1, 1, 1]} : vector<2x18x18x4xf32> to vector<2x16x16x4xf32>
    %23 = vector.shape_cast %22 : vector<2x16x16x4xf32> to vector<512x4xf32>
    %c0_9 = arith.constant 0 : index
    %c20 = arith.constant 20 : index
    %24 = vector.load %arg5[%c0_9, %c20] : memref<512x36xf32, #tpu.memory_space<vmem>>, vector<512x4xf32>
    tpu.vector_store %arg5[%c0_9, %c20], %23 {strides = array<i32>} : memref<512x36xf32, #tpu.memory_space<vmem>>, vector<512x4xf32>,
    %25 = vector.extract_strided_slice %6 {offsets = [0, 2, 0, 0], sizes = [2, 16, 16, 4], strides = [1, 1, 1, 1]} : vector<2x18x18x4xf32> to vector<2x16x16x4xf32>
    %26 = vector.shape_cast %25 : vector<2x16x16x4xf32> to vector<512x4xf32>
    %c0_10 = arith.constant 0 : index
    %c24 = arith.constant 24 : index
    %27 = vector.load %arg5[%c0_10, %c24] : memref<512x36xf32, #tpu.memory_space<vmem>>, vector<512x4xf32>
    tpu.vector_store %arg5[%c0_10, %c24], %26 {strides = array<i32>} : memref<512x36xf32, #tpu.memory_space<vmem>>, vector<512x4xf32>,
    %28 = vector.extract_strided_slice %6 {offsets = [0, 2, 1, 0], sizes = [2, 16, 16, 4], strides = [1, 1, 1, 1]} : vector<2x18x18x4xf32> to vector<2x16x16x4xf32>
    %29 = vector.shape_cast %28 : vector<2x16x16x4xf32> to vector<512x4xf32>
    %c0_11 = arith.constant 0 : index
    %c28 = arith.constant 28 : index
    %30 = vector.load %arg5[%c0_11, %c28] : memref<512x36xf32, #tpu.memory_space<vmem>>, vector<512x4xf32>
    tpu.vector_store %arg5[%c0_11, %c28], %29 {strides = array<i32>} : memref<512x36xf32, #tpu.memory_space<vmem>>, vector<512x4xf32>,
    %31 = vector.extract_strided_slice %6 {offsets = [0, 2, 2, 0], sizes = [2, 16, 16, 4], strides = [1, 1, 1, 1]} : vector<2x18x18x4xf32> to vector<2x16x16x4xf32>
    %32 = vector.shape_cast %31 : vector<2x16x16x4xf32> to vector<512x4xf32>
    %c0_12 = arith.constant 0 : index
    %c32 = arith.constant 32 : index
    %33 = vector.load %arg5[%c0_12, %c32] : memref<512x36xf32, #tpu.memory_space<vmem>>, vector<512x4xf32>
    tpu.vector_store %arg5[%c0_12, %c32], %32 {strides = array<i32>} : memref<512x36xf32, #tpu.memory_space<vmem>>, vector<512x4xf32>,
    %c0_13 = arith.constant 0 : index
    %c0_14 = arith.constant 0 : index
    %34 = vector.load %arg2[%c0_13, %c0_14] : memref<8x36xf32, #tpu.memory_space<vmem>>, vector<8x36xf32>
    %c0_15 = arith.constant 0 : index
    %c0_16 = arith.constant 0 : index
    %35 = vector.load %arg5[%c0_15, %c0_16] : memref<512x36xf32, #tpu.memory_space<vmem>>, vector<512x36xf32>
    %cst = arith.constant dense<0.000000e+00> : vector<8x512xf32>
    %36 = tpu.matmul %34, %35, %cst {dimension_numbers = #tpu.dot_dimension_numbers<[1], [1], [0], [0], [0, 0, 1, 0], [], []>} : vector<8x36xf32>, vector<512x36xf32>, vector<8x512xf32> -> vector<8x512xf32>
    %c0_17 = arith.constant 0 : index
    %c0_18 = arith.constant 0 : index
    %37 = vector.load %arg3[%c0_17, %c0_18] : memref<8x1xf32, #tpu.memory_space<vmem>>, vector<8x1xf32>
    %38 = vector.broadcast %37 : vector<8x1xf32> to vector<8x512xf32>
    %39 = arith.addf %36, %38 : vector<8x512xf32>
    %40 = vector.extract_strided_slice %39 {offsets = [0, 0], sizes = [8, 256], strides = [1, 1]} : vector<8x512xf32> to vector<8x256xf32>
    %c0_19 = arith.constant 0 : index
    %c0_20 = arith.constant 0 : index
    %c0_21 = arith.constant 0 : index
    %41 = vector.load %arg4[%c0_19, %c0_20, %c0_21] : memref<2x8x256xf32, #tpu.memory_space<vmem>>, vector<1x8x256xf32>
    %42 = vector.shape_cast %41 : vector<1x8x256xf32> to vector<8x256xf32>
    %43 = vector.shape_cast %40 : vector<8x256xf32> to vector<1x8x256xf32>
    tpu.vector_store %arg4[%c0_19, %c0_20, %c0_21], %43 {strides = array<i32>} : memref<2x8x256xf32, #tpu.memory_space<vmem>>, vector<1x8x256xf32>,
    %44 = vector.extract_strided_slice %39 {offsets = [0, 256], sizes = [8, 256], strides = [1, 1]} : vector<8x512xf32> to vector<8x256xf32>
    %c1 = arith.constant 1 : index
    %c0_22 = arith.constant 0 : index
    %c0_23 = arith.constant 0 : index
    %45 = vector.load %arg4[%c1, %c0_22, %c0_23] : memref<2x8x256xf32, #tpu.memory_space<vmem>>, vector<1x8x256xf32>
    %46 = vector.shape_cast %45 : vector<1x8x256xf32> to vector<8x256xf32>
    %47 = vector.shape_cast %44 : vector<8x256xf32> to vector<1x8x256xf32>
    tpu.vector_store %arg4[%c1, %c0_22, %c0_23], %47 {strides = array<i32>} : memref<2x8x256xf32, #tpu.memory_space<vmem>>, vector<1x8x256xf32>,
    return
  }
  func.func @transform_0(%arg0: i32) -> (i32, i32, i32, i32) {
    %c0_i32 = arith.constant 0 : i32
    %c0_i32_0 = arith.constant 0 : i32
    %c0_i32_1 = arith.constant 0 : i32
    %c0_i32_2 = arith.constant 0 : i32
    return %arg0, %c0_i32, %c0_i32_0, %c0_i32_1 : i32, i32, i32, i32
  }
  func.func @transform_1(%arg0: i32) -> (i32, i32) {
    %c0_i32 = arith.constant 0 : i32
    %c0_i32_0 = arith.constant 0 : i32
    %c0_i32_1 = arith.constant 0 : i32
    return %c0_i32, %c0_i32_0 : i32, i32
  }
  func.func @transform_2(%arg0: i32) -> (i32, i32) {
    %c0_i32 = arith.constant 0 : i32
    %c0_i32_0 = arith.constant 0 : i32
    %c0_i32_1 = arith.constant 0 : i32
    return %c0_i32, %c0_i32_0 : i32, i32
  }
  func.func @transform_3(%arg0: i32) -> (i32, i32, i32) {
    %c0_i32 = arith.constant 0 : i32
    %c0_i32_0 = arith.constant 0 : i32
    %c0_i32_1 = arith.constant 0 : i32
    return %arg0, %c0_i32, %c0_i32_0 : i32, i32, i32
  }
}

</mosaic_0001>

<bundles_post_ra>
// kernel: tpu_custom_call.1
= control target key start
LH: loop header
LB: loop body
LE: loop exit
PB: predicated region body
PF: predicated region fallthrough
CT: control target
= control target key end

     0   :  { %vm207_vm0 = vcmask 1040384   ;;  %vm651_vm1 = vcmask 1046528   ;;  %s6267_s0 = inlined_call_operand.vmem [shape: f32[2,16,16,4], index: 0, kind: input, shape index: {}]   ;;  %s6268_s1 = inlined_call_operand.vmem [shape: f32[8,36], index: 1, kind: input, shape index: {}]   ;;  %s6269_s2 = inlined_call_operand.vmem [shape: f32[8,1], index: 2, kind: input, shape index: {}]   ;;  %s6270_s3 = inlined_call_operand.hbm [shape: f32[2,8,256], index: 3, kind: output, shape index: {}]  }
   0x1   :  { %v17_v0 = vld [vmem:[%s6267_s0 + $0x10] sm:$0xff]  ;;  %v18_v1 = vld [vmem:[%s6267_s0 + $0x18] sm:$0xff]  ;;  %v15_v2 = vld [vmem:[%s6267_s0] sm:$0xff] }
   0x2   :  { %v111_v3 = vrot.slane %v17_v0, 1  ;;  %v208_v4 = vrot.slane %v17_v0, 7  ;;  %v209_v5 = vrot.slane %v18_v1, 7  ;;  %v16_v6 = vld [vmem:[%s6267_s0 + $0x8] sm:$0xff]  ;;  %v112_v7 = vrot.slane %v15_v2, 1  ;;  %v19_v18 = vld [vmem:[%s6267_s0 + $0x20] sm:$0xff] }
   0x3   :  { %v211_v8 = vrot.slane %v15_v2, 7  ;;  %v212_v9 = vrot.slane %v16_v6, 7  ;;  %v398_v10 = vrot.slane %v18_v1, 5  ;;  %v399_v11 = vrot.slane %v16_v6, 5  ;;  %v21_v22 = vld [vmem:[%s6267_s0 + $0x30] sm:$0xff] }
   0x4   :  { %v3493_v12 = vsel %vm207_vm0, %v208_v4, %v209_v5  ;;  %v3496_v13 = vsel %vm207_vm0, %v111_v3, %v208_v4 }
   0x5   :  { %v652_v14 = vrot.slane %v3496_v13, 1  ;;  %v653_v15 = vrot.slane %v3493_v12, 1  ;;  %v3501_v16 = vsel %vm207_vm0, %v211_v8, %v212_v9  ;;  %v3504_v17 = vsel %vm207_vm0, %v112_v7, %v211_v8 }
   0x6   :  { %v657_v19 = vrot.slane %v3504_v17, 1  ;;  %v658_v20 = vrot.slane %v3501_v16, 1  ;;  %v3512_v21 = vsel %vm207_vm0, %v209_v5, %v398_v10 }
   0x7   :  { %8 = vsyncpa [#allocation4], 0  ;;  %v3518_v23 = vsel %vm651_vm1, %v652_v14, %v653_v15  ;;  %v3521_v24 = vsel %vm207_vm0, %v212_v9, %v399_v11  ;;  %v22_v25 = vld [vmem:[%s6267_s0 + $0x38] sm:$0xff]  ;;  %v20_v26 = vld [vmem:[%s6267_s0 + $0x28] sm:$0xff]  ;;  %s3449_s28 = smov 4   ;;  %v113_v28 = vrot.slane %v19_v18, 1 }
   0x8   :  { %6580 = vst [vmem:[#allocation6_spill] sm:$0xff] %v3518_v23  ;;  %802 = vrot.lane.b32.xlu0 %v3518_v23, %s3449_s28  ;;  %v3532_v27 = vsel %vm651_vm1, %v657_v19, %v658_v20  ;;  %v655_v29 = vrot.slane %v3512_v21, 1  ;;  %v114_v30 = vrot.slane %v21_v22, 1  ;;  %v217_v31 = vrot.slane %v21_v22, 7  ;;  %v23_v45 = vld [vmem:[%s6267_s0 + $0x40] sm:$0xff]  ;;  %v24_v46 = vld [vmem:[%s6267_s0 + $0x48] sm:$0xff] }
   0x9   :  { %6581 = vst [vmem:[#allocation7_spill] sm:$0xff] %v3532_v27  ;;  %806 = vrot.lane.b32.xlu1 %v3532_v27, %s3449_s28  ;;  %v660_v32 = vrot.slane %v3521_v24, 1  ;;  %v218_v33 = vrot.slane %v22_v25, 7  ;;  %v214_v34 = vrot.slane %v19_v18, 7  ;;  %v215_v35 = vrot.slane %v20_v26, 7  ;;  %v25_v51 = vld [vmem:[%s6267_s0 + $0x50] sm:$0xff] }
   0xa   :  { %v401_v36 = vrot.slane %v22_v25, 5  ;;  %v3545_v39 = vsel %vm651_vm1, %v653_v15, %v655_v29  ;;  %v3548_v40 = vsel %vm207_vm0, %v114_v30, %v217_v31  ;;  %v400_v49 = vrot.slane %v20_v26, 5  ;;  %v26_v52 = vld [vmem:[%s6267_s0 + $0x58] sm:$0xff]  ;;  %v27_v5 = vld [vmem:[%s6267_s0 + $0x60] sm:$0xff]  ;;  %v28_v9 = vld [vmem:[%s6267_s0 + $0x68] sm:$0xff]  ;;  %s3450_s29 = smov 8  }
   0xb   :  { %v3539_v37 = vsel %vm207_vm0, %v214_v34, %v215_v35  ;;  %v3542_v38 = vsel %vm207_vm0, %v113_v28, %v214_v34  ;;  %6582 = vst [vmem:[#allocation8_spill] sm:$0xff] %v3545_v39  ;;  %v3553_v43 = vsel %vm651_vm1, %v658_v20, %v660_v32  ;;  %v3556_v44 = vsel %vm207_vm0, %v217_v31, %v218_v33  ;;  %v30_v34 = vld [vmem:[%s6267_s0 + $0x78] sm:$0xff]  ;;  %s3453_s11 = smov 20   ;;  %s3454_s12 = smov 24  }
   0xc   :  { %v662_v41 = vrot.slane %v3542_v38, 1  ;;  %v663_v42 = vrot.slane %v3539_v37, 1  ;;  %6583 = vst [vmem:[#allocation9_spill] sm:$0xff] %v3553_v43  ;;  %v3565_v47 = vsel %vm207_vm0, %v218_v33, %v401_v36  ;;  %v667_v50 = vrot.slane %v3548_v40, 1  ;;  %v29_v33 = vld [vmem:[%s6267_s0 + $0x70] sm:$0xff]  ;;  %s3455_s13 = smov 28  }
   0xd   :  { %v668_v53 = vrot.slane %v3556_v44, 1  ;;  %v220_v54 = vrot.slane %v23_v45, 7  ;;  %v221_v55 = vrot.slane %v24_v46, 7  ;;  %v3585_v56 = vsel %vm207_vm0, %v215_v35, %v400_v49  ;;  %s3456_s14 = smov 32   ;;  %s3331_s19 = sshll.u32 %s6270_s3, 4  ;;  %s3332_s19 = int_to_ptr.hbm [resolvable:$true] %s3331_s19 }
   0xe   :  { %v3568_v48 = vsel %vm651_vm1, %v662_v41, %v663_v42  ;;  %v670_v57 = vrot.slane %v3565_v47, 1  ;;  %v402_v58 = vrot.slane %v24_v46, 5  ;;  %v665_v59 = vrot.slane %v3585_v56, 1  ;;  %s3458_s20 = smov [#allocation3]   ;;  %s3459_s22 = smov 256  }
   0xf   :  { %6584 = vst [vmem:[#allocation10_spill] sm:$0xff] %v3568_v48  ;;  %810 = vrot.lane.b32.xlu2 %v3568_v48, %s3449_s28  ;;  %v116_v60 = vrot.slane %v25_v51, 1  ;;  %v223_v61 = vrot.slane %v25_v51, 7  ;;  %v224_v62 = vrot.slane %v26_v52, 7  ;;  %v115_v63 = vrot.slane %v23_v45, 1  ;;  %v32_v45 = vld [vmem:[%s6267_s0 + $0x88] sm:$0xff] }
  0x10   :  { %804 = vrot.lane.b32.xlu0 %v3545_v39, %s3449_s28  ;;  %v3590_v0 = vsel %vm651_vm1, %v667_v50, %v668_v53  ;;  %v3593_v1 = vsel %vm207_vm0, %v220_v54, %v221_v55  ;;  %v3596_v2 = vsel %vm651_vm1, %v663_v42, %v665_v59  ;;  %v3599_v3 = vsel %vm651_vm1, %v668_v53, %v670_v57  ;;  %v31_v42 = vld [vmem:[%s6267_s0 + $0x80] sm:$0xff]  ;;  %s3329_s21 = sshll.u32 %s3458_s20, 4  ;;  %s3330_s21 = int_to_ptr.vmem [resolvable:$true] %s3329_s21 }
  0x11   :  { %808 = vrot.lane.b32.xlu1 %v3553_v43, %s3449_s28  ;;  %6585 = vst [vmem:[#allocation11_spill] sm:$0xff] %v3590_v0  ;;  %v3602_v4 = vsel %vm207_vm0, %v221_v55, %v402_v58  ;;  %v3608_v6 = vsel %vm207_vm0, %v115_v63, %v220_v54  ;;  %v3611_v7 = vsel %vm207_vm0, %v223_v61, %v224_v62  ;;  %v673_v10 = vrot.slane %v3593_v1, 1 }
  0x12   :  { %6586 = vst [vmem:[#allocation12_spill] sm:$0xff] %v3596_v2  ;;  %v3614_v8 = vsel %vm207_vm0, %v116_v60, %v223_v61  ;;  %v675_v11 = vrot.slane %v3602_v4, 1  ;;  %v117_v14 = vrot.slane %v27_v5, 1  ;;  %v226_v15 = vrot.slane %v27_v5, 7  ;;  %v33_v5 = vld [vmem:[%s6267_s0 + $0x90] sm:$0xff] }
  0x13   :  { %6587 = vst [vmem:[#allocation13_spill] sm:$0xff] %v3599_v3  ;;  %v672_v18 = vrot.slane %v3608_v6, 1  ;;  %v677_v19 = vrot.slane %v3614_v8, 1  ;;  %v678_v20 = vrot.slane %v3611_v7, 1  ;;  %v227_v22 = vrot.slane %v28_v9, 7 }
  0x14   :  { %v403_v25 = vrot.slane %v26_v52, 5  ;;  %v404_v26 = vrot.slane %v28_v9, 5  ;;  %v3631_v28 = vsel %vm651_vm1, %v673_v10, %v675_v11  ;;  %v3634_v29 = vsel %vm207_vm0, %v117_v14, %v226_v15  ;;  %v34_v14 = vld [vmem:[%s6267_s0 + $0x98] sm:$0xff] }
  0x15   :  { %6588 = vst [vmem:[#allocation14_spill] sm:$0xff] %v3631_v28  ;;  %v3637_v30 = vsel %vm651_vm1, %v672_v18, %v673_v10  ;;  %v3640_v31 = vsel %vm651_vm1, %v677_v19, %v678_v20  ;;  %v3643_v32 = vsel %vm207_vm0, %v226_v15, %v227_v22  ;;  %v682_v41 = vrot.slane %v3634_v29, 1 }
  0x16   :  { %6589 = vst [vmem:[#allocation15_spill] sm:$0xff] %v3637_v30  ;;  %v3652_v35 = vsel %vm207_vm0, %v224_v62, %v403_v25  ;;  %v3655_v36 = vsel %vm207_vm0, %v227_v22, %v404_v26  ;;  %v683_v46 = vrot.slane %v3643_v32, 1  ;;  %v229_v49 = vrot.slane %v29_v33, 7 }
  0x17   :  { %812 = vrot.lane.b32.xlu2 %v3596_v2, %s3449_s28  ;;  %6590 = vst [vmem:[#allocation16_spill] sm:$0xff] %v3640_v31  ;;  %v230_v50 = vrot.slane %v30_v34, 7  ;;  %v680_v51 = vrot.slane %v3652_v35, 1  ;;  %v685_v52 = vrot.slane %v3655_v36, 1  ;;  %v405_v53 = vrot.slane %v30_v34, 5 }
  0x18   :  { %814 = vrot.lane.b32.xlu0 %v3590_v0, %s3449_s28  ;;  %v118_v54 = vrot.slane %v29_v33, 1  ;;  %v119_v55 = vrot.slane %v31_v42, 1  ;;  %v232_v57 = vrot.slane %v31_v42, 7  ;;  %v233_v58 = vrot.slane %v32_v45, 7 }
  0x19   :  { %816 = vrot.lane.b32.xlu1 %v3599_v3, %s3449_s28  ;;  %v3674_v59 = vsel %vm651_vm1, %v682_v41, %v683_v46  ;;  %v3677_v60 = vsel %vm207_vm0, %v229_v49, %v230_v50  ;;  %v3680_v61 = vsel %vm651_vm1, %v678_v20, %v680_v51  ;;  %v3683_v62 = vsel %vm651_vm1, %v683_v46, %v685_v52 }
  0x1a   :  { %6591 = vst [vmem:[#allocation17_spill] sm:$0xff] %v3674_v59  ;;  %v3686_v63 = vsel %vm207_vm0, %v230_v50, %v405_v53  ;;  %v3692_v9 = vsel %vm207_vm0, %v118_v54, %v229_v49  ;;  %v3695_v10 = vsel %vm207_vm0, %v232_v57, %v233_v58  ;;  %v3698_v11 = vsel %vm207_vm0, %v119_v55, %v232_v57  ;;  %v35_v50 = vld [vmem:[%s6267_s0 + $0xa0] sm:$0xff] }
  0x1b   :  { %6592 = vst [vmem:[#allocation18_spill] sm:$0xff] %v3680_v61  ;;  %v688_v15 = vrot.slane %v3677_v60, 1  ;;  %v690_v18 = vrot.slane %v3686_v63, 1  ;;  %v120_v19 = vrot.slane %v33_v5, 1  ;;  %v235_v20 = vrot.slane %v33_v5, 7  ;;  %v37_v5 = vld [vmem:[%s6267_s0 + $0xb0] sm:$0xff] }
  0x1c   :  { %6593 = vst [vmem:[#allocation19_spill] sm:$0xff] %v3683_v62  ;;  %v687_v22 = vrot.slane %v3692_v9, 1  ;;  %v692_v25 = vrot.slane %v3698_v11, 1  ;;  %v693_v26 = vrot.slane %v3695_v10, 1  ;;  %v236_v33 = vrot.slane %v34_v14, 7 }
  0x1d   :  { %6594 = vst [vmem:[#allocation20_spill] sm:$0xff] %v3686_v63  ;;  %v406_v34 = vrot.slane %v32_v45, 5  ;;  %v407_v41 = vrot.slane %v34_v14, 5  ;;  %v3715_v42 = vsel %vm651_vm1, %v688_v15, %v690_v18  ;;  %v3718_v46 = vsel %vm207_vm0, %v120_v19, %v235_v20  ;;  %v36_v45 = vld [vmem:[%s6267_s0 + $0xa8] sm:$0xff] }
  0x1e   :  { %6595 = vst [vmem:[#allocation21_spill] sm:$0xff] %v3715_v42  ;;  %v3721_v49 = vsel %vm651_vm1, %v687_v22, %v688_v15  ;;  %v3727_v51 = vsel %vm651_vm1, %v692_v25, %v693_v26  ;;  %v3730_v52 = vsel %vm207_vm0, %v235_v20, %v236_v33  ;;  %v697_v55 = vrot.slane %v3718_v46, 1 }
  0x1f   :  { %818 = vrot.lane.b32.xlu2 %v3637_v30, %s3449_s28  ;;  %6596 = vst [vmem:[#allocation22_spill] sm:$0xff] %v3721_v49  ;;  %v3736_v53 = vsel %vm207_vm0, %v233_v58, %v406_v34  ;;  %v3739_v54 = vsel %vm207_vm0, %v236_v33, %v407_v41  ;;  %v238_v57 = vrot.slane %v35_v50, 7  ;;  %v38_v58 = vld [vmem:[%s6267_s0 + $0xb8] sm:$0xff]  ;;  %v698_v14 = vrot.slane %v3730_v52, 1 }
  0x20   :  { %820 = vrot.lane.b32.xlu0 %v3631_v28, %s3449_s28  ;;  %6597 = vst [vmem:[#allocation23_spill] sm:$0xff] %v3727_v51  ;;  %v239_v15 = vrot.slane %v36_v45, 7  ;;  %v408_v18 = vrot.slane %v36_v45, 5  ;;  %v695_v19 = vrot.slane %v3736_v53, 1  ;;  %v700_v20 = vrot.slane %v3739_v54, 1 }
  0x21   :  { %822 = vrot.lane.b32.xlu1 %v3640_v31, %s3449_s28  ;;  %6598 = vst [vmem:[#allocation24_spill] sm:$0xff] %v3736_v53  ;;  %v121_v22 = vrot.slane %v35_v50, 1  ;;  %v122_v25 = vrot.slane %v37_v5, 1  ;;  %v241_v33 = vrot.slane %v37_v5, 7  ;;  %v242_v34 = vrot.slane %v38_v58, 7  ;;  %v39_v50 = vld [vmem:[%s6267_s0 + $0xc0] sm:$0xff] }
  0x22   :  { %6599 = vst [vmem:[#allocation25_spill] sm:$0xff] %v3739_v54  ;;  %v3758_v41 = vsel %vm651_vm1, %v697_v55, %v698_v14  ;;  %v3770_v45 = vsel %vm651_vm1, %v698_v14, %v700_v20  ;;  %v40_v55 = vld [vmem:[%s6267_s0 + $0xc8] sm:$0xff]  ;;  %vm526_vm2 = vcmask 31744   ;;  %vm982_vm3 = vcmask 64544  }
  0x23   :  { %6600 = vst [vmem:[#allocation26_spill] sm:$0xff] %v3758_v41  ;;  %v3779_v5 = vsel %vm207_vm0, %v121_v22, %v238_v57  ;;  %v245_v20 = vrot.slane %v40_v55, 7  ;;  %vm1047_vm4 = vcmask 1045504   ;;  %vm1378_vm5 = vcmask 97344  }
  0x24   :  { %6604 = vst [vmem:[#allocation30_spill] sm:$0xff] %v3770_v45  ;;  %v702_v22 = vrot.slane %v3779_v5, 1  ;;  %vm1637_vm6 = vcmask 130144   ;;  %vm1906_vm7 = vcmask 162944   ;;  %vm2173_vm8 = vcmask 195744  }
  0x25   :  { %6605 = vst [vmem:[#allocation31_spill] sm:$0xff] %v3779_v5  ;;  %vm2418_vm9 = vcmask 228544   ;;  %vm2663_vm10 = vcmask 261344   ;;  %vm2908_vm11 = vcmask 294144   ;;  %vm3044_vm12 = vcmask 293888  }
  0x26   :  { %533 = vst.msk [vmem:[#allocation2 + $0x30] sm:$0xff] %vm526_vm2, %v3542_v38 }
  0x27   :  { %824 = vrot.lane.b32.xlu2 %v3680_v61, %s3449_s28  ;;  %527 = vst.msk [vmem:[#allocation2] sm:$0xff] %vm526_vm2, %v3496_v13 }
  0x28   :  { %826 = vrot.lane.b32.xlu0 %v3674_v59, %s3449_s28  ;;  %528 = vst.msk [vmem:[#allocation2 + $0x8] sm:$0xff] %vm526_vm2, %v3493_v12 }
  0x29   :  { %828 = vrot.lane.b32.xlu1 %v3683_v62, %s3449_s28  ;;  %v3767_v62 = vsel %vm651_vm1, %v693_v26, %v695_v19  ;;  %v3785_v26 = vsel %vm207_vm0, %v122_v25, %v241_v33  ;;  %v244_v19 = vrot.slane %v39_v50, 7  ;;  %529 = vst.msk [vmem:[#allocation2 + $0x10] sm:$0xff] %vm526_vm2, %v3504_v17 }
  0x2a   :  { %6603 = vst [vmem:[#allocation29_spill] sm:$0xff] %v3767_v62  ;;  %v707_v25 = vrot.slane %v3785_v26, 1 }
  0x2b   :  { %v3802_v31 = vsel %vm207_vm0, %v244_v19, %v245_v20  ;;  %530 = vst.msk [vmem:[#allocation2 + $0x18] sm:$0xff] %vm526_vm2, %v3501_v16 }
  0x2c   :  { %6607 = vst [vmem:[#allocation33_spill] sm:$0xff] %v3802_v31 }
  0x2d   :  { %531 = vst.msk [vmem:[#allocation2 + $0x20] sm:$0xff] %vm526_vm2, %v3496_v13 }
  0x2e   :  { %532 = vst.msk [vmem:[#allocation2 + $0x28] sm:$0xff] %vm526_vm2, %v3493_v12 }
  0x2f   :  { %830 = vrot.lane.b32.xlu2 %v3721_v49, %s3449_s28  ;;  %v410_v49 = vrot.slane %v40_v55, 5  ;;  %v42_v55 = vld [vmem:[%s6267_s0 + $0xd8] sm:$0xff]  ;;  %534 = vst.msk [vmem:[#allocation2 + $0x38] sm:$0xff] %vm526_vm2, %v3539_v37 }
  0x30   :  { %832 = vrot.lane.b32.xlu0 %v3715_v42, %s3449_s28  ;;  %v3761_v42 = vsel %vm207_vm0, %v238_v57, %v239_v15  ;;  %v123_v57 = vrot.slane %v39_v50, 1  ;;  %535 = vst.msk [vmem:[#allocation2 + $0x40] sm:$0xff] %vm526_vm2, %v3548_v40 }
  0x31   :  { %834 = vrot.lane.b32.xlu1 %v3727_v51, %s3449_s28  ;;  %6601 = vst [vmem:[#allocation27_spill] sm:$0xff] %v3761_v42  ;;  %v3764_v51 = vsel %vm207_vm0, %v239_v15, %v408_v18  ;;  %v3782_v15 = vsel %vm207_vm0, %v241_v33, %v242_v34  ;;  %v703_v14 = vrot.slane %v3761_v42, 1 }
  0x32   :  { %6602 = vst [vmem:[#allocation28_spill] sm:$0xff] %v3764_v51  ;;  %v705_v18 = vrot.slane %v3764_v51, 1  ;;  %v708_v33 = vrot.slane %v3782_v15, 1 }
  0x33   :  { %v3808_v50 = vsel %vm651_vm1, %v702_v22, %v703_v14  ;;  %v43_v22 = vld [vmem:[%s6267_s0 + $0xe0] sm:$0xff]  ;;  %536 = vst.msk [vmem:[#allocation2 + $0x48] sm:$0xff] %vm526_vm2, %v3556_v44 }
  0x34   :  { %v3799_v59 = vsel %vm651_vm1, %v703_v14, %v705_v18  ;;  %6609 = vst [vmem:[#allocation35_spill] sm:$0xff] %v3808_v50  ;;  %v250_v28 = vrot.slane %v43_v22, 7 }
  0x35   :  { %6606 = vst [vmem:[#allocation32_spill] sm:$0xff] %v3799_v59 }
  0x36   :  { %537 = vst.msk [vmem:[#allocation2 + $0x50] sm:$0xff] %vm526_vm2, %v3608_v6 }
  0x37   :  { %836 = vrot.lane.b32.xlu2 %v3767_v62, %s3449_s28  ;;  %v3805_v62 = vsel %vm207_vm0, %v123_v57, %v244_v19  ;;  %v3823_v57 = vsel %vm207_vm0, %v245_v20, %v410_v49  ;;  %v713_v19 = vrot.slane %v3802_v31, 1  ;;  %v411_v20 = vrot.slane %v42_v55, 5  ;;  %538 = vst.msk [vmem:[#allocation2 + $0x58] sm:$0xff] %vm526_vm2, %v3593_v1 }
  0x38   :  { %838 = vrot.lane.b32.xlu0 %v3758_v41, %s3449_s28  ;;  %v409_v41 = vrot.slane %v38_v58, 5  ;;  %6608 = vst [vmem:[#allocation34_spill] sm:$0xff] %v3805_v62  ;;  %v41_v58 = vld [vmem:[%s6267_s0 + $0xd0] sm:$0xff]  ;;  %v712_v14 = vrot.slane %v3805_v62, 1 }
  0x39   :  { %840 = vrot.lane.b32.xlu1 %v3770_v45, %s3449_s28  ;;  %v3811_v45 = vsel %vm651_vm1, %v707_v25, %v708_v33  ;;  %6612 = vst [vmem:[#allocation38_spill] sm:$0xff] %v3823_v57  ;;  %v247_v49 = vrot.slane %v41_v58, 7  ;;  %v124_v61 = vrot.slane %v41_v58, 1  ;;  %v49_v58 = vld [vmem:[%s6267_s0 + $0x110] sm:$0xff] }
  0x3a   :  { %6610 = vst [vmem:[#allocation36_spill] sm:$0xff] %v3811_v45  ;;  %v3820_v18 = vsel %vm207_vm0, %v242_v34, %v409_v41  ;;  %v44_v34 = vld [vmem:[%s6267_s0 + $0xe8] sm:$0xff]  ;;  %v248_v41 = vrot.slane %v42_v55, 7  ;;  %v3842_v30 = vsel %vm651_vm1, %v712_v14, %v713_v19  ;;  %v50_v14 = vld [vmem:[%s6267_s0 + $0x118] sm:$0xff] }
  0x3b   :  { %6611 = vst [vmem:[#allocation37_spill] sm:$0xff] %v3820_v18  ;;  %v710_v25 = vrot.slane %v3820_v18, 1  ;;  %v251_v3 = vrot.slane %v44_v34, 7  ;;  %v414_v2 = vrot.slane %v50_v14, 5  ;;  %v56_v18 = vld [vmem:[%s6267_s0 + $0x148] sm:$0xff] }
  0x3c   :  { %6613 = vst [vmem:[#allocation39_spill] sm:$0xff] %v3842_v30  ;;  %v3845_v0 = vsel %vm207_vm0, %v247_v49, %v248_v41  ;;  %v3848_v48 = vsel %vm207_vm0, %v248_v41, %v411_v20  ;;  %v257_v20 = vrot.slane %v50_v14, 7 }
  0x3d   :  { %6614 = vst [vmem:[#allocation40_spill] sm:$0xff] %v3845_v0  ;;  %v3866_v41 = vsel %vm207_vm0, %v250_v28, %v251_v3 }
  0x3e   :  { %6615 = vst [vmem:[#allocation41_spill] sm:$0xff] %v3848_v48 }
  0x3f   :  { %842 = vrot.lane.b32.xlu2 %v3808_v50, %s3449_s28  ;;  %v125_v50 = vrot.slane %v43_v22, 1  ;;  %v3863_v22 = vsel %vm207_vm0, %v124_v61, %v247_v49  ;;  %v127_v61 = vrot.slane %v49_v58, 1  ;;  %v256_v49 = vrot.slane %v49_v58, 7  ;;  %539 = vst.msk [vmem:[#allocation2 + $0x60] sm:$0xff] %vm526_vm2, %v3614_v8 }
  0x40   :  { %844 = vrot.lane.b32.xlu0 %v3799_v59, %s3449_s28  ;;  %v715_v59 = vrot.slane %v3823_v57, 1  ;;  %6618 = vst [vmem:[#allocation44_spill] sm:$0xff] %v3863_v22 }
  0x41   :  { %846 = vrot.lane.b32.xlu1 %v3811_v45, %s3449_s28  ;;  %v3851_v45 = vsel %vm651_vm1, %v708_v33, %v710_v25  ;;  %v3869_v33 = vsel %vm207_vm0, %v125_v50, %v250_v28  ;;  %v717_v25 = vrot.slane %v3863_v22, 1  ;;  %v723_v50 = vrot.slane %v3866_v41, 1  ;;  %540 = vst.msk [vmem:[#allocation2 + $0x68] sm:$0xff] %vm526_vm2, %v3611_v7 }
  0x42   :  { %6616 = vst [vmem:[#allocation42_spill] sm:$0xff] %v3851_v45  ;;  %v3854_v55 = vsel %vm651_vm1, %v713_v19, %v715_v59  ;;  %v718_v59 = vrot.slane %v3845_v0, 1  ;;  %v720_v19 = vrot.slane %v3848_v48, 1  ;;  %v722_v28 = vrot.slane %v3869_v33, 1 }
  0x43   :  { %6617 = vst [vmem:[#allocation43_spill] sm:$0xff] %v3854_v55  ;;  %v3886_v43 = vsel %vm207_vm0, %v256_v49, %v257_v20 }
  0x44   :  { %v3883_v39 = vsel %vm651_vm1, %v718_v59, %v720_v19  ;;  %6620 = vst [vmem:[#allocation46_spill] sm:$0xff] %v3886_v43  ;;  %v3892_v58 = vsel %vm651_vm1, %v717_v25, %v718_v59  ;;  %v3898_v23 = vsel %vm651_vm1, %v722_v28, %v723_v50  ;;  %v3907_v19 = vsel %vm207_vm0, %v257_v20, %v414_v2  ;;  %v51_v25 = vld [vmem:[%s6267_s0 + $0x120] sm:$0xff]  ;;  %v52_v2 = vld [vmem:[%s6267_s0 + $0x128] sm:$0xff] }
  0x45   :  { %6619 = vst [vmem:[#allocation45_spill] sm:$0xff] %v3883_v39  ;;  %v730_v28 = vrot.slane %v3907_v19, 1  ;;  %v262_v27 = vrot.slane %v51_v25, 7  ;;  %v263_v48 = vrot.slane %v52_v2, 7 }
  0x46   :  { %6621 = vst [vmem:[#allocation47_spill] sm:$0xff] %v3892_v58 }
  0x47   :  { %848 = vrot.lane.b32.xlu2 %v3851_v45, %s3449_s28  ;;  %v3889_v45 = vsel %vm207_vm0, %v127_v61, %v256_v49  ;;  %6622 = vst [vmem:[#allocation48_spill] sm:$0xff] %v3898_v23  ;;  %v728_v61 = vrot.slane %v3886_v43, 1 }
  0x48   :  { %850 = vrot.lane.b32.xlu0 %v3842_v30, %s3449_s28  ;;  %v412_v30 = vrot.slane %v44_v34, 5  ;;  %v48_v34 = vld [vmem:[%s6267_s0 + $0x108] sm:$0xff]  ;;  %6624 = vst [vmem:[#allocation50_spill] sm:$0xff] %v3907_v19  ;;  %v727_v59 = vrot.slane %v3889_v45, 1 }
  0x49   :  { %852 = vrot.lane.b32.xlu1 %v3854_v55, %s3449_s28  ;;  %v47_v55 = vld [vmem:[%s6267_s0 + $0x100] sm:$0xff]  ;;  %541 = vst.msk [vmem:[#allocation2 + $0x70] sm:$0xff] %vm526_vm2, %v3634_v29 }
  0x4a   :  { %v3904_v14 = vsel %vm207_vm0, %v251_v3, %v412_v30  ;;  %v259_v49 = vrot.slane %v47_v55, 7  ;;  %v260_v3 = vrot.slane %v48_v34, 7  ;;  %v415_v30 = vrot.slane %v48_v34, 5  ;;  %542 = vst.msk [vmem:[#allocation2 + $0x78] sm:$0xff] %vm526_vm2, %v3643_v32 }
  0x4b   :  { %6623 = vst [vmem:[#allocation49_spill] sm:$0xff] %v3904_v14  ;;  %v725_v20 = vrot.slane %v3904_v14, 1  ;;  %v3932_v34 = vsel %vm651_vm1, %v727_v59, %v728_v61  ;;  %v53_v59 = vld [vmem:[%s6267_s0 + $0x130] sm:$0xff]  ;;  %v54_v14 = vld [vmem:[%s6267_s0 + $0x138] sm:$0xff] }
  0x4c   :  { %6625 = vst [vmem:[#allocation51_spill] sm:$0xff] %v3932_v34 }
  0x4d   :  { %v3941_v19 = vsel %vm651_vm1, %v723_v50, %v725_v20  ;;  %v3960_v50 = vsel %vm207_vm0, %v262_v27, %v263_v48  ;;  %543 = vst.msk [vmem:[#allocation2 + $0x80] sm:$0xff] %vm526_vm2, %v3692_v9 }
  0x4e   :  { %6628 = vst [vmem:[#allocation54_spill] sm:$0xff] %v3941_v19 }
  0x4f   :  { %854 = vrot.lane.b32.xlu2 %v3892_v58, %s3449_s28  ;;  %v129_v58 = vrot.slane %v51_v25, 1  ;;  %v3946_v25 = vsel %vm651_vm1, %v728_v61, %v730_v28  ;;  %6631 = vst [vmem:[#allocation57_spill] sm:$0xff] %v3960_v50 }
  0x50   :  { %856 = vrot.lane.b32.xlu0 %v3883_v39, %s3449_s28  ;;  %v128_v39 = vrot.slane %v47_v55, 1  ;;  %v3938_v55 = vsel %vm207_vm0, %v260_v3, %v415_v30  ;;  %6629 = vst [vmem:[#allocation55_spill] sm:$0xff] %v3946_v25 }
  0x51   :  { %858 = vrot.lane.b32.xlu1 %v3898_v23, %s3449_s28  ;;  %v3935_v23 = vsel %vm207_vm0, %v259_v49, %v260_v3  ;;  %6627 = vst [vmem:[#allocation53_spill] sm:$0xff] %v3938_v55  ;;  %v3963_v61 = vsel %vm207_vm0, %v129_v58, %v262_v27  ;;  %v130_v27 = vrot.slane %v53_v59, 1  ;;  %v265_v58 = vrot.slane %v53_v59, 7 }
  0x52   :  { %6626 = vst [vmem:[#allocation52_spill] sm:$0xff] %v3935_v23  ;;  %v3955_v3 = vsel %vm207_vm0, %v128_v39, %v259_v49  ;;  %v733_v30 = vrot.slane %v3935_v23, 1  ;;  %v735_v39 = vrot.slane %v3938_v55, 1  ;;  %v266_v49 = vrot.slane %v54_v14, 7 }
  0x53   :  { %6630 = vst [vmem:[#allocation56_spill] sm:$0xff] %v3955_v3  ;;  %v732_v20 = vrot.slane %v3955_v3, 1  ;;  %v737_v28 = vrot.slane %v3963_v61, 1  ;;  %v416_v55 = vrot.slane %v52_v2, 5  ;;  %v3995_v57 = vsel %vm207_vm0, %v130_v27, %v265_v58 }
  0x54   :  { %6632 = vst [vmem:[#allocation58_spill] sm:$0xff] %v3963_v61  ;;  %v3989_v59 = vsel %vm651_vm1, %v733_v30, %v735_v39  ;;  %v55_v39 = vld [vmem:[%s6267_s0 + $0x140] sm:$0xff] }
  0x55   :  { %6633 = vst [vmem:[#allocation59_spill] sm:$0xff] %v3989_v59  ;;  %v3998_v2 = vsel %vm651_vm1, %v732_v20, %v733_v30  ;;  %v4012_v27 = vsel %vm207_vm0, %v263_v48, %v416_v55  ;;  %v57_v48 = vld [vmem:[%s6267_s0 + $0x150] sm:$0xff]  ;;  %v268_v55 = vrot.slane %v55_v39, 7  ;;  %v131_v51 = vrot.slane %v55_v39, 1 }
  0x56   :  { %6635 = vst [vmem:[#allocation61_spill] sm:$0xff] %v3995_v57  ;;  %v132_v54 = vrot.slane %v57_v48, 1  ;;  %v271_v53 = vrot.slane %v57_v48, 7 }
  0x57   :  { %860 = vrot.lane.b32.xlu2 %v3941_v19, %s3449_s28  ;;  %v417_v19 = vrot.slane %v54_v14, 5  ;;  %6636 = vst [vmem:[#allocation62_spill] sm:$0xff] %v3998_v2 }
  0x58   :  { %862 = vrot.lane.b32.xlu0 %v3932_v34, %s3449_s28  ;;  %v738_v34 = vrot.slane %v3960_v50, 1  ;;  %6638 = vst [vmem:[#allocation64_spill] sm:$0xff] %v4012_v27 }
  0x59   :  { %864 = vrot.lane.b32.xlu1 %v3946_v25, %s3449_s28  ;;  %v3992_v25 = vsel %vm207_vm0, %v265_v58, %v266_v49  ;;  %v4017_v30 = vsel %vm207_vm0, %v266_v49, %v417_v19  ;;  %v742_v58 = vrot.slane %v3995_v57, 1  ;;  %v58_v19 = vld [vmem:[%s6267_s0 + $0x158] sm:$0xff]  ;;  %v269_v49 = vrot.slane %v56_v18, 7  ;;  %544 = vst.msk [vmem:[#allocation2 + $0x88] sm:$0xff] %vm526_vm2, %v3677_v60 }
  0x5a   :  { %6634 = vst [vmem:[#allocation60_spill] sm:$0xff] %v3992_v25  ;;  %v4003_v14 = vsel %vm651_vm1, %v737_v28, %v738_v34  ;;  %v743_v20 = vrot.slane %v3992_v25, 1  ;;  %v418_v28 = vrot.slane %v56_v18, 5  ;;  %v272_v63 = vrot.slane %v58_v19, 7 }
  0x5b   :  { %6637 = vst [vmem:[#allocation63_spill] sm:$0xff] %v4003_v14 }
  0x5c   :  { %6639 = vst [vmem:[#allocation65_spill] sm:$0xff] %v4017_v30  ;;  %v4048_v18 = vsel %vm651_vm1, %v742_v58, %v743_v20  ;;  %v59_v58 = vld [vmem:[%s6267_s0 + $0x160] sm:$0xff] }
  0x5d   :  { %545 = vst.msk [vmem:[#allocation2 + $0x90] sm:$0xff] %vm526_vm2, %v3698_v11 }
  0x5e   :  { %6640 = vst [vmem:[#allocation66_spill] sm:$0xff] %v4048_v18 }
  0x5f   :  { %866 = vrot.lane.b32.xlu2 %v3998_v2, %s3449_s28  ;;  %v745_v2 = vrot.slane %v4017_v30, 1  ;;  %v4054_v30 = vsel %vm207_vm0, %v269_v49, %v418_v28  ;;  %546 = vst.msk [vmem:[#allocation2 + $0x98] sm:$0xff] %vm526_vm2, %v3695_v10 }
  0x60   :  { %868 = vrot.lane.b32.xlu0 %v3989_v59, %s3449_s28  ;;  %v740_v59 = vrot.slane %v4012_v27, 1  ;;  %6642 = vst [vmem:[#allocation68_spill] sm:$0xff] %v4054_v30  ;;  %v750_v28 = vrot.slane %v4054_v30, 1  ;;  %v419_v27 = vrot.slane %v58_v19, 5 }
  0x61   :  { %870 = vrot.lane.b32.xlu1 %v4003_v14, %s3449_s28  ;;  %v4051_v14 = vsel %vm207_vm0, %v268_v55, %v269_v49  ;;  %v4062_v48 = vsel %vm651_vm1, %v743_v20, %v745_v2  ;;  %547 = vst.msk [vmem:[#allocation2 + $0xa0] sm:$0xff] %vm526_vm2, %v3718_v46  ;;  %v60_v49 = vld [vmem:[%s6267_s0 + $0x168] sm:$0xff]  ;;  %v4079_v2 = vsel %vm207_vm0, %v132_v54, %v271_v53 }
  0x62   :  { %6641 = vst [vmem:[#allocation67_spill] sm:$0xff] %v4051_v14  ;;  %v4057_v39 = vsel %vm651_vm1, %v738_v34, %v740_v59  ;;  %v4073_v34 = vsel %vm207_vm0, %v131_v51, %v268_v55  ;;  %v4076_v59 = vsel %vm207_vm0, %v271_v53, %v272_v63  ;;  %v748_v20 = vrot.slane %v4051_v14, 1 }
  0x63   :  { %6643 = vst [vmem:[#allocation69_spill] sm:$0xff] %v4057_v39  ;;  %v133_v51 = vrot.slane %v59_v58, 1  ;;  %v274_v53 = vrot.slane %v59_v58, 7  ;;  %v275_v54 = vrot.slane %v60_v49, 7  ;;  %v747_v55 = vrot.slane %v4073_v34, 1 }
  0x64   :  { %6644 = vst [vmem:[#allocation70_spill] sm:$0xff] %v4062_v48  ;;  %v753_v30 = vrot.slane %v4076_v59, 1  ;;  %v4104_v58 = vsel %vm651_vm1, %v748_v20, %v750_v28  ;;  %v62_v28 = vld [vmem:[%s6267_s0 + $0x178] sm:$0xff] }
  0x65   :  { %6645 = vst [vmem:[#allocation71_spill] sm:$0xff] %v4073_v34  ;;  %v4115_v19 = vsel %vm651_vm1, %v747_v55, %v748_v20  ;;  %v421_v55 = vrot.slane %v62_v28, 5 }
  0x66   :  { %6646 = vst [vmem:[#allocation72_spill] sm:$0xff] %v4076_v59 }
  0x67   :  { %6647 = vst [vmem:[#allocation73_spill] sm:$0xff] %v4079_v2  ;;  %872 = vrot.lane.b32.xlu2 %v4057_v39, %s3449_s28 }
  0x68   :  { %548 = vst.msk [vmem:[#allocation2 + $0xa8] sm:$0xff] %vm526_vm2, %v3730_v52  ;;  %874 = vrot.lane.b32.xlu0 %v4048_v18, %s3449_s28  ;;  %v752_v18 = vrot.slane %v4079_v2, 1 }
  0x69   :  { %549 = vst.msk [vmem:[#allocation2 + $0xb0] sm:$0xff] %vm526_vm2, %v3779_v5  ;;  %876 = vrot.lane.b32.xlu1 %v4062_v48, %s3449_s28  ;;  %v811_v39 = vpop.permute.xlu2 %810  ;;  %v420_v48 = vrot.slane %v60_v49, 5  ;;  %v4109_v5 = vsel %vm207_vm0, %v274_v53, %v275_v54  ;;  %v61_v49 = vld [vmem:[%s6267_s0 + $0x170] sm:$0xff] }
  0x6a   :  { %550 = vst.msk [vmem:[#allocation2 + $0xb8] sm:$0xff] %vm526_vm2, %v3761_v42  ;;  %v4112_v42 = vsel %vm207_vm0, %v133_v51, %v274_v53  ;;  %v4129_v51 = vsel %vm207_vm0, %v272_v63, %v419_v27  ;;  %v758_v53 = vrot.slane %v4109_v5, 1  ;;  %v63_v63 = vld [vmem:[%s6267_s0 + $0x180] sm:$0xff]  ;;  %v64_v27 = vld [vmem:[%s6267_s0 + $0x188] sm:$0xff] }
  0x6b   :  { %551 = vst.msk [vmem:[#allocation2 + $0xc0] sm:$0xff] %vm526_vm2, %v3785_v26  ;;  %v757_v20 = vrot.slane %v4112_v42, 1 }
  0x6c   :  { %989 = vst.msk [vmem:[#allocation2 + $0x30] sm:$0xff] %vm982_vm3, %v811_v39  ;;  %v4118_v39 = vsel %vm651_vm1, %v752_v18, %v753_v30  ;;  %v4134_v18 = vsel %vm207_vm0, %v275_v54, %v420_v48  ;;  %v277_v48 = vrot.slane %v61_v49, 7  ;;  %v278_v54 = vrot.slane %v62_v28, 7 }
  0x6d   :  { %552 = vst.msk [vmem:[#allocation2 + $0xc8] sm:$0xff] %vm526_vm2, %v3782_v15  ;;  %v4167_v28 = vsel %vm651_vm1, %v757_v20, %v758_v53  ;;  %v66_v20 = vld [vmem:[%s6267_s0 + $0x198] sm:$0xff] }
  0x6e   :  { %6648 = vst [vmem:[#allocation74_spill] sm:$0xff] %v4104_v58 }
  0x6f   :  { %553 = vst.msk [vmem:[#allocation2 + $0xd0] sm:$0xff] %vm526_vm2, %v3805_v62  ;;  %878 = vrot.lane.b32.xlu2 %v4115_v19, %s3449_s28  ;;  %v281_v62 = vrot.slane %v64_v27, 7 }
  0x70   :  { %6649 = vst [vmem:[#allocation75_spill] sm:$0xff] %v4109_v5  ;;  %880 = vrot.lane.b32.xlu0 %v4104_v58, %s3449_s28  ;;  %v755_v58 = vrot.slane %v4129_v51, 1 }
  0x71   :  { %6650 = vst [vmem:[#allocation76_spill] sm:$0xff] %v4112_v42  ;;  %882 = vrot.lane.b32.xlu1 %v4118_v39, %s3449_s28 }
  0x72   :  { %6651 = vst [vmem:[#allocation77_spill] sm:$0xff] %v4115_v19  ;;  %v760_v19 = vrot.slane %v4134_v18, 1 }
  0x73   :  { %6652 = vst [vmem:[#allocation78_spill] sm:$0xff] %v4118_v39  ;;  %v135_v39 = vrot.slane %v63_v63, 1 }
  0x74   :  { %554 = vst.msk [vmem:[#allocation2 + $0xd8] sm:$0xff] %vm526_vm2, %v3802_v31  ;;  %v280_v31 = vrot.slane %v63_v63, 7  ;;  %v65_v63 = vld [vmem:[%s6267_s0 + $0x190] sm:$0xff] }
  0x75   :  { %6653 = vst [vmem:[#allocation79_spill] sm:$0xff] %v4129_v51  ;;  %v4176_v51 = vsel %vm651_vm1, %v753_v30, %v755_v58 }
  0x76   :  { %555 = vst.msk [vmem:[#allocation2 + $0xe0] sm:$0xff] %vm526_vm2, %v3863_v22  ;;  %v4158_v22 = vpop.permute.xlu2 %812  ;;  %v4195_v30 = vsel %vm207_vm0, %v280_v31, %v281_v62  ;;  %v4198_v58 = vsel %vm207_vm0, %v135_v39, %v280_v31  ;;  %v283_v31 = vrot.slane %v65_v63, 7  ;;  %v284_v39 = vrot.slane %v66_v20, 7 }
  0x77   :  { %6654 = vst [vmem:[#allocation80_spill] sm:$0xff] %v4134_v18  ;;  %v4170_v18 = vsel %vm207_vm0, %v277_v48, %v278_v54  ;;  %884 = vrot.lane.b32.xlu2 %v4176_v51, %s3449_s28 }
  0x78   :  { %556 = vst.msk [vmem:[#allocation2 + $0xe8] sm:$0xff] %vm526_vm2, %v3845_v0  ;;  %v134_v0 = vrot.slane %v61_v49, 1  ;;  %v4173_v49 = vsel %vm207_vm0, %v278_v54, %v421_v55  ;;  %886 = vrot.lane.b32.xlu0 %v4167_v28, %s3449_s28 }
  0x79   :  { %557 = vst.msk [vmem:[#allocation2 + $0xf0] sm:$0xff] %vm526_vm2, %v3869_v33 }
  0x7a   :  { %558 = vst.msk [vmem:[#allocation2 + $0xf8] sm:$0xff] %vm526_vm2, %v3866_v41  ;;  %v4190_v54 = vsel %vm207_vm0, %v134_v0, %v277_v48  ;;  %v765_v0 = vrot.slane %v4173_v49, 1  ;;  %v423_v48 = vrot.slane %v66_v20, 5  ;;  %v4229_v20 = vsel %vm207_vm0, %v283_v31, %v284_v39 }
  0x7b   :  { %559 = vst.msk [vmem:[#allocation2 + $0x100] sm:$0xff] %vm526_vm2, %v3889_v45  ;;  %v762_v55 = vrot.slane %v4190_v54, 1 }
  0x7c   :  { %560 = vst.msk [vmem:[#allocation2 + $0x108] sm:$0xff] %vm526_vm2, %v3886_v43 }
  0x7d   :  { %561 = vst.msk [vmem:[#allocation2 + $0x110] sm:$0xff] %vm526_vm2, %v3955_v3  ;;  %v4184_v3 = vsel %vm651_vm1, %v758_v53, %v760_v19  ;;  %v763_v19 = vrot.slane %v4170_v18, 1  ;;  %v136_v53 = vrot.slane %v65_v63, 1 }
  0x7e   :  { %6655 = vst [vmem:[#allocation81_spill] sm:$0xff] %v4167_v28  ;;  %888 = vrot.lane.b32.xlu1 %v4184_v3, %s3449_s28  ;;  %v803_v28 = vpop.permute.xlu0 %802 }
  0x7f   :  { %6656 = vst [vmem:[#allocation82_spill] sm:$0xff] %v4170_v18  ;;  %v4224_v63 = vsel %vm651_vm1, %v763_v19, %v765_v0 }
  0x80   :  { %6657 = vst [vmem:[#allocation83_spill] sm:$0xff] %v4173_v49  ;;  %v767_v49 = vrot.slane %v4198_v58, 1  ;;  %892 = vrot.lane.b32.xlu0 %v4224_v63, %s3449_s28 }
  0x81   :  { %6658 = vst [vmem:[#allocation84_spill] sm:$0xff] %v4176_v51  ;;  %v768_v51 = vrot.slane %v4195_v30, 1 }
  0x82   :  { %562 = vst.msk [vmem:[#allocation2 + $0x118] sm:$0xff] %vm526_vm2, %v3935_v23  ;;  %v4217_v23 = vpop.permute.xlu2 %818 }
  0x83   :  { %6659 = vst [vmem:[#allocation85_spill] sm:$0xff] %v4184_v3  ;;  %v807_v3 = vpop.permute.xlu1 %806  ;;  %v4243_v0 = vsel %vm651_vm1, %v767_v49, %v768_v51  ;;  %v4262_v49 = vld [vmem:[%s6267_s0 + $0x1b8] sm:$0xff] }
  0x84   :  { %6660 = vst [vmem:[#allocation86_spill] sm:$0xff] %v4190_v54 }
  0x85   :  { %563 = vst.msk [vmem:[#allocation2 + $0x120] sm:$0xff] %vm526_vm2, %v3889_v45 }
  0x86   :  { %6661 = vst [vmem:[#allocation87_spill] sm:$0xff] %v4195_v30  ;;  %894 = vrot.lane.b32.xlu1 %v4243_v0, %s3449_s28 }
  0x87   :  { %6662 = vst [vmem:[#allocation88_spill] sm:$0xff] %v4198_v58 }
  0x88   :  { %564 = vst.msk [vmem:[#allocation2 + $0x128] sm:$0xff] %vm526_vm2, %v3886_v43  ;;  %v422_v43 = vrot.slane %v64_v27, 5  ;;  %v4235_v27 = vsel %vm207_vm0, %v284_v39, %v423_v48 }
  0x89   :  { %565 = vst.msk [vmem:[#allocation2 + $0x130] sm:$0xff] %vm526_vm2, %v3963_v61  ;;  %v775_v39 = vrot.slane %v4235_v27, 1 }
  0x8a   :  { %566 = vst.msk [vmem:[#allocation2 + $0x138] sm:$0xff] %vm526_vm2, %v3960_v50  ;;  %v4232_v50 = vsel %vm207_vm0, %v136_v53, %v283_v31  ;;  %v68_v53 = vld [vmem:[%s6267_s0 + $0x1a8] sm:$0xff]  ;;  %v4252_v31 = vsel %vm207_vm0, %v281_v62, %v422_v43  ;;  %v773_v62 = vrot.slane %v4229_v20, 1 }
  0x8b   :  { %567 = vst.msk [vmem:[#allocation2 + $0x140] sm:$0xff] %vm526_vm2, %v3995_v57  ;;  %v4238_v57 = vsel %vm651_vm1, %v762_v55, %v763_v19  ;;  %v69_v19 = vld [vmem:[%s6267_s0 + $0x1b0] sm:$0xff]  ;;  %v772_v43 = vrot.slane %v4232_v50, 1  ;;  %v287_v55 = vrot.slane %v68_v53, 7 }
  0x8c   :  { %568 = vst.msk [vmem:[#allocation2 + $0x148] sm:$0xff] %vm526_vm2, %v3992_v25  ;;  %890 = vrot.lane.b32.xlu2 %v4238_v57, %s3449_s28  ;;  %v289_v25 = vrot.slane %v69_v19, 7 }
  0x8d   :  { %6663 = vst [vmem:[#allocation89_spill] sm:$0xff] %v4224_v63  ;;  %v770_v63 = vrot.slane %v4252_v31, 1 }
  0x8e   :  { %570 = vst.msk [vmem:[#allocation2 + $0x158] sm:$0xff] %vm526_vm2, %v4051_v14  ;;  %v67_v14 = vld [vmem:[%s6267_s0 + $0x1a0] sm:$0xff] }
  0x8f   :  { %6664 = vst [vmem:[#allocation90_spill] sm:$0xff] %v4229_v20  ;;  %v286_v48 = vrot.slane %v67_v14, 7  ;;  %v137_v61 = vrot.slane %v67_v14, 1 }
  0x90   :  { %6665 = vst [vmem:[#allocation91_spill] sm:$0xff] %v4232_v50 }
  0x91   :  { %6666 = vst [vmem:[#allocation92_spill] sm:$0xff] %v4235_v27  ;;  %v138_v27 = vrot.slane %v69_v19, 1  ;;  %v4296_v19 = vsel %vm651_vm1, %v768_v51, %v770_v63 }
  0x92   :  { %6667 = vst [vmem:[#allocation93_spill] sm:$0xff] %v4238_v57  ;;  %v290_v57 = vrot.slane %v4262_v49, 7 }
  0x93   :  { %571 = vst.msk [vmem:[#allocation2 + $0x160] sm:$0xff] %vm526_vm2, %v4079_v2  ;;  %v4279_v2 = vpop.permute.xlu2 %824 }
  0x94   :  { %6668 = vst [vmem:[#allocation94_spill] sm:$0xff] %v4243_v0  ;;  %v4290_v0 = vsel %vm207_vm0, %v286_v48, %v287_v55  ;;  %v4304_v14 = vsel %vm207_vm0, %v289_v25, %v290_v57  ;;  %896 = vrot.lane.b32.xlu2 %v4296_v19, %s3449_s28 }
  0x95   :  { %6669 = vst [vmem:[#allocation95_spill] sm:$0xff] %v4252_v31  ;;  %v783_v63 = vrot.slane %v4304_v14, 1 }
  0x96   :  { %572 = vst.msk [vmem:[#allocation2 + $0x168] sm:$0xff] %vm526_vm2, %v4076_v59  ;;  %v805_v59 = vpop.permute.xlu0 %804 }
  0x97   :  { %573 = vst.msk [vmem:[#allocation2 + $0x170] sm:$0xff] %vm526_vm2, %v4112_v42  ;;  %v424_v42 = vrot.slane %v68_v53, 5  ;;  %v4287_v53 = vsel %vm651_vm1, %v772_v43, %v773_v62  ;;  %v4313_v43 = vsel %vm207_vm0, %v137_v61, %v286_v48 }
  0x98   :  { %574 = vst.msk [vmem:[#allocation2 + $0x178] sm:$0xff] %vm526_vm2, %v4109_v5  ;;  %v809_v5 = vpop.permute.xlu1 %808  ;;  %898 = vrot.lane.b32.xlu0 %v4287_v53, %s3449_s28 }
  0x99   :  { %983 = vst.msk [vmem:[#allocation2] sm:$0xff] %vm982_vm3, %v803_v28  ;;  %v4293_v31 = vsel %vm207_vm0, %v287_v55, %v424_v42  ;;  %v71_v42 = vld [vmem:[%s6267_s0 + $0x1c0] sm:$0xff] }
  0x9a   :  { %987 = vst.msk [vmem:[#allocation2 + $0x20] sm:$0xff] %vm982_vm3, %v803_v28  ;;  %v4307_v28 = vsel %vm207_vm0, %v138_v27, %v289_v25  ;;  %v778_v25 = vrot.slane %v4290_v0, 1  ;;  %v780_v51 = vrot.slane %v4293_v31, 1  ;;  %v139_v27 = vrot.slane %v71_v42, 1 }
  0x9b   :  { %985 = vst.msk [vmem:[#allocation2 + $0x10] sm:$0xff] %vm982_vm3, %v807_v3  ;;  %v4301_v3 = vsel %vm651_vm1, %v773_v62, %v775_v39  ;;  %v782_v61 = vrot.slane %v4307_v28, 1  ;;  %v777_v62 = vrot.slane %v4313_v43, 1  ;;  %v831_v48 = vpop.permute.xlu2 %830  ;;  %v292_v55 = vrot.slane %v71_v42, 7 }
  0x9c   :  { %569 = vst.msk [vmem:[#allocation2 + $0x150] sm:$0xff] %vm526_vm2, %v4073_v34  ;;  %900 = vrot.lane.b32.xlu1 %v4301_v3, %s3449_s28 }
  0x9d   :  { %6670 = vst [vmem:[#allocation96_spill] sm:$0xff] %v4287_v53  ;;  %v4348_v42 = vsel %vm651_vm1, %v777_v62, %v778_v25 }
  0x9e   :  { %6671 = vst [vmem:[#allocation97_spill] sm:$0xff] %v4293_v31  ;;  %v815_v39 = vpop.permute.xlu0 %814  ;;  %v425_v31 = vrot.slane %v4262_v49, 5  ;;  %902 = vrot.lane.b32.xlu2 %v4348_v42, %s3449_s28 }
  0x9f   :  { %6672 = vst [vmem:[#allocation98_spill] sm:$0xff] %v4296_v19 }
  0xa0   :  { %990 = vst.msk [vmem:[#allocation2 + $0x38] sm:$0xff] %vm982_vm3, %v4158_v22  ;;  %v72_v22 = vld [vmem:[%s6267_s0 + $0x1c8] sm:$0xff]  ;;  %v4362_v49 = vsel %vm207_vm0, %v290_v57, %v425_v31  ;;  %v75_v57 = vld [vmem:[%s6267_s0 + $0x1e0] sm:$0xff] }
  0xa1   :  { %6673 = vst [vmem:[#allocation99_spill] sm:$0xff] %v4301_v3  ;;  %v293_v53 = vrot.slane %v72_v22, 7  ;;  %v426_v19 = vrot.slane %v72_v22, 5  ;;  %v4342_v3 = vsel %vm651_vm1, %v778_v25, %v780_v51  ;;  %v73_v22 = vld [vmem:[%s6267_s0 + $0x1d0] sm:$0xff]  ;;  %v74_v25 = vld [vmem:[%s6267_s0 + $0x1d8] sm:$0xff]  ;;  %v76_v31 = vld [vmem:[%s6267_s0 + $0x1e8] sm:$0xff] }
  0xa2   :  { %6674 = vst [vmem:[#allocation100_spill] sm:$0xff] %v4304_v14  ;;  %904 = vrot.lane.b32.xlu0 %v4342_v3, %s3449_s28 }
  0xa3   :  { %6675 = vst [vmem:[#allocation101_spill] sm:$0xff] %v4307_v28  ;;  %v837_v62 = vpop.permute.xlu2 %836 }
  0xa4   :  { %576 = vst.msk [vmem:[#allocation2 + $0x188] sm:$0xff] %vm526_vm2, %v4170_v18 }
  0xa5   :  { %577 = vst.msk [vmem:[#allocation2 + $0x190] sm:$0xff] %vm526_vm2, %v4198_v58  ;;  %v4345_v58 = vsel %vm651_vm1, %v782_v61, %v783_v63  ;;  %v785_v61 = vrot.slane %v4362_v49, 1 }
  0xa6   :  { %578 = vst.msk [vmem:[#allocation2 + $0x198] sm:$0xff] %vm526_vm2, %v4195_v30  ;;  %v817_v30 = vpop.permute.xlu1 %816  ;;  %906 = vrot.lane.b32.xlu1 %v4345_v58, %s3449_s28 }
  0xa7   :  { %984 = vst.msk [vmem:[#allocation2 + $0x8] sm:$0xff] %vm982_vm3, %v805_v59 }
  0xa8   :  { %988 = vst.msk [vmem:[#allocation2 + $0x28] sm:$0xff] %vm982_vm3, %v805_v59  ;;  %v4353_v59 = vsel %vm207_vm0, %v292_v55, %v293_v53 }
  0xa9   :  { %986 = vst.msk [vmem:[#allocation2 + $0x18] sm:$0xff] %vm982_vm3, %v809_v5  ;;  %v4356_v5 = vsel %vm207_vm0, %v139_v27, %v292_v55  ;;  %v821_v27 = vpop.permute.xlu0 %820  ;;  %v296_v55 = vrot.slane %v74_v25, 7 }
  0xaa   :  { %993 = vst.msk [vmem:[#allocation2 + $0x50] sm:$0xff] %vm982_vm3, %v4217_v23  ;;  %v4359_v23 = vsel %vm207_vm0, %v293_v53, %v426_v19  ;;  %v787_v53 = vrot.slane %v4356_v5, 1  ;;  %v788_v19 = vrot.slane %v4353_v59, 1 }
  0xab   :  { %6676 = vst [vmem:[#allocation102_spill] sm:$0xff] %v4342_v3  ;;  %v790_v51 = vrot.slane %v4359_v23, 1  ;;  %v141_v3 = vrot.slane %v75_v57, 1 }
  0xac   :  { %6677 = vst [vmem:[#allocation103_spill] sm:$0xff] %v4345_v58 }
  0xad   :  { %6678 = vst [vmem:[#allocation104_spill] sm:$0xff] %v4348_v42  ;;  %v427_v42 = vrot.slane %v74_v25, 5 }
  0xae   :  { %579 = vst.msk [vmem:[#allocation2 + $0x1a0] sm:$0xff] %vm526_vm2, %v4232_v50  ;;  %v823_v58 = vpop.permute.xlu1 %822  ;;  %v299_v50 = vrot.slane %v76_v31, 7 }
  0xaf   :  { %6679 = vst [vmem:[#allocation105_spill] sm:$0xff] %v4353_v59  ;;  %v4413_v25 = vsel %vm207_vm0, %v296_v55, %v427_v42 }
  0xb0   :  { %6680 = vst [vmem:[#allocation106_spill] sm:$0xff] %v4356_v5 }
  0xb1   :  { %6681 = vst [vmem:[#allocation107_spill] sm:$0xff] %v4359_v23  ;;  %v4399_v23 = vsel %vm651_vm1, %v787_v53, %v788_v19 }
  0xb2   :  { %6682 = vst [vmem:[#allocation108_spill] sm:$0xff] %v4362_v49  ;;  %v4402_v49 = vsel %vm651_vm1, %v783_v63, %v785_v61  ;;  %910 = vrot.lane.b32.xlu0 %v4399_v23, %s3449_s28  ;;  %v843_v61 = vpop.permute.xlu2 %842 }
  0xb3   :  { %580 = vst.msk [vmem:[#allocation2 + $0x1a8] sm:$0xff] %vm526_vm2, %v4229_v20  ;;  %v298_v20 = vrot.slane %v75_v57, 7  ;;  %908 = vrot.lane.b32.xlu2 %v4402_v49, %s3449_s28 }
  0xb4   :  { %991 = vst.msk [vmem:[#allocation2 + $0x40] sm:$0xff] %vm982_vm3, %v815_v39  ;;  %v295_v39 = vrot.slane %v73_v22, 7 }
  0xb5   :  { %992 = vst.msk [vmem:[#allocation2 + $0x48] sm:$0xff] %vm982_vm3, %v817_v30  ;;  %v140_v30 = vrot.slane %v73_v22, 1  ;;  %v4420_v63 = vsel %vm207_vm0, %v298_v20, %v299_v50  ;;  %v4423_v53 = vsel %vm207_vm0, %v141_v3, %v298_v20 }
  0xb6   :  { %575 = vst.msk [vmem:[#allocation2 + $0x180] sm:$0xff] %vm526_vm2, %v4190_v54  ;;  %v4410_v22 = vsel %vm207_vm0, %v295_v39, %v296_v55  ;;  %v797_v3 = vrot.slane %v4423_v53, 1 }
  0xb7   :  { %996 = vst.msk [vmem:[#allocation2 + $0x68] sm:$0xff] %vm982_vm3, %v4279_v2  ;;  %v4407_v2 = vsel %vm651_vm1, %v788_v19, %v790_v51  ;;  %v4416_v57 = vsel %vm207_vm0, %v140_v30, %v295_v39  ;;  %v793_v42 = vrot.slane %v4410_v22, 1  ;;  %v795_v19 = vrot.slane %v4413_v25, 1 }
  0xb8   :  { %582 = vst.msk [vmem:[#allocation2 + $0x1b8] sm:$0xff] %vm526_vm2, %v4290_v0  ;;  %912 = vrot.lane.b32.xlu1 %v4407_v2, %s3449_s28  ;;  %v792_v20 = vrot.slane %v4416_v57, 1  ;;  %v798_v51 = vrot.slane %v4420_v63, 1 }
  0xb9   :  { %583 = vst.msk [vmem:[#allocation2 + $0x1c0] sm:$0xff] %vm526_vm2, %v4307_v28  ;;  %v4445_v39 = vsel %vm651_vm1, %v793_v42, %v795_v19 }
  0xba   :  { %6683 = vst [vmem:[#allocation109_spill] sm:$0xff] %v4399_v23  ;;  %v4448_v55 = vsel %vm651_vm1, %v792_v20, %v793_v42  ;;  %v4453_v30 = vsel %vm651_vm1, %v797_v3, %v798_v51  ;;  %916 = vrot.lane.b32.xlu0 %v4445_v39, %s3449_s28  ;;  %v1049_v42 = vrot.slane %v3493_v12, 2  ;;  %v1051_v20 = vrot.slane %v3512_v21, 2 }
  0xbb   :  { %6684 = vst [vmem:[#allocation110_spill] sm:$0xff] %v4402_v49  ;;  %914 = vrot.lane.b32.xlu2 %v4448_v55, %s3449_s28  ;;  %v1054_v21 = vrot.slane %v3501_v16, 2 }
  0xbc   :  { %584 = vst.msk [vmem:[#allocation2 + $0x1c8] sm:$0xff] %vm526_vm2, %v4304_v14 }
  0xbd   :  { %6685 = vst [vmem:[#allocation111_spill] sm:$0xff] %v4407_v2 }
  0xbe   :  { %6686 = vst [vmem:[#allocation112_spill] sm:$0xff] %v4410_v22 }
  0xbf   :  { %6687 = vst [vmem:[#allocation113_spill] sm:$0xff] %v4416_v57 }
  0xc0   :  { %994 = vst.msk [vmem:[#allocation2 + $0x58] sm:$0xff] %vm982_vm3, %v821_v27  ;;  %v428_v27 = vrot.slane %v76_v31, 5  ;;  %918 = vrot.lane.b32.xlu1 %v4453_v30, %s3449_s28 }
  0xc1   :  { %6688 = vst [vmem:[#allocation114_spill] sm:$0xff] %v4420_v63 }
  0xc2   :  { %6689 = vst [vmem:[#allocation115_spill] sm:$0xff] %v4423_v53  ;;  %v4456_v31 = vsel %vm207_vm0, %v299_v50, %v428_v27  ;;  %v1048_v50 = vrot.slane %v3496_v13, 2 }
  0xc3   :  { %995 = vst.msk [vmem:[#allocation2 + $0x60] sm:$0xff] %vm982_vm3, %v823_v58  ;;  %v827_v58 = vpop.permute.xlu0 %826 }
  0xc4   :  { %999 = vst.msk [vmem:[#allocation2 + $0x80] sm:$0xff] %vm982_vm3, %v831_v48  ;;  %v829_v48 = vpop.permute.xlu1 %828  ;;  %v4479_v27 = vsel %vm1047_vm4, %v1048_v50, %v1049_v42 }
  0xc5   :  { %585 = vst.msk [vmem:[#allocation2 + $0x1d0] sm:$0xff] %vm526_vm2, %v4356_v5  ;;  %1198 = vrot.lane.b32.xlu0 %v4479_v27, %s3450_s29 }
  0xc6   :  { %586 = vst.msk [vmem:[#allocation2 + $0x1d8] sm:$0xff] %vm526_vm2, %v4353_v59 }
  0xc7   :  { %997 = vst.msk [vmem:[#allocation2 + $0x70] sm:$0xff] %vm982_vm3, %v827_v58  ;;  %v849_v58 = vpop.permute.xlu2 %848 }
  0xc8   :  { %998 = vst.msk [vmem:[#allocation2 + $0x78] sm:$0xff] %vm982_vm3, %v829_v48 }
  0xc9   :  { %6690 = vst [vmem:[#allocation116_spill] sm:$0xff] %v4445_v39 }
  0xca   :  { %6691 = vst [vmem:[#allocation117_spill] sm:$0xff] %v4448_v55 }
  0xcb   :  { %581 = vst.msk [vmem:[#allocation2 + $0x1b0] sm:$0xff] %vm526_vm2, %v4313_v43  ;;  %v833_v19 = vpop.permute.xlu0 %832 }
  0xcc   :  { %6692 = vst [vmem:[#allocation118_spill] sm:$0xff] %v4453_v30  ;;  %v835_v3 = vpop.permute.xlu1 %834  ;;  %v4485_v30 = vsel %vm1047_vm4, %v1049_v42, %v1051_v20  ;;  %v1058_v42 = vrot.slane %v3542_v38, 2 }
  0xcd   :  { %1002 = vst.msk [vmem:[#allocation2 + $0x98] sm:$0xff] %vm982_vm3, %v837_v62  ;;  %v800_v62 = vrot.slane %v4456_v31, 1  ;;  %1200 = vrot.lane.b32.xlu1 %v4485_v30, %s3450_s29 }
  0xce   :  { %588 = vst.msk [vmem:[#allocation2 + $0x1e8] sm:$0xff] %vm526_vm2, %v4410_v22 }
  0xcf   :  { %589 = vst.msk [vmem:[#allocation2 + $0x1f0] sm:$0xff] %vm526_vm2, %v4423_v53  ;;  %v4482_v48 = vsel %vm651_vm1, %v798_v51, %v800_v62  ;;  %v1056_v51 = vrot.slane %v3521_v24, 2  ;;  %v1059_v62 = vrot.slane %v3539_v37, 2 }
  0xd0   :  { %590 = vst.msk [vmem:[#allocation2 + $0x1f8] sm:$0xff] %vm526_vm2, %v4420_v63  ;;  %920 = vrot.lane.b32.xlu2 %v4482_v48, %s3449_s28  ;;  %s3451_s28 = smov 12  }
  0xd1   :  { %1000 = vst.msk [vmem:[#allocation2 + $0x88] sm:$0xff] %vm982_vm3, %v833_v19  ;;  %v855_v19 = vpop.permute.xlu2 %854 }
  0xd2   :  { %1001 = vst.msk [vmem:[#allocation2 + $0x90] sm:$0xff] %vm982_vm3, %v835_v3  ;;  %v4511_v3 = vsel %vm1047_vm4, %v1058_v42, %v1059_v62 }
  0xd3   :  { %1005 = vst.msk [vmem:[#allocation2 + $0xb0] sm:$0xff] %vm982_vm3, %v843_v61  ;;  %v1053_v61 = vrot.slane %v3504_v17, 2  ;;  %v839_v50 = vpop.permute.xlu0 %838 }
  0xd4   :  { %6693 = vst [vmem:[#allocation119_spill] sm:$0xff] %v4479_v27  ;;  %v841_v20 = vpop.permute.xlu1 %840 }
  0xd5   :  { %6694 = vst [vmem:[#allocation120_spill] sm:$0xff] %v4482_v48  ;;  %v4508_v24 = vsel %vm1047_vm4, %v1053_v61, %v1054_v21  ;;  %1206 = vrot.lane.b32.xlu1 %v4511_v3, %s3450_s29  ;;  %v1066_v61 = vrot.slane %v3565_v47, 2  ;;  %v1069_v47 = vrot.slane %v3593_v1, 2 }
  0xd6   :  { %6695 = vst [vmem:[#allocation121_spill] sm:$0xff] %v4485_v30 }
  0xd7   :  { %587 = vst.msk [vmem:[#allocation2 + $0x1e0] sm:$0xff] %vm526_vm2, %v4416_v57 }
  0xd8   :  { %1008 = vst.msk [vmem:[#allocation2 + $0xc8] sm:$0xff] %vm982_vm3, %v849_v58  ;;  %v4504_v58 = vsel %vm1047_vm4, %v1054_v21, %v1056_v51  ;;  %1202 = vrot.lane.b32.xlu2 %v4508_v24, %s3450_s29  ;;  %v1063_v51 = vrot.slane %v3548_v40, 2 }
  0xd9   :  { %1003 = vst.msk [vmem:[#allocation2 + $0xa0] sm:$0xff] %vm982_vm3, %v839_v50  ;;  %1204 = vrot.lane.b32.xlu0 %v4504_v58, %s3450_s29  ;;  %v1064_v50 = vrot.slane %v3556_v44, 2  ;;  %v861_v42 = vpop.permute.xlu2 %860 }
  0xda   :  { %1004 = vst.msk [vmem:[#allocation2 + $0xa8] sm:$0xff] %vm982_vm3, %v841_v20 }
  0xdb   :  { %6696 = vst [vmem:[#allocation122_spill] sm:$0xff] %v4504_v58  ;;  %v845_v21 = vpop.permute.xlu0 %844  ;;  %v4526_v30 = vsel %vm1047_vm4, %v1063_v51, %v1064_v50  ;;  %v4533_v27 = vsel %vm1047_vm4, %v1064_v50, %v1066_v61  ;;  %v1068_v51 = vrot.slane %v3608_v6, 2  ;;  %v1074_v50 = vrot.slane %v3611_v7, 2 }
  0xdc   :  { %1011 = vst.msk [vmem:[#allocation2 + $0xe0] sm:$0xff] %vm982_vm3, %v855_v19  ;;  %v1061_v19 = vrot.slane %v3585_v56, 2  ;;  %v847_v20 = vpop.permute.xlu1 %846  ;;  %v1071_v56 = vrot.slane %v3602_v4, 2 }
  0xdd   :  { %6697 = vst [vmem:[#allocation123_spill] sm:$0xff] %v4508_v24  ;;  %1212 = vrot.lane.b32.xlu1 %v4533_v27, %s3450_s29  ;;  %v4553_v4 = vsel %vm1047_vm4, %v1068_v51, %v1069_v47  ;;  %v1081_v51 = vrot.slane %v3655_v36, 2  ;;  %v6708_v36 = vld [vmem:[#allocation20_spill] sm:$0xff] }
  0xde   :  { %6698 = vst [vmem:[#allocation124_spill] sm:$0xff] %v4511_v3  ;;  %v4530_v3 = vsel %vm1047_vm4, %v1059_v62, %v1061_v19  ;;  %v1073_v19 = vrot.slane %v3614_v8, 2 }
  0xdf   :  { %1006 = vst.msk [vmem:[#allocation2 + $0xb8] sm:$0xff] %vm982_vm3, %v845_v21 }
  0xe0   :  { %1007 = vst.msk [vmem:[#allocation2 + $0xc0] sm:$0xff] %vm982_vm3, %v847_v20  ;;  %1208 = vrot.lane.b32.xlu2 %v4530_v3, %s3450_s29  ;;  %v4556_v20 = vsel %vm1047_vm4, %v1073_v19, %v1074_v50 }
  0xe1   :  { %6699 = vst [vmem:[#allocation125_spill] sm:$0xff] %v4526_v30  ;;  %1210 = vrot.lane.b32.xlu0 %v4526_v30, %s3450_s29  ;;  %v867_v21 = vpop.permute.xlu2 %866 }
  0xe2   :  { %1014 = vst.msk [vmem:[#allocation2 + $0xf8] sm:$0xff] %vm982_vm3, %v861_v42  ;;  %v4549_v42 = vsel %vm1047_vm4, %v1069_v47, %v1071_v56  ;;  %v1078_v56 = vrot.slane %v3634_v29, 2 }
  0xe3   :  { %6700 = vst [vmem:[#allocation126_spill] sm:$0xff] %v4530_v3  ;;  %v851_v62 = vpop.permute.xlu0 %850 }
  0xe4   :  { %6701 = vst [vmem:[#allocation127_spill] sm:$0xff] %v4533_v27  ;;  %v853_v61 = vpop.permute.xlu1 %852 }
  0xe5   :  { %1009 = vst.msk [vmem:[#allocation2 + $0xd0] sm:$0xff] %vm982_vm3, %v851_v62  ;;  %1218 = vrot.lane.b32.xlu1 %v4556_v20, %s3450_s29  ;;  %v1079_v62 = vrot.slane %v3643_v32, 2 }
  0xe6   :  { %1010 = vst.msk [vmem:[#allocation2 + $0xd8] sm:$0xff] %vm982_vm3, %v853_v61 }
  0xe7   :  { %6702 = vst [vmem:[#allocation128_spill] sm:$0xff] %v4549_v42 }
  0xe8   :  { %1017 = vst.msk [vmem:[#allocation2 + $0x110] sm:$0xff] %vm982_vm3, %v867_v21  ;;  %1214 = vrot.lane.b32.xlu2 %v4553_v4, %s3450_s29  ;;  %v1076_v21 = vrot.slane %v3652_v35, 2  ;;  %v1084_v35 = vrot.slane %v3677_v60, 2 }
  0xe9   :  { %6703 = vst [vmem:[#allocation129_spill] sm:$0xff] %v4553_v4  ;;  %1216 = vrot.lane.b32.xlu0 %v4549_v42, %s3450_s29  ;;  %v873_v19 = vpop.permute.xlu2 %872  ;;  %v4571_v42 = vsel %vm1047_vm4, %v1078_v56, %v1079_v62  ;;  %v4578_v4 = vsel %vm1047_vm4, %v1079_v62, %v1081_v51  ;;  %v1086_v56 = vrot.slane %v6708_v36, 2  ;;  %v1089_v62 = vrot.slane %v3695_v10, 2 }
  0xea   :  { %6704 = vst [vmem:[#allocation130_spill] sm:$0xff] %v4556_v20  ;;  %v4575_v20 = vsel %vm1047_vm4, %v1074_v50, %v1076_v21  ;;  %v1088_v21 = vrot.slane %v3698_v11, 2 }
  0xeb   :  { %v857_v47 = vpop.permute.xlu0 %856  ;;  %6705 = vst [vmem:[#allocation131_spill] sm:$0xff] %v4571_v42 }
  0xec   :  { %1012 = vst.msk [vmem:[#allocation2 + $0xe8] sm:$0xff] %vm982_vm3, %v857_v47  ;;  %v859_v61 = vpop.permute.xlu1 %858  ;;  %v1083_v47 = vrot.slane %v3692_v9, 2 }
  0xed   :  { %1013 = vst.msk [vmem:[#allocation2 + $0xf0] sm:$0xff] %vm982_vm3, %v859_v61  ;;  %1224 = vrot.lane.b32.xlu1 %v4578_v4, %s3450_s29  ;;  %v4595_v61 = vsel %vm1047_vm4, %v1084_v35, %v1086_v56  ;;  %v1093_v56 = vrot.slane %v3718_v46, 2 }
  0xee   :  { %1022 = vst.msk [vmem:[#allocation2 + $0x138] sm:$0xff] %vm982_vm3, %v873_v19  ;;  %v4598_v36 = vsel %vm1047_vm4, %v1083_v47, %v1084_v35  ;;  %v1094_v35 = vrot.slane %v3730_v52, 2  ;;  %v6712_v47 = vld [vmem:[#allocation24_spill] sm:$0xff] }
  0xef   :  { %6706 = vst [vmem:[#allocation132_spill] sm:$0xff] %v4575_v20 }
  0xf0   :  { %6707 = vst [vmem:[#allocation133_spill] sm:$0xff] %v4578_v4  ;;  %1220 = vrot.lane.b32.xlu2 %v4575_v20, %s3450_s29 }
  0xf1   :  { %1222 = vrot.lane.b32.xlu0 %v4571_v42, %s3450_s29  ;;  %v879_v51 = vpop.permute.xlu2 %878  ;;  %6709 = vst [vmem:[#allocation20_spill] sm:$0xff] %v4595_v61  ;;  %v4602_v42 = vsel %vm1047_vm4, %v1088_v21, %v1089_v62  ;;  %v6713_v21 = vld [vmem:[#allocation25_spill] sm:$0xff] }
  0xf2   :  { %6710 = vst [vmem:[#allocation134_spill] sm:$0xff] %v4598_v36  ;;  %v1096_v4 = vrot.slane %v6713_v21, 2 }
  0xf3   :  { %v863_v50 = vpop.permute.xlu0 %862  ;;  %6711 = vst [vmem:[#allocation135_spill] sm:$0xff] %v4602_v42 }
  0xf4   :  { %1015 = vst.msk [vmem:[#allocation2 + $0x100] sm:$0xff] %vm982_vm3, %v863_v50  ;;  %v865_v19 = vpop.permute.xlu1 %864 }
  0xf5   :  { %1019 = vst.msk [vmem:[#allocation2 + $0x120] sm:$0xff] %vm982_vm3, %v863_v50  ;;  %1230 = vrot.lane.b32.xlu1 %v4602_v42, %s3450_s29  ;;  %v1091_v50 = vrot.slane %v6712_v47, 2  ;;  %v6717_v47 = vld [vmem:[#allocation27_spill] sm:$0xff] }
  0xf6   :  { %1016 = vst.msk [vmem:[#allocation2 + $0x108] sm:$0xff] %vm982_vm3, %v865_v19 }
  0xf7   :  { %1020 = vst.msk [vmem:[#allocation2 + $0x128] sm:$0xff] %vm982_vm3, %v865_v19  ;;  %v4622_v42 = vsel %vm1047_vm4, %v1089_v62, %v1091_v50  ;;  %v1103_v50 = vrot.slane %v3785_v26, 2 }
  0xf8   :  { %1025 = vst.msk [vmem:[#allocation2 + $0x150] sm:$0xff] %vm982_vm3, %v879_v51  ;;  %1226 = vrot.lane.b32.xlu2 %v4598_v36, %s3450_s29  ;;  %v4625_v36 = vsel %vm1047_vm4, %v1094_v35, %v1096_v4  ;;  %v1104_v4 = vrot.slane %v3782_v15, 2 }
  0xf9   :  { %1228 = vrot.lane.b32.xlu0 %v4595_v61, %s3450_s29  ;;  %v885_v20 = vpop.permute.xlu2 %884  ;;  %v4618_v61 = vsel %vm1047_vm4, %v1093_v56, %v1094_v35  ;;  %6715 = vst [vmem:[#allocation25_spill] sm:$0xff] %v4622_v42  ;;  %v1099_v56 = vrot.slane %v6717_v47, 2 }
  0xfa   :  { %6714 = vst [vmem:[#allocation24_spill] sm:$0xff] %v4618_v61 }
  0xfb   :  { %v869_v19 = vpop.permute.xlu0 %868  ;;  %1028 = vst.msk [vmem:[#allocation2 + $0x168] sm:$0xff] %vm982_vm3, %v885_v20  ;;  %v6719_v20 = vld [vmem:[#allocation31_spill] sm:$0xff] }
  0xfc   :  { %1018 = vst.msk [vmem:[#allocation2 + $0x118] sm:$0xff] %vm982_vm3, %v869_v19  ;;  %v871_v51 = vpop.permute.xlu1 %870  ;;  %v6718_v19 = vld [vmem:[#allocation28_spill] sm:$0xff] }
  0xfd   :  { %1021 = vst.msk [vmem:[#allocation2 + $0x130] sm:$0xff] %vm982_vm3, %v871_v51  ;;  %1236 = vrot.lane.b32.xlu1 %v4625_v36, %s3450_s29  ;;  %v1101_v21 = vrot.slane %v6718_v19, 2  ;;  %v1098_v51 = vrot.slane %v6719_v20, 2 }
  0xfe   :  { %6716 = vst [vmem:[#allocation136_spill] sm:$0xff] %v4625_v36  ;;  %v4648_v36 = vsel %vm1047_vm4, %v1103_v50, %v1104_v4 }
  0xff   :  { %v4645_v19 = vsel %vm1047_vm4, %v1098_v51, %v1099_v56  ;;  %6722 = vst [vmem:[#allocation31_spill] sm:$0xff] %v4648_v36  ;;  %v6726_v51 = vld [vmem:[#allocation38_spill] sm:$0xff] }
 0x100   :  { %1232 = vrot.lane.b32.xlu2 %v4622_v42, %s3450_s29  ;;  %v4641_v42 = vsel %vm1047_vm4, %v1099_v56, %v1101_v21  ;;  %6721 = vst [vmem:[#allocation28_spill] sm:$0xff] %v4645_v19  ;;  %v1111_v3 = vrot.slane %v6726_v51, 2  ;;  %v6732_v51 = vld [vmem:[#allocation44_spill] sm:$0xff] }
 0x101   :  { %1234 = vrot.lane.b32.xlu0 %v4618_v61, %s3450_s29  ;;  %v891_v35 = vpop.permute.xlu2 %890  ;;  %6720 = vst [vmem:[#allocation27_spill] sm:$0xff] %v4641_v42 }
 0x102   :  { %1031 = vst.msk [vmem:[#allocation2 + $0x180] sm:$0xff] %vm982_vm3, %v891_v35  ;;  %v6725_v35 = vld [vmem:[#allocation37_spill] sm:$0xff] }
 0x103   :  { %v875_v62 = vpop.permute.xlu0 %874  ;;  %v1106_v27 = vrot.slane %v6725_v35, 2  ;;  %v6731_v35 = vld [vmem:[#allocation41_spill] sm:$0xff] }
 0x104   :  { %1023 = vst.msk [vmem:[#allocation2 + $0x140] sm:$0xff] %vm982_vm3, %v875_v62  ;;  %v877_v61 = vpop.permute.xlu1 %876  ;;  %v6724_v62 = vld [vmem:[#allocation33_spill] sm:$0xff] }
 0x105   :  { %1024 = vst.msk [vmem:[#allocation2 + $0x148] sm:$0xff] %vm982_vm3, %v877_v61  ;;  %1242 = vrot.lane.b32.xlu1 %v4648_v36, %s3450_s29  ;;  %v6723_v61 = vld [vmem:[#allocation34_spill] sm:$0xff]  ;;  %v1109_v30 = vrot.slane %v6724_v62, 2  ;;  %v4667_v36 = vsel %vm1047_vm4, %v1104_v4, %v1106_v27  ;;  %v1118_v4 = vrot.slane %v3869_v33, 2 }
 0x106   :  { %v1108_v21 = vrot.slane %v6723_v61, 2  ;;  %6728 = vst [vmem:[#allocation33_spill] sm:$0xff] %v4667_v36 }
 0x108   :  { %1238 = vrot.lane.b32.xlu2 %v4645_v19, %s3450_s29  ;;  %v4670_v19 = vsel %vm1047_vm4, %v1109_v30, %v1111_v3 }
 0x109   :  { %1240 = vrot.lane.b32.xlu0 %v4641_v42, %s3450_s29  ;;  %v897_v50 = vpop.permute.xlu2 %896  ;;  %v4663_v42 = vsel %vm1047_vm4, %v1108_v21, %v1109_v30  ;;  %6729 = vst [vmem:[#allocation37_spill] sm:$0xff] %v4670_v19  ;;  %v1119_v30 = vrot.slane %v3866_v41, 2 }
 0x10a   :  { %6727 = vst [vmem:[#allocation34_spill] sm:$0xff] %v4663_v42 }
 0x10b   :  { %v881_v56 = vpop.permute.xlu0 %880  ;;  %1034 = vst.msk [vmem:[#allocation2 + $0x198] sm:$0xff] %vm982_vm3, %v897_v50  ;;  %v1113_v50 = vrot.slane %v6732_v51, 2 }
 0x10c   :  { %1026 = vst.msk [vmem:[#allocation2 + $0x158] sm:$0xff] %vm982_vm3, %v881_v56  ;;  %v883_v24 = vpop.permute.xlu1 %882  ;;  %v1116_v56 = vrot.slane %v6731_v35, 2 }
 0x10d   :  { %1027 = vst.msk [vmem:[#allocation2 + $0x160] sm:$0xff] %vm982_vm3, %v883_v24  ;;  %1248 = vrot.lane.b32.xlu1 %v4670_v19, %s3450_s29  ;;  %v6730_v24 = vld [vmem:[#allocation40_spill] sm:$0xff]  ;;  %v4693_v19 = vsel %vm1047_vm4, %v1118_v4, %v1119_v30 }
 0x10e   :  { %v1114_v21 = vrot.slane %v6730_v24, 2  ;;  %6735 = vst [vmem:[#allocation41_spill] sm:$0xff] %v4693_v19 }
 0x110   :  { %1244 = vrot.lane.b32.xlu2 %v4667_v36, %s3450_s29  ;;  %v4686_v36 = vsel %vm1047_vm4, %v1114_v21, %v1116_v56  ;;  %v4690_v35 = vsel %vm1047_vm4, %v1113_v50, %v1114_v21  ;;  %v6736_v56 = vld [vmem:[#allocation46_spill] sm:$0xff] }
 0x111   :  { %1246 = vrot.lane.b32.xlu0 %v4663_v42, %s3450_s29  ;;  %v903_v3 = vpop.permute.xlu2 %902  ;;  %6733 = vst [vmem:[#allocation38_spill] sm:$0xff] %v4686_v36  ;;  %v6738_v50 = vld [vmem:[#allocation50_spill] sm:$0xff] }
 0x112   :  { %1037 = vst.msk [vmem:[#allocation2 + $0x1b0] sm:$0xff] %vm982_vm3, %v903_v3  ;;  %v6737_v3 = vld [vmem:[#allocation49_spill] sm:$0xff]  ;;  %v1126_v48 = vrot.slane %v6738_v50, 2  ;;  %v6744_v50 = vld [vmem:[#allocation56_spill] sm:$0xff] }
 0x113   :  { %v887_v27 = vpop.permute.xlu0 %886  ;;  %6734 = vst [vmem:[#allocation40_spill] sm:$0xff] %v4690_v35  ;;  %v1121_v58 = vrot.slane %v6737_v3, 2  ;;  %v6743_v3 = vld [vmem:[#allocation53_spill] sm:$0xff] }
 0x114   :  { %1029 = vst.msk [vmem:[#allocation2 + $0x170] sm:$0xff] %vm982_vm3, %v887_v27  ;;  %v889_v42 = vpop.permute.xlu1 %888  ;;  %v1124_v27 = vrot.slane %v6736_v56, 2 }
 0x115   :  { %1030 = vst.msk [vmem:[#allocation2 + $0x178] sm:$0xff] %vm982_vm3, %v889_v42  ;;  %1254 = vrot.lane.b32.xlu1 %v4693_v19, %s3450_s29  ;;  %v1123_v42 = vrot.slane %v3889_v45, 2  ;;  %v4712_v19 = vsel %vm1047_vm4, %v1119_v30, %v1121_v58  ;;  %v6745_v30 = vld [vmem:[#allocation58_spill] sm:$0xff] }
 0x116   :  { %6740 = vst [vmem:[#allocation49_spill] sm:$0xff] %v4712_v19  ;;  %v1133_v39 = vrot.slane %v6745_v30, 2 }
 0x118   :  { %1250 = vrot.lane.b32.xlu2 %v4690_v35, %s3450_s29  ;;  %v4715_v35 = vsel %vm1047_vm4, %v1124_v27, %v1126_v48  ;;  %v6746_v48 = vld [vmem:[#allocation57_spill] sm:$0xff] }
 0x119   :  { %1252 = vrot.lane.b32.xlu0 %v4686_v36, %s3450_s29  ;;  %v909_v4 = vpop.permute.xlu2 %908  ;;  %v4708_v36 = vsel %vm1047_vm4, %v1123_v42, %v1124_v27  ;;  %6741 = vst [vmem:[#allocation50_spill] sm:$0xff] %v4715_v35  ;;  %v1134_v27 = vrot.slane %v6746_v48, 2 }
 0x11a   :  { %6739 = vst [vmem:[#allocation44_spill] sm:$0xff] %v4708_v36 }
 0x11b   :  { %v893_v21 = vpop.permute.xlu0 %892  ;;  %1040 = vst.msk [vmem:[#allocation2 + $0x1c8] sm:$0xff] %vm982_vm3, %v909_v4  ;;  %v1128_v4 = vrot.slane %v6744_v50, 2 }
 0x11c   :  { %1032 = vst.msk [vmem:[#allocation2 + $0x188] sm:$0xff] %vm982_vm3, %v893_v21  ;;  %v895_v55 = vpop.permute.xlu1 %894  ;;  %v1131_v21 = vrot.slane %v6743_v3, 2 }
 0x11d   :  { %1033 = vst.msk [vmem:[#allocation2 + $0x190] sm:$0xff] %vm982_vm3, %v895_v55  ;;  %1260 = vrot.lane.b32.xlu1 %v4715_v35, %s3450_s29  ;;  %v6742_v55 = vld [vmem:[#allocation52_spill] sm:$0xff]  ;;  %v4738_v35 = vsel %vm1047_vm4, %v1133_v39, %v1134_v27 }
 0x11e   :  { %v1129_v42 = vrot.slane %v6742_v55, 2  ;;  %6749 = vst [vmem:[#allocation56_spill] sm:$0xff] %v4738_v35 }
 0x120   :  { %1256 = vrot.lane.b32.xlu2 %v4712_v19, %s3450_s29  ;;  %v4731_v19 = vsel %vm1047_vm4, %v1129_v42, %v1131_v21  ;;  %v4735_v3 = vsel %vm1047_vm4, %v1128_v4, %v1129_v42  ;;  %v6753_v4 = vld [vmem:[#allocation65_spill] sm:$0xff] }
 0x121   :  { %1258 = vrot.lane.b32.xlu0 %v4708_v36, %s3450_s29  ;;  %v915_v2 = vpop.permute.xlu2 %914  ;;  %6747 = vst [vmem:[#allocation52_spill] sm:$0xff] %v4731_v19  ;;  %v1141_v48 = vrot.slane %v6753_v4, 2  ;;  %v1143_v4 = vrot.slane %v4073_v34, 2 }
 0x122   :  { %1043 = vst.msk [vmem:[#allocation2 + $0x1e0] sm:$0xff] %vm982_vm3, %v915_v2  ;;  %v6752_v2 = vld [vmem:[#allocation64_spill] sm:$0xff] }
 0x123   :  { %v899_v58 = vpop.permute.xlu0 %898  ;;  %6748 = vst [vmem:[#allocation53_spill] sm:$0xff] %v4735_v3  ;;  %v1136_v23 = vrot.slane %v6752_v2, 2  ;;  %v6758_v2 = vld [vmem:[#allocation68_spill] sm:$0xff] }
 0x124   :  { %1035 = vst.msk [vmem:[#allocation2 + $0x1a0] sm:$0xff] %vm982_vm3, %v899_v58  ;;  %v901_v36 = vpop.permute.xlu1 %900  ;;  %v6751_v58 = vld [vmem:[#allocation60_spill] sm:$0xff] }
 0x125   :  { %1036 = vst.msk [vmem:[#allocation2 + $0x1a8] sm:$0xff] %vm982_vm3, %v901_v36  ;;  %1266 = vrot.lane.b32.xlu1 %v4738_v35, %s3450_s29  ;;  %v6750_v36 = vld [vmem:[#allocation61_spill] sm:$0xff]  ;;  %v1139_v49 = vrot.slane %v6751_v58, 2  ;;  %v4757_v35 = vsel %vm1047_vm4, %v1134_v27, %v1136_v23 }
 0x126   :  { %v1138_v21 = vrot.slane %v6750_v36, 2  ;;  %6755 = vst [vmem:[#allocation65_spill] sm:$0xff] %v4757_v35  ;;  %v6759_v27 = vld [vmem:[#allocation73_spill] sm:$0xff] }
 0x128   :  { %1262 = vrot.lane.b32.xlu2 %v4735_v3, %s3450_s29  ;;  %v4760_v3 = vsel %vm1047_vm4, %v1139_v49, %v1141_v48 }
 0x129   :  { %1264 = vrot.lane.b32.xlu0 %v4731_v19, %s3450_s29  ;;  %v4753_v19 = vsel %vm1047_vm4, %v1138_v21, %v1139_v49  ;;  %6756 = vst [vmem:[#allocation137_spill] sm:$0xff] %v4760_v3  ;;  %v6760_v49 = vld [vmem:[#allocation72_spill] sm:$0xff] }
 0x12a   :  { %v921_v39 = vpop.permute.xlu2 %920  ;;  %6754 = vst [vmem:[#allocation64_spill] sm:$0xff] %v4753_v19  ;;  %v1149_v48 = vrot.slane %v6760_v49, 2 }
 0x12b   :  { %v905_v42 = vpop.permute.xlu0 %904  ;;  %1046 = vst.msk [vmem:[#allocation2 + $0x1f8] sm:$0xff] %vm982_vm3, %v921_v39  ;;  %v1148_v39 = vrot.slane %v6759_v27, 2 }
 0x12c   :  { %1038 = vst.msk [vmem:[#allocation2 + $0x1b8] sm:$0xff] %vm982_vm3, %v905_v42  ;;  %v907_v56 = vpop.permute.xlu1 %906  ;;  %v1146_v42 = vrot.slane %v6758_v2, 2 }
 0x12d   :  { %1039 = vst.msk [vmem:[#allocation2 + $0x1c0] sm:$0xff] %vm982_vm3, %v907_v56  ;;  %1272 = vrot.lane.b32.xlu1 %v4760_v3, %s3450_s29  ;;  %v6757_v56 = vld [vmem:[#allocation67_spill] sm:$0xff] }
 0x12e   :  { %v1144_v21 = vrot.slane %v6757_v56, 2 }
 0x130   :  { %1268 = vrot.lane.b32.xlu2 %v4757_v35, %s3450_s29  ;;  %v4776_v3 = vsel %vm1047_vm4, %v1144_v21, %v1146_v42  ;;  %v4780_v2 = vsel %vm1047_vm4, %v1143_v4, %v1144_v21  ;;  %v4783_v35 = vsel %vm1047_vm4, %v1148_v39, %v1149_v48  ;;  %v6767_v4 = vld [vmem:[#allocation80_spill] sm:$0xff] }
 0x131   :  { %1270 = vrot.lane.b32.xlu0 %v4753_v19, %s3450_s29  ;;  %6761 = vst [vmem:[#allocation68_spill] sm:$0xff] %v4776_v3  ;;  %v1156_v27 = vrot.slane %v6767_v4, 2 }
 0x132   :  { %v1203_v36 = vpop.permute.xlu2 %1202  ;;  %6762 = vst [vmem:[#allocation138_spill] sm:$0xff] %v4780_v2 }
 0x133   :  { %v911_v23 = vpop.permute.xlu0 %910  ;;  %1381 = vst.msk [vmem:[#allocation2 + $0x10] sm:$0xff] %vm1378_vm5, %v1203_v36  ;;  %v6766_v36 = vld [vmem:[#allocation79_spill] sm:$0xff] }
 0x134   :  { %1041 = vst.msk [vmem:[#allocation2 + $0x1d0] sm:$0xff] %vm982_vm3, %v911_v23  ;;  %v913_v19 = vpop.permute.xlu1 %912  ;;  %v6765_v23 = vld [vmem:[#allocation75_spill] sm:$0xff]  ;;  %v1151_v56 = vrot.slane %v6766_v36, 2 }
 0x135   :  { %1042 = vst.msk [vmem:[#allocation2 + $0x1d8] sm:$0xff] %vm982_vm3, %v913_v19  ;;  %1278 = vrot.lane.b32.xlu1 %v4783_v35, %s3450_s29  ;;  %v6764_v19 = vld [vmem:[#allocation76_spill] sm:$0xff]  ;;  %v1154_v49 = vrot.slane %v6765_v23, 2 }
 0x136   :  { %6763 = vst [vmem:[#allocation139_spill] sm:$0xff] %v4783_v35  ;;  %v1153_v42 = vrot.slane %v6764_v19, 2  ;;  %v4802_v35 = vsel %vm1047_vm4, %v1149_v48, %v1151_v56  ;;  %v6772_v48 = vld [vmem:[#allocation88_spill] sm:$0xff] }
 0x137   :  { %6769 = vst [vmem:[#allocation80_spill] sm:$0xff] %v4802_v35  ;;  %v1163_v4 = vrot.slane %v6772_v48, 2 }
 0x138   :  { %1274 = vrot.lane.b32.xlu2 %v4780_v2, %s3450_s29  ;;  %v4805_v2 = vsel %vm1047_vm4, %v1154_v49, %v1156_v27  ;;  %v6773_v27 = vld [vmem:[#allocation87_spill] sm:$0xff] }
 0x139   :  { %1276 = vrot.lane.b32.xlu0 %v4776_v3, %s3450_s29  ;;  %v4798_v3 = vsel %vm1047_vm4, %v1153_v42, %v1154_v49  ;;  %6770 = vst [vmem:[#allocation140_spill] sm:$0xff] %v4805_v2  ;;  %v6771_v42 = vld [vmem:[#allocation83_spill] sm:$0xff]  ;;  %v1164_v49 = vrot.slane %v6773_v27, 2 }
 0x13a   :  { %v1209_v39 = vpop.permute.xlu2 %1208  ;;  %6768 = vst [vmem:[#allocation79_spill] sm:$0xff] %v4798_v3  ;;  %v1161_v36 = vrot.slane %v6771_v42, 2  ;;  %v6779_v27 = vld [vmem:[#allocation95_spill] sm:$0xff] }
 0x13b   :  { %v917_v21 = vpop.permute.xlu0 %916  ;;  %1386 = vst.msk [vmem:[#allocation2 + $0x38] sm:$0xff] %vm1378_vm5, %v1209_v39 }
 0x13c   :  { %1044 = vst.msk [vmem:[#allocation2 + $0x1e8] sm:$0xff] %vm982_vm3, %v917_v21  ;;  %v919_v34 = vpop.permute.xlu1 %918  ;;  %v1158_v21 = vrot.slane %v4190_v54, 2 }
 0x13d   :  { %1045 = vst.msk [vmem:[#allocation2 + $0x1f0] sm:$0xff] %vm982_vm3, %v919_v34  ;;  %1284 = vrot.lane.b32.xlu1 %v4805_v2, %s3450_s29  ;;  %v1159_v34 = vrot.slane %v4170_v18, 2 }
 0x13f   :  { %v4822_v2 = vsel %vm1047_vm4, %v1159_v34, %v1161_v36  ;;  %v4825_v42 = vsel %vm1047_vm4, %v1158_v21, %v1159_v34  ;;  %v6777_v36 = vld [vmem:[#allocation91_spill] sm:$0xff]  ;;  %v6778_v34 = vld [vmem:[#allocation90_spill] sm:$0xff] }
 0x140   :  { %1280 = vrot.lane.b32.xlu2 %v4802_v35, %s3450_s29  ;;  %6774 = vst [vmem:[#allocation83_spill] sm:$0xff] %v4822_v2  ;;  %v4829_v35 = vsel %vm1047_vm4, %v1163_v4, %v1164_v49  ;;  %v1169_v21 = vrot.slane %v6778_v34, 2  ;;  %v6780_v4 = vld [vmem:[#allocation92_spill] sm:$0xff] }
 0x141   :  { %1282 = vrot.lane.b32.xlu0 %v4798_v3, %s3450_s29  ;;  %6775 = vst [vmem:[#allocation141_spill] sm:$0xff] %v4825_v42  ;;  %v1171_v48 = vrot.slane %v6780_v4, 2 }
 0x142   :  { %v1215_v39 = vpop.permute.xlu2 %1214  ;;  %6776 = vst [vmem:[#allocation142_spill] sm:$0xff] %v4829_v35 }
 0x143   :  { %v1199_v56 = vpop.permute.xlu0 %1198  ;;  %1389 = vst.msk [vmem:[#allocation2 + $0x50] sm:$0xff] %vm1378_vm5, %v1215_v39 }
 0x144   :  { %1379 = vst.msk [vmem:[#allocation2] sm:$0xff] %vm1378_vm5, %v1199_v56  ;;  %v1201_v3 = vpop.permute.xlu1 %1200 }
 0x145   :  { %1383 = vst.msk [vmem:[#allocation2 + $0x20] sm:$0xff] %vm1378_vm5, %v1199_v56  ;;  %1290 = vrot.lane.b32.xlu1 %v4829_v35, %s3450_s29  ;;  %v1168_v56 = vrot.slane %v6777_v36, 2 }
 0x146   :  { %1380 = vst.msk [vmem:[#allocation2 + $0x8] sm:$0xff] %vm1378_vm5, %v1201_v3 }
 0x147   :  { %1384 = vst.msk [vmem:[#allocation2 + $0x28] sm:$0xff] %vm1378_vm5, %v1201_v3  ;;  %v1166_v3 = vrot.slane %v6779_v27, 2  ;;  %v6784_v27 = vld [vmem:[#allocation97_spill] sm:$0xff] }
 0x148   :  { %1286 = vrot.lane.b32.xlu2 %v4825_v42, %s3450_s29  ;;  %v4852_v42 = vsel %vm1047_vm4, %v1169_v21, %v1171_v48  ;;  %v1179_v48 = vrot.slane %v4304_v14, 2 }
 0x149   :  { %1288 = vrot.lane.b32.xlu0 %v4822_v2, %s3450_s29  ;;  %v4845_v2 = vsel %vm1047_vm4, %v1168_v56, %v1169_v21  ;;  %v4849_v35 = vsel %vm1047_vm4, %v1164_v49, %v1166_v3  ;;  %6783 = vst [vmem:[#allocation95_spill] sm:$0xff] %v4852_v42  ;;  %v1176_v56 = vrot.slane %v6784_v27, 2  ;;  %v1178_v3 = vrot.slane %v4307_v28, 2 }
 0x14a   :  { %v1221_v54 = vpop.permute.xlu2 %1220  ;;  %6781 = vst [vmem:[#allocation91_spill] sm:$0xff] %v4845_v2 }
 0x14b   :  { %v1205_v18 = vpop.permute.xlu0 %1204  ;;  %1392 = vst.msk [vmem:[#allocation2 + $0x68] sm:$0xff] %vm1378_vm5, %v1221_v54  ;;  %v1173_v54 = vrot.slane %v4313_v43, 2 }
 0x14c   :  { %1382 = vst.msk [vmem:[#allocation2 + $0x18] sm:$0xff] %vm1378_vm5, %v1205_v18  ;;  %v1207_v39 = vpop.permute.xlu1 %1206  ;;  %v1174_v18 = vrot.slane %v4290_v0, 2 }
 0x14d   :  { %1385 = vst.msk [vmem:[#allocation2 + $0x30] sm:$0xff] %vm1378_vm5, %v1207_v39  ;;  %1296 = vrot.lane.b32.xlu1 %v4852_v42, %s3450_s29  ;;  %v4875_v42 = vsel %vm1047_vm4, %v1178_v3, %v1179_v48 }
 0x14e   :  { %6782 = vst [vmem:[#allocation90_spill] sm:$0xff] %v4849_v35  ;;  %v4868_v39 = vsel %vm1047_vm4, %v1174_v18, %v1176_v56  ;;  %v4872_v27 = vsel %vm1047_vm4, %v1173_v54, %v1174_v18  ;;  %v1183_v56 = vrot.slane %v4356_v5, 2  ;;  %v6789_v54 = vld [vmem:[#allocation107_spill] sm:$0xff] }
 0x14f   :  { %6785 = vst [vmem:[#allocation92_spill] sm:$0xff] %v4868_v39 }
 0x150   :  { %1292 = vrot.lane.b32.xlu2 %v4849_v35, %s3450_s29  ;;  %6786 = vst [vmem:[#allocation97_spill] sm:$0xff] %v4872_v27 }
 0x151   :  { %1294 = vrot.lane.b32.xlu0 %v4845_v2, %s3450_s29  ;;  %6787 = vst [vmem:[#allocation143_spill] sm:$0xff] %v4875_v42  ;;  %v1186_v2 = vrot.slane %v6789_v54, 2 }
 0x152   :  { %v1227_v21 = vpop.permute.xlu2 %1226 }
 0x153   :  { %v1211_v49 = vpop.permute.xlu0 %1210  ;;  %1395 = vst.msk [vmem:[#allocation2 + $0x80] sm:$0xff] %vm1378_vm5, %v1227_v21  ;;  %v6788_v21 = vld [vmem:[#allocation108_spill] sm:$0xff] }
 0x154   :  { %1387 = vst.msk [vmem:[#allocation2 + $0x40] sm:$0xff] %vm1378_vm5, %v1211_v49  ;;  %v1213_v4 = vpop.permute.xlu1 %1212  ;;  %v1184_v49 = vrot.slane %v4353_v59, 2 }
 0x155   :  { %1388 = vst.msk [vmem:[#allocation2 + $0x48] sm:$0xff] %vm1378_vm5, %v1213_v4  ;;  %1302 = vrot.lane.b32.xlu1 %v4875_v42, %s3450_s29  ;;  %v1181_v4 = vrot.slane %v6788_v21, 2  ;;  %v1188_v21 = vrot.slane %v4416_v57, 2 }
 0x157   :  { %v4894_v42 = vsel %vm1047_vm4, %v1179_v48, %v1181_v4  ;;  %v1193_v4 = vrot.slane %v4423_v53, 2 }
 0x158   :  { %1298 = vrot.lane.b32.xlu2 %v4872_v27, %s3450_s29  ;;  %v4897_v27 = vsel %vm1047_vm4, %v1184_v49, %v1186_v2  ;;  %v1194_v2 = vrot.slane %v4420_v63, 2 }
 0x159   :  { %1300 = vrot.lane.b32.xlu0 %v4868_v39, %s3450_s29  ;;  %v4890_v39 = vsel %vm1047_vm4, %v1183_v56, %v1184_v49  ;;  %v1191_v56 = vrot.slane %v4413_v25, 2 }
 0x15a   :  { %v1233_v3 = vpop.permute.xlu2 %1232 }
 0x15b   :  { %v1217_v18 = vpop.permute.xlu0 %1216  ;;  %1398 = vst.msk [vmem:[#allocation2 + $0x98] sm:$0xff] %vm1378_vm5, %v1233_v3  ;;  %v4920_v3 = vsel %vm1047_vm4, %v1193_v4, %v1194_v2 }
 0x15c   :  { %1390 = vst.msk [vmem:[#allocation2 + $0x58] sm:$0xff] %vm1378_vm5, %v1217_v18  ;;  %v1219_v35 = vpop.permute.xlu1 %1218 }
 0x15d   :  { %1391 = vst.msk [vmem:[#allocation2 + $0x60] sm:$0xff] %vm1378_vm5, %v1219_v35  ;;  %1308 = vrot.lane.b32.xlu1 %v4897_v27, %s3450_s29  ;;  %v1189_v35 = vrot.slane %v4410_v22, 2 }
 0x15f   :  { %v4913_v54 = vsel %vm1047_vm4, %v1189_v35, %v1191_v56  ;;  %v4917_v25 = vsel %vm1047_vm4, %v1188_v21, %v1189_v35  ;;  %v1196_v56 = vrot.slane %v4456_v31, 2 }
 0x160   :  { %1304 = vrot.lane.b32.xlu2 %v4894_v42, %s3450_s29 }
 0x161   :  { %1306 = vrot.lane.b32.xlu0 %v4890_v39, %s3450_s29  ;;  %v4933_v21 = vsel %vm1047_vm4, %v1194_v2, %v1196_v56 }
 0x162   :  { %v1239_v49 = vpop.permute.xlu2 %1238 }
 0x163   :  { %v1223_v48 = vpop.permute.xlu0 %1222  ;;  %1401 = vst.msk [vmem:[#allocation2 + $0xb0] sm:$0xff] %vm1378_vm5, %v1239_v49 }
 0x164   :  { %1393 = vst.msk [vmem:[#allocation2 + $0x70] sm:$0xff] %vm1378_vm5, %v1223_v48  ;;  %v1225_v18 = vpop.permute.xlu1 %1224 }
 0x165   :  { %1394 = vst.msk [vmem:[#allocation2 + $0x78] sm:$0xff] %vm1378_vm5, %v1225_v18  ;;  %1314 = vrot.lane.b32.xlu1 %v4920_v3, %s3450_s29 }
 0x168   :  { %1310 = vrot.lane.b32.xlu2 %v4917_v25, %s3450_s29 }
 0x169   :  { %1312 = vrot.lane.b32.xlu0 %v4913_v54, %s3450_s29 }
 0x16a   :  { %v1245_v18 = vpop.permute.xlu2 %1244 }
 0x16b   :  { %v1229_v48 = vpop.permute.xlu0 %1228  ;;  %1404 = vst.msk [vmem:[#allocation2 + $0xc8] sm:$0xff] %vm1378_vm5, %v1245_v18 }
 0x16c   :  { %1396 = vst.msk [vmem:[#allocation2 + $0x88] sm:$0xff] %vm1378_vm5, %v1229_v48  ;;  %v1231_v35 = vpop.permute.xlu1 %1230 }
 0x16d   :  { %1397 = vst.msk [vmem:[#allocation2 + $0x90] sm:$0xff] %vm1378_vm5, %v1231_v35  ;;  %1447 = vrot.lane.b32.xlu1 %v3501_v16, %s3451_s28 }
 0x170   :  { %1316 = vrot.lane.b32.xlu2 %v4933_v21, %s3450_s29 }
 0x171   :  { %1445 = vrot.lane.b32.xlu0 %v3504_v17, %s3451_s28 }
 0x172   :  { %v1251_v4 = vpop.permute.xlu2 %1250 }
 0x173   :  { %v1235_v31 = vpop.permute.xlu0 %1234  ;;  %1407 = vst.msk [vmem:[#allocation2 + $0xe0] sm:$0xff] %vm1378_vm5, %v1251_v4 }
 0x174   :  { %1399 = vst.msk [vmem:[#allocation2 + $0xa0] sm:$0xff] %vm1378_vm5, %v1235_v31  ;;  %v1237_v49 = vpop.permute.xlu1 %1236 }
 0x175   :  { %1400 = vst.msk [vmem:[#allocation2 + $0xa8] sm:$0xff] %vm1378_vm5, %v1237_v49  ;;  %1453 = vrot.lane.b32.xlu1 %v3542_v38, %s3451_s28 }
 0x178   :  { %1449 = vrot.lane.b32.xlu2 %v3496_v13, %s3451_s28 }
 0x179   :  { %1451 = vrot.lane.b32.xlu0 %v3493_v12, %s3451_s28 }
 0x17a   :  { %v1257_v16 = vpop.permute.xlu2 %1256 }
 0x17b   :  { %v1241_v17 = vpop.permute.xlu0 %1240  ;;  %1410 = vst.msk [vmem:[#allocation2 + $0xf8] sm:$0xff] %vm1378_vm5, %v1257_v16 }
 0x17c   :  { %1402 = vst.msk [vmem:[#allocation2 + $0xb8] sm:$0xff] %vm1378_vm5, %v1241_v17  ;;  %v1243_v2 = vpop.permute.xlu1 %1242 }
 0x17d   :  { %1403 = vst.msk [vmem:[#allocation2 + $0xc0] sm:$0xff] %vm1378_vm5, %v1243_v2  ;;  %1459 = vrot.lane.b32.xlu1 %v3556_v44, %s3451_s28 }
 0x180   :  { %1455 = vrot.lane.b32.xlu2 %v3539_v37, %s3451_s28 }
 0x181   :  { %1457 = vrot.lane.b32.xlu0 %v3548_v40, %s3451_s28 }
 0x182   :  { %v1263_v48 = vpop.permute.xlu2 %1262 }
 0x183   :  { %v1247_v56 = vpop.permute.xlu0 %1246  ;;  %1413 = vst.msk [vmem:[#allocation2 + $0x110] sm:$0xff] %vm1378_vm5, %v1263_v48 }
 0x184   :  { %1405 = vst.msk [vmem:[#allocation2 + $0xd0] sm:$0xff] %vm1378_vm5, %v1247_v56  ;;  %v1249_v18 = vpop.permute.xlu1 %1248 }
 0x185   :  { %1406 = vst.msk [vmem:[#allocation2 + $0xd8] sm:$0xff] %vm1378_vm5, %v1249_v18  ;;  %1465 = vrot.lane.b32.xlu1 %v3614_v8, %s3451_s28 }
 0x188   :  { %1461 = vrot.lane.b32.xlu2 %v3608_v6, %s3451_s28 }
 0x189   :  { %1463 = vrot.lane.b32.xlu0 %v3593_v1, %s3451_s28 }
 0x18a   :  { %v1269_v31 = vpop.permute.xlu2 %1268 }
 0x18b   :  { %v1253_v35 = vpop.permute.xlu0 %1252  ;;  %1418 = vst.msk [vmem:[#allocation2 + $0x138] sm:$0xff] %vm1378_vm5, %v1269_v31 }
 0x18c   :  { %1408 = vst.msk [vmem:[#allocation2 + $0xe8] sm:$0xff] %vm1378_vm5, %v1253_v35  ;;  %v1255_v4 = vpop.permute.xlu1 %1254 }
 0x18d   :  { %1409 = vst.msk [vmem:[#allocation2 + $0xf0] sm:$0xff] %vm1378_vm5, %v1255_v4  ;;  %1471 = vrot.lane.b32.xlu1 %v3643_v32, %s3451_s28 }
 0x190   :  { %1467 = vrot.lane.b32.xlu2 %v3611_v7, %s3451_s28 }
 0x191   :  { %1469 = vrot.lane.b32.xlu0 %v3634_v29, %s3451_s28 }
 0x192   :  { %v1275_v17 = vpop.permute.xlu2 %1274 }
 0x193   :  { %v1259_v49 = vpop.permute.xlu0 %1258  ;;  %1421 = vst.msk [vmem:[#allocation2 + $0x150] sm:$0xff] %vm1378_vm5, %v1275_v17 }
 0x194   :  { %1411 = vst.msk [vmem:[#allocation2 + $0x100] sm:$0xff] %vm1378_vm5, %v1259_v49  ;;  %v1261_v16 = vpop.permute.xlu1 %1260 }
 0x195   :  { %1415 = vst.msk [vmem:[#allocation2 + $0x120] sm:$0xff] %vm1378_vm5, %v1259_v49  ;;  %1477 = vrot.lane.b32.xlu1 %v3698_v11, %s3451_s28 }
 0x196   :  { %1412 = vst.msk [vmem:[#allocation2 + $0x108] sm:$0xff] %vm1378_vm5, %v1261_v16 }
 0x197   :  { %1416 = vst.msk [vmem:[#allocation2 + $0x128] sm:$0xff] %vm1378_vm5, %v1261_v16 }
 0x198   :  { %1473 = vrot.lane.b32.xlu2 %v3692_v9, %s3451_s28 }
 0x199   :  { %1475 = vrot.lane.b32.xlu0 %v3677_v60, %s3451_s28 }
 0x19a   :  { %v1281_v56 = vpop.permute.xlu2 %1280 }
 0x19b   :  { %v1265_v2 = vpop.permute.xlu0 %1264  ;;  %1424 = vst.msk [vmem:[#allocation2 + $0x168] sm:$0xff] %vm1378_vm5, %v1281_v56 }
 0x19c   :  { %1414 = vst.msk [vmem:[#allocation2 + $0x118] sm:$0xff] %vm1378_vm5, %v1265_v2  ;;  %v1267_v48 = vpop.permute.xlu1 %1266 }
 0x19d   :  { %1417 = vst.msk [vmem:[#allocation2 + $0x130] sm:$0xff] %vm1378_vm5, %v1267_v48  ;;  %1483 = vrot.lane.b32.xlu1 %v3730_v52, %s3451_s28  ;;  %v45_v48 = vld [vmem:[%s6267_s0 + $0xf0] sm:$0xff] }
 0x1a0   :  { %1479 = vrot.lane.b32.xlu2 %v3695_v10, %s3451_s28 }
 0x1a1   :  { %1481 = vrot.lane.b32.xlu0 %v3718_v46, %s3451_s28 }
 0x1a2   :  { %v1287_v35 = vpop.permute.xlu2 %1286 }
 0x1a3   :  { %v1271_v18 = vpop.permute.xlu0 %1270  ;;  %1427 = vst.msk [vmem:[#allocation2 + $0x180] sm:$0xff] %vm1378_vm5, %v1287_v35  ;;  %v126_v35 = vrot.slane %v45_v48, 1 }
 0x1a4   :  { %1419 = vst.msk [vmem:[#allocation2 + $0x140] sm:$0xff] %vm1378_vm5, %v1271_v18  ;;  %v1273_v31 = vpop.permute.xlu1 %1272  ;;  %v5024_v18 = vld [vmem:[%s6267_s0 + $0xf8] sm:$0xff] }
 0x1a5   :  { %1420 = vst.msk [vmem:[#allocation2 + $0x148] sm:$0xff] %vm1378_vm5, %v1273_v31  ;;  %1489 = vrot.lane.b32.xlu1 %v3785_v26, %s3451_s28  ;;  %v253_v31 = vrot.slane %v45_v48, 7 }
 0x1a8   :  { %1485 = vrot.lane.b32.xlu2 %v6719_v20, %s3451_s28 }
 0x1a9   :  { %1487 = vrot.lane.b32.xlu0 %v6717_v47, %s3451_s28 }
 0x1aa   :  { %v1293_v49 = vpop.permute.xlu2 %1292 }
 0x1ab   :  { %v1277_v4 = vpop.permute.xlu0 %1276  ;;  %1430 = vst.msk [vmem:[#allocation2 + $0x198] sm:$0xff] %vm1378_vm5, %v1293_v49  ;;  %v6560_v49 = vrot.slane %v5024_v18, 7 }
 0x1ac   :  { %1422 = vst.msk [vmem:[#allocation2 + $0x158] sm:$0xff] %vm1378_vm5, %v1277_v4  ;;  %v1279_v17 = vpop.permute.xlu1 %1278 }
 0x1ad   :  { %1423 = vst.msk [vmem:[#allocation2 + $0x160] sm:$0xff] %vm1378_vm5, %v1279_v17  ;;  %1495 = vrot.lane.b32.xlu1 %v6724_v62, %s3451_s28 }
 0x1b0   :  { %1491 = vrot.lane.b32.xlu2 %v3782_v15, %s3451_s28 }
 0x1b1   :  { %1493 = vrot.lane.b32.xlu0 %v6723_v61, %s3451_s28 }
 0x1b2   :  { %v1299_v2 = vpop.permute.xlu2 %1298 }
 0x1b3   :  { %v1283_v16 = vpop.permute.xlu0 %1282  ;;  %1433 = vst.msk [vmem:[#allocation2 + $0x1b0] sm:$0xff] %vm1378_vm5, %v1299_v2  ;;  %v5036_v2 = vsel %vm207_vm0, %v126_v35, %v253_v31 }
 0x1b4   :  { %1425 = vst.msk [vmem:[#allocation2 + $0x170] sm:$0xff] %vm1378_vm5, %v1283_v16  ;;  %v1285_v56 = vpop.permute.xlu1 %1284 }
 0x1b5   :  { %1426 = vst.msk [vmem:[#allocation2 + $0x178] sm:$0xff] %vm1378_vm5, %v1285_v56  ;;  %1501 = vrot.lane.b32.xlu1 %v3869_v33, %s3451_s28  ;;  %v5042_v56 = vsel %vm207_vm0, %v253_v31, %v6560_v49 }
 0x1b8   :  { %1497 = vrot.lane.b32.xlu2 %v6732_v51, %s3451_s28 }
 0x1b9   :  { %1499 = vrot.lane.b32.xlu0 %v6730_v24, %s3451_s28 }
 0x1ba   :  { %v1305_v17 = vpop.permute.xlu2 %1304 }
 0x1bb   :  { %v1289_v4 = vpop.permute.xlu0 %1288  ;;  %1436 = vst.msk [vmem:[#allocation2 + $0x1c8] sm:$0xff] %vm1378_vm5, %v1305_v17 }
 0x1bc   :  { %1428 = vst.msk [vmem:[#allocation2 + $0x188] sm:$0xff] %vm1378_vm5, %v1289_v4  ;;  %v1291_v16 = vpop.permute.xlu1 %1290 }
 0x1bd   :  { %1429 = vst.msk [vmem:[#allocation2 + $0x190] sm:$0xff] %vm1378_vm5, %v1291_v16  ;;  %1507 = vrot.lane.b32.xlu1 %v5042_v56, %s3451_s28 }
 0x1c0   :  { %1503 = vrot.lane.b32.xlu2 %v3866_v41, %s3451_s28 }
 0x1c1   :  { %1505 = vrot.lane.b32.xlu0 %v5036_v2, %s3451_s28 }
 0x1c2   :  { %v1311_v4 = vpop.permute.xlu2 %1310 }
 0x1c3   :  { %v1295_v48 = vpop.permute.xlu0 %1294  ;;  %1439 = vst.msk [vmem:[#allocation2 + $0x1e0] sm:$0xff] %vm1378_vm5, %v1311_v4 }
 0x1c4   :  { %1431 = vst.msk [vmem:[#allocation2 + $0x1a0] sm:$0xff] %vm1378_vm5, %v1295_v48  ;;  %v1297_v35 = vpop.permute.xlu1 %1296 }
 0x1c5   :  { %1432 = vst.msk [vmem:[#allocation2 + $0x1a8] sm:$0xff] %vm1378_vm5, %v1297_v35  ;;  %1513 = vrot.lane.b32.xlu1 %v3889_v45, %s3451_s28 }
 0x1c8   :  { %1509 = vrot.lane.b32.xlu2 %v6744_v50, %s3451_s28  ;;  %v6791_v50 = vld [vmem:[#allocation57_spill] sm:$0xff] }
 0x1c9   :  { %1511 = vrot.lane.b32.xlu0 %v6742_v55, %s3451_s28  ;;  %v6790_v55 = vld [vmem:[#allocation46_spill] sm:$0xff] }
 0x1ca   :  { %v1317_v17 = vpop.permute.xlu2 %1316 }
 0x1cb   :  { %v1301_v31 = vpop.permute.xlu0 %1300  ;;  %1442 = vst.msk [vmem:[#allocation2 + $0x1f8] sm:$0xff] %vm1378_vm5, %v1317_v17  ;;  %v6793_v17 = vld [vmem:[#allocation71_spill] sm:$0xff] }
 0x1cc   :  { %1434 = vst.msk [vmem:[#allocation2 + $0x1b8] sm:$0xff] %vm1378_vm5, %v1301_v31  ;;  %v1303_v16 = vpop.permute.xlu1 %1302  ;;  %v6792_v31 = vld [vmem:[#allocation61_spill] sm:$0xff] }
 0x1cd   :  { %1435 = vst.msk [vmem:[#allocation2 + $0x1c0] sm:$0xff] %vm1378_vm5, %v1303_v16  ;;  %1519 = vrot.lane.b32.xlu1 %v6791_v50, %s3451_s28 }
 0x1d0   :  { %1515 = vrot.lane.b32.xlu2 %v6790_v55, %s3451_s28 }
 0x1d1   :  { %1517 = vrot.lane.b32.xlu0 %v6745_v30, %s3451_s28 }
 0x1d2   :  { %v1450_v4 = vpop.permute.xlu2 %1449 }
 0x1d3   :  { %v1307_v48 = vpop.permute.xlu0 %1306  ;;  %1640 = vst.msk [vmem:[#allocation2 + $0x10] sm:$0xff] %vm1637_vm6, %v1450_v4  ;;  %v6794_v4 = vld [vmem:[#allocation73_spill] sm:$0xff] }
 0x1d4   :  { %1437 = vst.msk [vmem:[#allocation2 + $0x1d0] sm:$0xff] %vm1378_vm5, %v1307_v48  ;;  %v1309_v35 = vpop.permute.xlu1 %1308 }
 0x1d5   :  { %1438 = vst.msk [vmem:[#allocation2 + $0x1d8] sm:$0xff] %vm1378_vm5, %v1309_v35  ;;  %1525 = vrot.lane.b32.xlu1 %v6793_v17, %s3451_s28  ;;  %v6795_v35 = vld [vmem:[#allocation67_spill] sm:$0xff] }
 0x1d8   :  { %1521 = vrot.lane.b32.xlu2 %v6792_v31, %s3451_s28 }
 0x1d9   :  { %1523 = vrot.lane.b32.xlu0 %v6751_v58, %s3451_s28  ;;  %v6796_v58 = vld [vmem:[#allocation72_spill] sm:$0xff] }
 0x1da   :  { %v1456_v49 = vpop.permute.xlu2 %1455 }
 0x1db   :  { %v1313_v16 = vpop.permute.xlu0 %1312  ;;  %1643 = vst.msk [vmem:[#allocation2 + $0x28] sm:$0xff] %vm1637_vm6, %v1456_v49  ;;  %v6797_v49 = vld [vmem:[#allocation86_spill] sm:$0xff] }
 0x1dc   :  { %1440 = vst.msk [vmem:[#allocation2 + $0x1e8] sm:$0xff] %vm1378_vm5, %v1313_v16  ;;  %v1315_v48 = vpop.permute.xlu1 %1314 }
 0x1dd   :  { %1441 = vst.msk [vmem:[#allocation2 + $0x1f0] sm:$0xff] %vm1378_vm5, %v1315_v48  ;;  %1531 = vrot.lane.b32.xlu1 %v6796_v58, %s3451_s28 }
 0x1e0   :  { %1527 = vrot.lane.b32.xlu2 %v6795_v35, %s3451_s28 }
 0x1e1   :  { %1529 = vrot.lane.b32.xlu0 %v6794_v4, %s3451_s28 }
 0x1e2   :  { %v1462_v17 = vpop.permute.xlu2 %1461 }
 0x1e3   :  { %v1446_v31 = vpop.permute.xlu0 %1445  ;;  %1646 = vst.msk [vmem:[#allocation2 + $0x40] sm:$0xff] %vm1637_vm6, %v1462_v17  ;;  %v6800_v17 = vld [vmem:[#allocation87_spill] sm:$0xff] }
 0x1e4   :  { %1638 = vst.msk [vmem:[#allocation2] sm:$0xff] %vm1637_vm6, %v1446_v31  ;;  %v1448_v30 = vpop.permute.xlu1 %1447  ;;  %v6799_v31 = vld [vmem:[#allocation82_spill] sm:$0xff] }
 0x1e5   :  { %1639 = vst.msk [vmem:[#allocation2 + $0x8] sm:$0xff] %vm1637_vm6, %v1448_v30  ;;  %1537 = vrot.lane.b32.xlu1 %v6797_v49, %s3451_s28  ;;  %v6798_v30 = vld [vmem:[#allocation88_spill] sm:$0xff] }
 0x1e8   :  { %1533 = vrot.lane.b32.xlu2 %v6764_v19, %s3451_s28 }
 0x1e9   :  { %1535 = vrot.lane.b32.xlu0 %v6765_v23, %s3451_s28 }
 0x1ea   :  { %v1468_v48 = vpop.permute.xlu2 %1467 }
 0x1eb   :  { %v1452_v16 = vpop.permute.xlu0 %1451  ;;  %1649 = vst.msk [vmem:[#allocation2 + $0x58] sm:$0xff] %vm1637_vm6, %v1468_v48 }
 0x1ec   :  { %1641 = vst.msk [vmem:[#allocation2 + $0x18] sm:$0xff] %vm1637_vm6, %v1452_v16  ;;  %v1454_v4 = vpop.permute.xlu1 %1453 }
 0x1ed   :  { %1642 = vst.msk [vmem:[#allocation2 + $0x20] sm:$0xff] %vm1637_vm6, %v1454_v4  ;;  %1543 = vrot.lane.b32.xlu1 %v6800_v17, %s3451_s28 }
 0x1f0   :  { %1539 = vrot.lane.b32.xlu2 %v6799_v31, %s3451_s28 }
 0x1f1   :  { %1541 = vrot.lane.b32.xlu0 %v6798_v30, %s3451_s28 }
 0x1f2   :  { %v1474_v49 = vpop.permute.xlu2 %1473 }
 0x1f3   :  { %v1458_v23 = vpop.permute.xlu0 %1457  ;;  %1652 = vst.msk [vmem:[#allocation2 + $0x70] sm:$0xff] %vm1637_vm6, %v1474_v49 }
 0x1f4   :  { %1644 = vst.msk [vmem:[#allocation2 + $0x30] sm:$0xff] %vm1637_vm6, %v1458_v23  ;;  %v1460_v19 = vpop.permute.xlu1 %1459 }
 0x1f5   :  { %1645 = vst.msk [vmem:[#allocation2 + $0x38] sm:$0xff] %vm1637_vm6, %v1460_v19  ;;  %1549 = vrot.lane.b32.xlu1 %v4313_v43, %s3451_s28 }
 0x1f8   :  { %1545 = vrot.lane.b32.xlu2 %v6777_v36, %s3451_s28 }
 0x1f9   :  { %1547 = vrot.lane.b32.xlu0 %v6778_v34, %s3451_s28 }
 0x1fa   :  { %v1480_v16 = vpop.permute.xlu2 %1479 }
 0x1fb   :  { %v1464_v4 = vpop.permute.xlu0 %1463  ;;  %1655 = vst.msk [vmem:[#allocation2 + $0x88] sm:$0xff] %vm1637_vm6, %v1480_v16 }
 0x1fc   :  { %1647 = vst.msk [vmem:[#allocation2 + $0x48] sm:$0xff] %vm1637_vm6, %v1464_v4  ;;  %v1466_v48 = vpop.permute.xlu1 %1465 }
 0x1fd   :  { %1648 = vst.msk [vmem:[#allocation2 + $0x50] sm:$0xff] %vm1637_vm6, %v1466_v48  ;;  %1555 = vrot.lane.b32.xlu1 %v4304_v14, %s3451_s28  ;;  %v6832_v14 = vld [vmem:[#allocation48_spill] sm:$0xff] }
 0x200   :  { %1551 = vrot.lane.b32.xlu2 %v4290_v0, %s3451_s28 }
 0x201   :  { %1553 = vrot.lane.b32.xlu0 %v4307_v28, %s3451_s28 }
 0x202   :  { %v1486_v23 = vpop.permute.xlu2 %1485 }
 0x203   :  { %v1470_v19 = vpop.permute.xlu0 %1469  ;;  %1658 = vst.msk [vmem:[#allocation2 + $0xa0] sm:$0xff] %vm1637_vm6, %v1486_v23  ;;  %v5140_v23 = vld [vmem:[%s6267_s0 + $0x1f8] sm:$0xff] }
 0x204   :  { %1650 = vst.msk [vmem:[#allocation2 + $0x60] sm:$0xff] %vm1637_vm6, %v1470_v19  ;;  %v1472_v49 = vpop.permute.xlu1 %1471  ;;  %v77_v19 = vld [vmem:[%s6267_s0 + $0x1f0] sm:$0xff]  ;;  %s3452_s0 = smov 16  }
 0x205   :  { %1651 = vst.msk [vmem:[#allocation2 + $0x68] sm:$0xff] %vm1637_vm6, %v1472_v49  ;;  %1561 = vrot.lane.b32.xlu1 %v4416_v57, %s3451_s28  ;;  %v301_v49 = vrot.slane %v77_v19, 7 }
 0x208   :  { %1557 = vrot.lane.b32.xlu2 %v4356_v5, %s3451_s28 }
 0x209   :  { %1559 = vrot.lane.b32.xlu0 %v4353_v59, %s3451_s28 }
 0x20a   :  { %v1492_v16 = vpop.permute.xlu2 %1491 }
 0x20b   :  { %v1476_v4 = vpop.permute.xlu0 %1475  ;;  %1661 = vst.msk [vmem:[#allocation2 + $0xb8] sm:$0xff] %vm1637_vm6, %v1492_v16  ;;  %v142_v16 = vrot.slane %v77_v19, 1  ;;  %v6801_v19 = vld [vmem:[#allocation7_spill] sm:$0xff] }
 0x20c   :  { %1653 = vst.msk [vmem:[#allocation2 + $0x78] sm:$0xff] %vm1637_vm6, %v1476_v4  ;;  %v1478_v48 = vpop.permute.xlu1 %1477  ;;  %v6569_v4 = vrot.slane %v5140_v23, 7 }
 0x20d   :  { %1654 = vst.msk [vmem:[#allocation2 + $0x80] sm:$0xff] %vm1637_vm6, %v1478_v48  ;;  %1567 = vrot.lane.b32.xlu1 %v4420_v63, %s3451_s28  ;;  %v5158_v63 = vsel %vm207_vm0, %v142_v16, %v301_v49  ;;  %v6804_v16 = vld [vmem:[#allocation8_spill] sm:$0xff] }
 0x210   :  { %1563 = vrot.lane.b32.xlu2 %v4410_v22, %s3451_s28 }
 0x211   :  { %1565 = vrot.lane.b32.xlu0 %v4423_v53, %s3451_s28  ;;  %v5154_v53 = vsel %vm207_vm0, %v301_v49, %v6569_v4  ;;  %v6803_v49 = vld [vmem:[#allocation9_spill] sm:$0xff] }
 0x212   :  { %v1498_v59 = vpop.permute.xlu2 %1497 }
 0x213   :  { %v1482_v48 = vpop.permute.xlu0 %1481  ;;  %1664 = vst.msk [vmem:[#allocation2 + $0xd0] sm:$0xff] %vm1637_vm6, %v1498_v59  ;;  %v6802_v59 = vld [vmem:[#allocation6_spill] sm:$0xff] }
 0x214   :  { %1656 = vst.msk [vmem:[#allocation2 + $0x90] sm:$0xff] %vm1637_vm6, %v1482_v48  ;;  %v1484_v57 = vpop.permute.xlu1 %1483 }
 0x215   :  { %1657 = vst.msk [vmem:[#allocation2 + $0x98] sm:$0xff] %vm1637_vm6, %v1484_v57  ;;  %1714 = vrot.lane.b32.xlu1 %v6801_v19, %s3452_s0 }
 0x218   :  { %1569 = vrot.lane.b32.xlu2 %v5158_v63, %s3451_s28 }
 0x219   :  { %1571 = vrot.lane.b32.xlu0 %v5154_v53, %s3451_s28 }
 0x21a   :  { %v1504_v48 = vpop.permute.xlu2 %1503 }
 0x21b   :  { %v1488_v57 = vpop.permute.xlu0 %1487  ;;  %1667 = vst.msk [vmem:[#allocation2 + $0xe8] sm:$0xff] %vm1637_vm6, %v1504_v48  ;;  %v6807_v48 = vld [vmem:[#allocation11_spill] sm:$0xff] }
 0x21c   :  { %1659 = vst.msk [vmem:[#allocation2 + $0xa8] sm:$0xff] %vm1637_vm6, %v1488_v57  ;;  %v1490_v4 = vpop.permute.xlu1 %1489  ;;  %v6806_v57 = vld [vmem:[#allocation10_spill] sm:$0xff] }
 0x21d   :  { %1660 = vst.msk [vmem:[#allocation2 + $0xb0] sm:$0xff] %vm1637_vm6, %v1490_v4  ;;  %1720 = vrot.lane.b32.xlu1 %v6804_v16, %s3452_s0  ;;  %v6805_v4 = vld [vmem:[#allocation12_spill] sm:$0xff] }
 0x220   :  { %1716 = vrot.lane.b32.xlu2 %v6803_v49, %s3452_s0 }
 0x221   :  { %1718 = vrot.lane.b32.xlu0 %v6802_v59, %s3452_s0 }
 0x222   :  { %v1510_v19 = vpop.permute.xlu2 %1509 }
 0x223   :  { %v1494_v22 = vpop.permute.xlu0 %1493  ;;  %1670 = vst.msk [vmem:[#allocation2 + $0x100] sm:$0xff] %vm1637_vm6, %v1510_v19  ;;  %v6810_v19 = vld [vmem:[#allocation14_spill] sm:$0xff] }
 0x224   :  { %1662 = vst.msk [vmem:[#allocation2 + $0xc0] sm:$0xff] %vm1637_vm6, %v1494_v22  ;;  %v1496_v5 = vpop.permute.xlu1 %1495  ;;  %v6809_v22 = vld [vmem:[#allocation13_spill] sm:$0xff] }
 0x225   :  { %1663 = vst.msk [vmem:[#allocation2 + $0xc8] sm:$0xff] %vm1637_vm6, %v1496_v5  ;;  %1726 = vrot.lane.b32.xlu1 %v6807_v48, %s3452_s0  ;;  %v6808_v5 = vld [vmem:[#allocation15_spill] sm:$0xff] }
 0x228   :  { %1722 = vrot.lane.b32.xlu2 %v6806_v57, %s3452_s0 }
 0x229   :  { %1724 = vrot.lane.b32.xlu0 %v6805_v4, %s3452_s0 }
 0x22a   :  { %v1516_v16 = vpop.permute.xlu2 %1515 }
 0x22b   :  { %v1500_v49 = vpop.permute.xlu0 %1499  ;;  %1673 = vst.msk [vmem:[#allocation2 + $0x118] sm:$0xff] %vm1637_vm6, %v1516_v16  ;;  %v6812_v16 = vld [vmem:[#allocation16_spill] sm:$0xff] }
 0x22c   :  { %1665 = vst.msk [vmem:[#allocation2 + $0xd8] sm:$0xff] %vm1637_vm6, %v1500_v49  ;;  %v1502_v59 = vpop.permute.xlu1 %1501  ;;  %v6813_v49 = vld [vmem:[#allocation17_spill] sm:$0xff] }
 0x22d   :  { %1666 = vst.msk [vmem:[#allocation2 + $0xe0] sm:$0xff] %vm1637_vm6, %v1502_v59  ;;  %1732 = vrot.lane.b32.xlu1 %v6810_v19, %s3452_s0  ;;  %v6811_v59 = vld [vmem:[#allocation18_spill] sm:$0xff] }
 0x230   :  { %1728 = vrot.lane.b32.xlu2 %v6809_v22, %s3452_s0 }
 0x231   :  { %1730 = vrot.lane.b32.xlu0 %v6808_v5, %s3452_s0 }
 0x232   :  { %v1522_v48 = vpop.permute.xlu2 %1521 }
 0x233   :  { %v1506_v57 = vpop.permute.xlu0 %1505  ;;  %1676 = vst.msk [vmem:[#allocation2 + $0x130] sm:$0xff] %vm1637_vm6, %v1522_v48  ;;  %v6816_v48 = vld [vmem:[#allocation21_spill] sm:$0xff] }
 0x234   :  { %1668 = vst.msk [vmem:[#allocation2 + $0xf0] sm:$0xff] %vm1637_vm6, %v1506_v57  ;;  %v1508_v4 = vpop.permute.xlu1 %1507  ;;  %v6815_v57 = vld [vmem:[#allocation19_spill] sm:$0xff] }
 0x235   :  { %1669 = vst.msk [vmem:[#allocation2 + $0xf8] sm:$0xff] %vm1637_vm6, %v1508_v4  ;;  %1738 = vrot.lane.b32.xlu1 %v6813_v49, %s3452_s0  ;;  %v6814_v4 = vld [vmem:[#allocation22_spill] sm:$0xff] }
 0x238   :  { %1734 = vrot.lane.b32.xlu2 %v6812_v16, %s3452_s0 }
 0x239   :  { %1736 = vrot.lane.b32.xlu0 %v6811_v59, %s3452_s0 }
 0x23a   :  { %v1528_v19 = vpop.permute.xlu2 %1527 }
 0x23b   :  { %v1512_v22 = vpop.permute.xlu0 %1511  ;;  %1679 = vst.msk [vmem:[#allocation2 + $0x148] sm:$0xff] %vm1637_vm6, %v1528_v19  ;;  %v6819_v19 = vld [vmem:[#allocation26_spill] sm:$0xff] }
 0x23c   :  { %1671 = vst.msk [vmem:[#allocation2 + $0x108] sm:$0xff] %vm1637_vm6, %v1512_v22  ;;  %v1514_v5 = vpop.permute.xlu1 %1513  ;;  %v6818_v22 = vld [vmem:[#allocation23_spill] sm:$0xff] }
 0x23d   :  { %1672 = vst.msk [vmem:[#allocation2 + $0x110] sm:$0xff] %vm1637_vm6, %v1514_v5  ;;  %1744 = vrot.lane.b32.xlu1 %v6816_v48, %s3452_s0  ;;  %v6817_v5 = vld [vmem:[#allocation29_spill] sm:$0xff] }
 0x240   :  { %1740 = vrot.lane.b32.xlu2 %v6815_v57, %s3452_s0 }
 0x241   :  { %1742 = vrot.lane.b32.xlu0 %v6814_v4, %s3452_s0 }
 0x242   :  { %v1534_v49 = vpop.permute.xlu2 %1533 }
 0x243   :  { %v1518_v16 = vpop.permute.xlu0 %1517  ;;  %1682 = vst.msk [vmem:[#allocation2 + $0x160] sm:$0xff] %vm1637_vm6, %v1534_v49  ;;  %v6822_v49 = vld [vmem:[#allocation32_spill] sm:$0xff] }
 0x244   :  { %1674 = vst.msk [vmem:[#allocation2 + $0x120] sm:$0xff] %vm1637_vm6, %v1518_v16  ;;  %v1520_v59 = vpop.permute.xlu1 %1519  ;;  %v6821_v16 = vld [vmem:[#allocation30_spill] sm:$0xff] }
 0x245   :  { %1675 = vst.msk [vmem:[#allocation2 + $0x128] sm:$0xff] %vm1637_vm6, %v1520_v59  ;;  %1750 = vrot.lane.b32.xlu1 %v6819_v19, %s3452_s0  ;;  %v6820_v59 = vld [vmem:[#allocation35_spill] sm:$0xff] }
 0x248   :  { %1746 = vrot.lane.b32.xlu2 %v6818_v22, %s3452_s0 }
 0x249   :  { %1748 = vrot.lane.b32.xlu0 %v6817_v5, %s3452_s0 }
 0x24a   :  { %v1540_v48 = vpop.permute.xlu2 %1539 }
 0x24b   :  { %v1524_v57 = vpop.permute.xlu0 %1523  ;;  %1685 = vst.msk [vmem:[#allocation2 + $0x178] sm:$0xff] %vm1637_vm6, %v1540_v48  ;;  %v6825_v48 = vld [vmem:[#allocation39_spill] sm:$0xff] }
 0x24c   :  { %1677 = vst.msk [vmem:[#allocation2 + $0x138] sm:$0xff] %vm1637_vm6, %v1524_v57  ;;  %v1526_v4 = vpop.permute.xlu1 %1525  ;;  %v6824_v57 = vld [vmem:[#allocation36_spill] sm:$0xff] }
 0x24d   :  { %1678 = vst.msk [vmem:[#allocation2 + $0x140] sm:$0xff] %vm1637_vm6, %v1526_v4  ;;  %1756 = vrot.lane.b32.xlu1 %v6822_v49, %s3452_s0  ;;  %v6823_v4 = vld [vmem:[#allocation42_spill] sm:$0xff] }
 0x250   :  { %1752 = vrot.lane.b32.xlu2 %v6821_v16, %s3452_s0 }
 0x251   :  { %1754 = vrot.lane.b32.xlu0 %v6820_v59, %s3452_s0 }
 0x252   :  { %v1546_v19 = vpop.permute.xlu2 %1545 }
 0x253   :  { %v1530_v22 = vpop.permute.xlu0 %1529  ;;  %1688 = vst.msk [vmem:[#allocation2 + $0x190] sm:$0xff] %vm1637_vm6, %v1546_v19  ;;  %v6828_v19 = vld [vmem:[#allocation45_spill] sm:$0xff] }
 0x254   :  { %1680 = vst.msk [vmem:[#allocation2 + $0x150] sm:$0xff] %vm1637_vm6, %v1530_v22  ;;  %v1532_v5 = vpop.permute.xlu1 %1531  ;;  %v6827_v22 = vld [vmem:[#allocation43_spill] sm:$0xff] }
 0x255   :  { %1681 = vst.msk [vmem:[#allocation2 + $0x158] sm:$0xff] %vm1637_vm6, %v1532_v5  ;;  %1762 = vrot.lane.b32.xlu1 %v6825_v48, %s3452_s0  ;;  %v6826_v5 = vld [vmem:[#allocation47_spill] sm:$0xff]  ;;  %v1704_v48 = vrot.slane %v5036_v2, 1 }
 0x258   :  { %1758 = vrot.lane.b32.xlu2 %v6824_v57, %s3452_s0  ;;  %v413_v57 = vrot.slane %v5024_v18, 5 }
 0x259   :  { %1760 = vrot.lane.b32.xlu0 %v6823_v4, %s3452_s0 }
 0x25a   :  { %v1552_v49 = vpop.permute.xlu2 %1551 }
 0x25b   :  { %v1536_v16 = vpop.permute.xlu0 %1535  ;;  %1691 = vst.msk [vmem:[#allocation2 + $0x1a8] sm:$0xff] %vm1637_vm6, %v1552_v49 }
 0x25c   :  { %1683 = vst.msk [vmem:[#allocation2 + $0x168] sm:$0xff] %vm1637_vm6, %v1536_v16  ;;  %v1538_v59 = vpop.permute.xlu1 %1537  ;;  %v1705_v16 = vrot.slane %v5042_v56, 1 }
 0x25d   :  { %1684 = vst.msk [vmem:[#allocation2 + $0x170] sm:$0xff] %vm1637_vm6, %v1538_v59  ;;  %1768 = vrot.lane.b32.xlu1 %v6828_v19, %s3452_s0  ;;  %v6830_v19 = vrot.slane %v5024_v18, 7 }
 0x25e   :  { %v5254_v49 = vsel %vm651_vm1, %v1704_v48, %v1705_v16 }
 0x25f   :  { %6829 = vst [vmem:[#allocation108_spill] sm:$0xff] %v5254_v49 }
 0x260   :  { %1764 = vrot.lane.b32.xlu2 %v6827_v22, %s3452_s0  ;;  %v5259_v22 = vsel %vm207_vm0, %v6830_v19, %v413_v57  ;;  %v6834_v57 = vld [vmem:[#allocation62_spill] sm:$0xff]  ;;  %v6835_v19 = vld [vmem:[#allocation59_spill] sm:$0xff] }
 0x261   :  { %1766 = vrot.lane.b32.xlu0 %v6826_v5, %s3452_s0  ;;  %v6831_v5 = vld [vmem:[#allocation54_spill] sm:$0xff] }
 0x262   :  { %v1558_v28 = vpop.permute.xlu2 %1557 }
 0x263   :  { %v1542_v4 = vpop.permute.xlu0 %1541  ;;  %1694 = vst.msk [vmem:[#allocation2 + $0x1c0] sm:$0xff] %vm1637_vm6, %v1558_v28 }
 0x264   :  { %1686 = vst.msk [vmem:[#allocation2 + $0x180] sm:$0xff] %vm1637_vm6, %v1542_v4  ;;  %v1544_v59 = vpop.permute.xlu1 %1543  ;;  %v1707_v4 = vrot.slane %v5259_v22, 1 }
 0x265   :  { %1687 = vst.msk [vmem:[#allocation2 + $0x188] sm:$0xff] %vm1637_vm6, %v1544_v59  ;;  %1774 = vrot.lane.b32.xlu1 %v5254_v49, %s3452_s0 }
 0x266   :  { %v5272_v18 = vsel %vm651_vm1, %v1705_v16, %v1707_v4  ;;  %v6836_v16 = vld [vmem:[#allocation55_spill] sm:$0xff] }
 0x267   :  { %6833 = vst [vmem:[#allocation107_spill] sm:$0xff] %v5272_v18  ;;  %v6837_v4 = vld [vmem:[#allocation51_spill] sm:$0xff] }
 0x268   :  { %1770 = vrot.lane.b32.xlu2 %v6832_v14, %s3452_s0 }
 0x269   :  { %1772 = vrot.lane.b32.xlu0 %v6831_v5, %s3452_s0 }
 0x26a   :  { %v1564_v59 = vpop.permute.xlu2 %1563 }
 0x26b   :  { %v1548_v28 = vpop.permute.xlu0 %1547  ;;  %1697 = vst.msk [vmem:[#allocation2 + $0x1d8] sm:$0xff] %vm1637_vm6, %v1564_v59  ;;  %v6838_v59 = vld [vmem:[#allocation63_spill] sm:$0xff] }
 0x26c   :  { %1689 = vst.msk [vmem:[#allocation2 + $0x198] sm:$0xff] %vm1637_vm6, %v1548_v28  ;;  %v1550_v48 = vpop.permute.xlu1 %1549 }
 0x26d   :  { %1690 = vst.msk [vmem:[#allocation2 + $0x1a0] sm:$0xff] %vm1637_vm6, %v1550_v48  ;;  %1780 = vrot.lane.b32.xlu1 %v6835_v19, %s3452_s0  ;;  %v6840_v19 = vld [vmem:[#allocation69_spill] sm:$0xff] }
 0x270   :  { %1776 = vrot.lane.b32.xlu2 %v5272_v18, %s3452_s0 }
 0x271   :  { %1778 = vrot.lane.b32.xlu0 %v6834_v57, %s3452_s0 }
 0x272   :  { %v1570_v14 = vpop.permute.xlu2 %1569 }
 0x273   :  { %v1554_v49 = vpop.permute.xlu0 %1553  ;;  %1700 = vst.msk [vmem:[#allocation2 + $0x1f0] sm:$0xff] %vm1637_vm6, %v1570_v14  ;;  %v6839_v14 = vld [vmem:[#allocation66_spill] sm:$0xff] }
 0x274   :  { %1692 = vst.msk [vmem:[#allocation2 + $0x1b0] sm:$0xff] %vm1637_vm6, %v1554_v49  ;;  %v1556_v28 = vpop.permute.xlu1 %1555 }
 0x275   :  { %1693 = vst.msk [vmem:[#allocation2 + $0x1b8] sm:$0xff] %vm1637_vm6, %v1556_v28  ;;  %1786 = vrot.lane.b32.xlu1 %v6838_v59, %s3452_s0  ;;  %v6841_v28 = vld [vmem:[#allocation70_spill] sm:$0xff] }
 0x278   :  { %1782 = vrot.lane.b32.xlu2 %v6837_v4, %s3452_s0  ;;  %v6863_v4 = vld [vmem:[#allocation118_spill] sm:$0xff] }
 0x279   :  { %1784 = vrot.lane.b32.xlu0 %v6836_v16, %s3452_s0 }
 0x27a   :  { %v1717_v57 = vpop.permute.xlu2 %1716 }
 0x27b   :  { %v1560_v48 = vpop.permute.xlu0 %1559  ;;  %1908 = vst.msk [vmem:[#allocation2 + $0x8] sm:$0xff] %vm1906_vm7, %v1717_v57  ;;  %v6843_v57 = vld [vmem:[#allocation77_spill] sm:$0xff] }
 0x27c   :  { %1695 = vst.msk [vmem:[#allocation2 + $0x1c8] sm:$0xff] %vm1637_vm6, %v1560_v48  ;;  %v1562_v49 = vpop.permute.xlu1 %1561  ;;  %v6842_v48 = vld [vmem:[#allocation74_spill] sm:$0xff] }
 0x27d   :  { %1696 = vst.msk [vmem:[#allocation2 + $0x1d0] sm:$0xff] %vm1637_vm6, %v1562_v49  ;;  %1792 = vrot.lane.b32.xlu1 %v6841_v28, %s3452_s0  ;;  %v6844_v49 = vld [vmem:[#allocation78_spill] sm:$0xff] }
 0x280   :  { %1788 = vrot.lane.b32.xlu2 %v6840_v19, %s3452_s0 }
 0x281   :  { %1790 = vrot.lane.b32.xlu0 %v6839_v14, %s3452_s0 }
 0x282   :  { %v1723_v16 = vpop.permute.xlu2 %1722 }
 0x283   :  { %v1566_v59 = vpop.permute.xlu0 %1565  ;;  %1911 = vst.msk [vmem:[#allocation2 + $0x20] sm:$0xff] %vm1906_vm7, %v1723_v16  ;;  %v6846_v16 = vld [vmem:[#allocation84_spill] sm:$0xff] }
 0x284   :  { %1698 = vst.msk [vmem:[#allocation2 + $0x1e0] sm:$0xff] %vm1637_vm6, %v1566_v59  ;;  %v1568_v18 = vpop.permute.xlu1 %1567  ;;  %v6847_v59 = vld [vmem:[#allocation85_spill] sm:$0xff] }
 0x285   :  { %1699 = vst.msk [vmem:[#allocation2 + $0x1e8] sm:$0xff] %vm1637_vm6, %v1568_v18  ;;  %1798 = vrot.lane.b32.xlu1 %v6844_v49, %s3452_s0  ;;  %v6845_v18 = vld [vmem:[#allocation81_spill] sm:$0xff] }
 0x288   :  { %1794 = vrot.lane.b32.xlu2 %v6843_v57, %s3452_s0 }
 0x289   :  { %1796 = vrot.lane.b32.xlu0 %v6842_v48, %s3452_s0 }
 0x28a   :  { %v1729_v28 = vpop.permute.xlu2 %1728 }
 0x28b   :  { %v1572_v14 = vpop.permute.xlu0 %1571  ;;  %1914 = vst.msk [vmem:[#allocation2 + $0x38] sm:$0xff] %vm1906_vm7, %v1729_v28  ;;  %v6850_v28 = vld [vmem:[#allocation94_spill] sm:$0xff] }
 0x28c   :  { %1701 = vst.msk [vmem:[#allocation2 + $0x1f8] sm:$0xff] %vm1637_vm6, %v1572_v14  ;;  %v1715_v19 = vpop.permute.xlu1 %1714  ;;  %v6848_v14 = vld [vmem:[#allocation89_spill] sm:$0xff] }
 0x28d   :  { %1907 = vst.msk [vmem:[#allocation2] sm:$0xff] %vm1906_vm7, %v1715_v19  ;;  %1804 = vrot.lane.b32.xlu1 %v6847_v59, %s3452_s0  ;;  %v6849_v19 = vld [vmem:[#allocation93_spill] sm:$0xff] }
 0x290   :  { %1800 = vrot.lane.b32.xlu2 %v6846_v16, %s3452_s0 }
 0x291   :  { %1802 = vrot.lane.b32.xlu0 %v6845_v18, %s3452_s0 }
 0x292   :  { %v1735_v49 = vpop.permute.xlu2 %1734 }
 0x293   :  { %v1719_v48 = vpop.permute.xlu0 %1718  ;;  %1917 = vst.msk [vmem:[#allocation2 + $0x50] sm:$0xff] %vm1906_vm7, %v1735_v49  ;;  %v6853_v49 = vld [vmem:[#allocation99_spill] sm:$0xff] }
 0x294   :  { %1909 = vst.msk [vmem:[#allocation2 + $0x10] sm:$0xff] %vm1906_vm7, %v1719_v48  ;;  %v1721_v57 = vpop.permute.xlu1 %1720  ;;  %v6851_v48 = vld [vmem:[#allocation96_spill] sm:$0xff] }
 0x295   :  { %1910 = vst.msk [vmem:[#allocation2 + $0x18] sm:$0xff] %vm1906_vm7, %v1721_v57  ;;  %1810 = vrot.lane.b32.xlu1 %v6850_v28, %s3452_s0  ;;  %v6852_v57 = vld [vmem:[#allocation98_spill] sm:$0xff] }
 0x298   :  { %1806 = vrot.lane.b32.xlu2 %v6849_v19, %s3452_s0 }
 0x299   :  { %1808 = vrot.lane.b32.xlu0 %v6848_v14, %s3452_s0 }
 0x29a   :  { %v1741_v59 = vpop.permute.xlu2 %1740 }
 0x29b   :  { %v1725_v18 = vpop.permute.xlu0 %1724  ;;  %1920 = vst.msk [vmem:[#allocation2 + $0x68] sm:$0xff] %vm1906_vm7, %v1741_v59  ;;  %v6856_v59 = vld [vmem:[#allocation103_spill] sm:$0xff] }
 0x29c   :  { %1912 = vst.msk [vmem:[#allocation2 + $0x28] sm:$0xff] %vm1906_vm7, %v1725_v18  ;;  %v1727_v16 = vpop.permute.xlu1 %1726  ;;  %v6854_v18 = vld [vmem:[#allocation102_spill] sm:$0xff] }
 0x29d   :  { %1913 = vst.msk [vmem:[#allocation2 + $0x30] sm:$0xff] %vm1906_vm7, %v1727_v16  ;;  %1816 = vrot.lane.b32.xlu1 %v6853_v49, %s3452_s0  ;;  %v6855_v16 = vld [vmem:[#allocation104_spill] sm:$0xff] }
 0x2a0   :  { %1812 = vrot.lane.b32.xlu2 %v6852_v57, %s3452_s0 }
 0x2a1   :  { %1814 = vrot.lane.b32.xlu0 %v6851_v48, %s3452_s0 }
 0x2a2   :  { %v1747_v14 = vpop.permute.xlu2 %1746 }
 0x2a3   :  { %v1731_v19 = vpop.permute.xlu0 %1730  ;;  %1923 = vst.msk [vmem:[#allocation2 + $0x80] sm:$0xff] %vm1906_vm7, %v1747_v14  ;;  %v6857_v14 = vld [vmem:[#allocation109_spill] sm:$0xff] }
 0x2a4   :  { %1915 = vst.msk [vmem:[#allocation2 + $0x40] sm:$0xff] %vm1906_vm7, %v1731_v19  ;;  %v1733_v28 = vpop.permute.xlu1 %1732  ;;  %v6858_v19 = vld [vmem:[#allocation110_spill] sm:$0xff] }
 0x2a5   :  { %1916 = vst.msk [vmem:[#allocation2 + $0x48] sm:$0xff] %vm1906_vm7, %v1733_v28  ;;  %1822 = vrot.lane.b32.xlu1 %v6856_v59, %s3452_s0  ;;  %v6859_v28 = vld [vmem:[#allocation111_spill] sm:$0xff]  ;;  %v429_v59 = vrot.slane %v5140_v23, 5 }
 0x2a8   :  { %1818 = vrot.lane.b32.xlu2 %v6855_v16, %s3452_s0 }
 0x2a9   :  { %1820 = vrot.lane.b32.xlu0 %v6854_v18, %s3452_s0 }
 0x2aa   :  { %v1753_v49 = vpop.permute.xlu2 %1752 }
 0x2ab   :  { %v1737_v48 = vpop.permute.xlu0 %1736  ;;  %1926 = vst.msk [vmem:[#allocation2 + $0x98] sm:$0xff] %vm1906_vm7, %v1753_v49 }
 0x2ac   :  { %1918 = vst.msk [vmem:[#allocation2 + $0x58] sm:$0xff] %vm1906_vm7, %v1737_v48  ;;  %v1739_v57 = vpop.permute.xlu1 %1738 }
 0x2ad   :  { %1919 = vst.msk [vmem:[#allocation2 + $0x60] sm:$0xff] %vm1906_vm7, %v1739_v57  ;;  %1828 = vrot.lane.b32.xlu1 %v6859_v28, %s3452_s0  ;;  %v6860_v57 = vrot.slane %v5140_v23, 7  ;;  %v1710_v28 = vrot.slane %v5154_v53, 1 }
 0x2af   :  { %v5359_v49 = vsel %vm207_vm0, %v6860_v57, %v429_v59 }
 0x2b0   :  { %1824 = vrot.lane.b32.xlu2 %v6858_v19, %s3452_s0  ;;  %v6861_v19 = vld [vmem:[#allocation116_spill] sm:$0xff] }
 0x2b1   :  { %1826 = vrot.lane.b32.xlu0 %v6857_v14, %s3452_s0  ;;  %v6862_v14 = vld [vmem:[#allocation117_spill] sm:$0xff] }
 0x2b2   :  { %v1759_v18 = vpop.permute.xlu2 %1758 }
 0x2b3   :  { %v1743_v16 = vpop.permute.xlu0 %1742  ;;  %1929 = vst.msk [vmem:[#allocation2 + $0xb0] sm:$0xff] %vm1906_vm7, %v1759_v18  ;;  %v1712_v18 = vrot.slane %v5359_v49, 1 }
 0x2b4   :  { %1921 = vst.msk [vmem:[#allocation2 + $0x70] sm:$0xff] %vm1906_vm7, %v1743_v16  ;;  %v1745_v48 = vpop.permute.xlu1 %1744  ;;  %v1709_v16 = vrot.slane %v5158_v63, 1 }
 0x2b5   :  { %1922 = vst.msk [vmem:[#allocation2 + $0x78] sm:$0xff] %vm1906_vm7, %v1745_v48  ;;  %1834 = vrot.lane.b32.xlu1 %v6863_v4, %s3452_s0 }
 0x2b6   :  { %v5373_v57 = vsel %vm651_vm1, %v1709_v16, %v1710_v28 }
 0x2b7   :  { %6864 = vst [vmem:[#allocation46_spill] sm:$0xff] %v5373_v57 }
 0x2b8   :  { %1830 = vrot.lane.b32.xlu2 %v6862_v14, %s3452_s0  ;;  %v5377_v14 = vsel %vm651_vm1, %v1710_v28, %v1712_v18  ;;  %v6867_v28 = vld [vmem:[#allocation122_spill] sm:$0xff]  ;;  %v6868_v18 = vld [vmem:[#allocation123_spill] sm:$0xff] }
 0x2b9   :  { %1832 = vrot.lane.b32.xlu0 %v6861_v19, %s3452_s0  ;;  %6865 = vst [vmem:[#allocation57_spill] sm:$0xff] %v5377_v14  ;;  %v6866_v19 = vld [vmem:[#allocation120_spill] sm:$0xff] }
 0x2ba   :  { %v1765_v23 = vpop.permute.xlu2 %1764 }
 0x2bb   :  { %v1749_v48 = vpop.permute.xlu0 %1748  ;;  %1932 = vst.msk [vmem:[#allocation2 + $0xc8] sm:$0xff] %vm1906_vm7, %v1765_v23  ;;  %v6869_v23 = vld [vmem:[#allocation119_spill] sm:$0xff] }
 0x2bc   :  { %1924 = vst.msk [vmem:[#allocation2 + $0x88] sm:$0xff] %vm1906_vm7, %v1749_v48  ;;  %v1751_v59 = vpop.permute.xlu1 %1750 }
 0x2bd   :  { %1925 = vst.msk [vmem:[#allocation2 + $0x90] sm:$0xff] %vm1906_vm7, %v1751_v59  ;;  %1840 = vrot.lane.b32.xlu1 %v5377_v14, %s3452_s0 }
 0x2c0   :  { %1836 = vrot.lane.b32.xlu2 %v6866_v19, %s3452_s0 }
 0x2c1   :  { %1838 = vrot.lane.b32.xlu0 %v5373_v57, %s3452_s0 }
 0x2c2   :  { %v1771_v4 = vpop.permute.xlu2 %1770 }
 0x2c3   :  { %v1755_v48 = vpop.permute.xlu0 %1754  ;;  %1935 = vst.msk [vmem:[#allocation2 + $0xe0] sm:$0xff] %vm1906_vm7, %v1771_v4  ;;  %v6870_v4 = vld [vmem:[#allocation124_spill] sm:$0xff] }
 0x2c4   :  { %1927 = vst.msk [vmem:[#allocation2 + $0xa0] sm:$0xff] %vm1906_vm7, %v1755_v48  ;;  %v1757_v16 = vpop.permute.xlu1 %1756 }
 0x2c5   :  { %1928 = vst.msk [vmem:[#allocation2 + $0xa8] sm:$0xff] %vm1906_vm7, %v1757_v16  ;;  %1985 = vrot.lane.b32.xlu1 %v6869_v23, %s3453_s11  ;;  %v6871_v16 = vld [vmem:[#allocation121_spill] sm:$0xff] }
 0x2c8   :  { %1981 = vrot.lane.b32.xlu2 %v6868_v18, %s3453_s11 }
 0x2c9   :  { %1983 = vrot.lane.b32.xlu0 %v6867_v28, %s3453_s11  ;;  %v6872_v28 = vld [vmem:[#allocation126_spill] sm:$0xff] }
 0x2ca   :  { %v1777_v57 = vpop.permute.xlu2 %1776 }
 0x2cb   :  { %v1761_v59 = vpop.permute.xlu0 %1760  ;;  %1938 = vst.msk [vmem:[#allocation2 + $0xf8] sm:$0xff] %vm1906_vm7, %v1777_v57  ;;  %v6873_v57 = vld [vmem:[#allocation127_spill] sm:$0xff] }
 0x2cc   :  { %1930 = vst.msk [vmem:[#allocation2 + $0xb8] sm:$0xff] %vm1906_vm7, %v1761_v59  ;;  %v1763_v48 = vpop.permute.xlu1 %1762  ;;  %v6874_v59 = vld [vmem:[#allocation125_spill] sm:$0xff] }
 0x2cd   :  { %1931 = vst.msk [vmem:[#allocation2 + $0xc0] sm:$0xff] %vm1906_vm7, %v1763_v48  ;;  %1991 = vrot.lane.b32.xlu1 %v6872_v28, %s3453_s11  ;;  %v6875_v48 = vld [vmem:[#allocation129_spill] sm:$0xff] }
 0x2d0   :  { %1987 = vrot.lane.b32.xlu2 %v6871_v16, %s3453_s11 }
 0x2d1   :  { %1989 = vrot.lane.b32.xlu0 %v6870_v4, %s3453_s11 }
 0x2d2   :  { %v1783_v23 = vpop.permute.xlu2 %1782 }
 0x2d3   :  { %v1767_v18 = vpop.permute.xlu0 %1766  ;;  %1941 = vst.msk [vmem:[#allocation2 + $0x110] sm:$0xff] %vm1906_vm7, %v1783_v23  ;;  %v6877_v23 = vld [vmem:[#allocation128_spill] sm:$0xff] }
 0x2d4   :  { %1933 = vst.msk [vmem:[#allocation2 + $0xd0] sm:$0xff] %vm1906_vm7, %v1767_v18  ;;  %v1769_v14 = vpop.permute.xlu1 %1768  ;;  %v6878_v18 = vld [vmem:[#allocation132_spill] sm:$0xff] }
 0x2d5   :  { %1934 = vst.msk [vmem:[#allocation2 + $0xd8] sm:$0xff] %vm1906_vm7, %v1769_v14  ;;  %1997 = vrot.lane.b32.xlu1 %v6875_v48, %s3453_s11  ;;  %v6876_v14 = vld [vmem:[#allocation130_spill] sm:$0xff] }
 0x2d8   :  { %1993 = vrot.lane.b32.xlu2 %v6874_v59, %s3453_s11 }
 0x2d9   :  { %1995 = vrot.lane.b32.xlu0 %v6873_v57, %s3453_s11 }
 0x2da   :  { %v1789_v4 = vpop.permute.xlu2 %1788 }
 0x2db   :  { %v1773_v16 = vpop.permute.xlu0 %1772  ;;  %1944 = vst.msk [vmem:[#allocation2 + $0x128] sm:$0xff] %vm1906_vm7, %v1789_v4  ;;  %v6879_v4 = vld [vmem:[#allocation133_spill] sm:$0xff] }
 0x2dc   :  { %1936 = vst.msk [vmem:[#allocation2 + $0xe8] sm:$0xff] %vm1906_vm7, %v1773_v16  ;;  %v1775_v28 = vpop.permute.xlu1 %1774  ;;  %v6880_v16 = vld [vmem:[#allocation131_spill] sm:$0xff] }
 0x2dd   :  { %1937 = vst.msk [vmem:[#allocation2 + $0xf0] sm:$0xff] %vm1906_vm7, %v1775_v28  ;;  %2003 = vrot.lane.b32.xlu1 %v6878_v18, %s3453_s11  ;;  %v6881_v28 = vld [vmem:[#allocation134_spill] sm:$0xff] }
 0x2e0   :  { %1999 = vrot.lane.b32.xlu2 %v6877_v23, %s3453_s11 }
 0x2e1   :  { %2001 = vrot.lane.b32.xlu0 %v6876_v14, %s3453_s11 }
 0x2e2   :  { %v1795_v57 = vpop.permute.xlu2 %1794 }
 0x2e3   :  { %v1779_v59 = vpop.permute.xlu0 %1778  ;;  %1947 = vst.msk [vmem:[#allocation2 + $0x140] sm:$0xff] %vm1906_vm7, %v1795_v57  ;;  %v6882_v57 = vld [vmem:[#allocation135_spill] sm:$0xff] }
 0x2e4   :  { %1939 = vst.msk [vmem:[#allocation2 + $0x100] sm:$0xff] %vm1906_vm7, %v1779_v59  ;;  %v1781_v48 = vpop.permute.xlu1 %1780  ;;  %v6883_v59 = vld [vmem:[#allocation20_spill] sm:$0xff] }
 0x2e5   :  { %1940 = vst.msk [vmem:[#allocation2 + $0x108] sm:$0xff] %vm1906_vm7, %v1781_v48  ;;  %2009 = vrot.lane.b32.xlu1 %v6881_v28, %s3453_s11  ;;  %v6884_v48 = vld [vmem:[#allocation25_spill] sm:$0xff] }
 0x2e8   :  { %2005 = vrot.lane.b32.xlu2 %v6880_v16, %s3453_s11 }
 0x2e9   :  { %2007 = vrot.lane.b32.xlu0 %v6879_v4, %s3453_s11 }
 0x2ea   :  { %v1801_v14 = vpop.permute.xlu2 %1800 }
 0x2eb   :  { %v1785_v23 = vpop.permute.xlu0 %1784  ;;  %1950 = vst.msk [vmem:[#allocation2 + $0x158] sm:$0xff] %vm1906_vm7, %v1801_v14  ;;  %v6885_v14 = vld [vmem:[#allocation136_spill] sm:$0xff] }
 0x2ec   :  { %1942 = vst.msk [vmem:[#allocation2 + $0x118] sm:$0xff] %vm1906_vm7, %v1785_v23  ;;  %v1787_v18 = vpop.permute.xlu1 %1786  ;;  %v6886_v23 = vld [vmem:[#allocation24_spill] sm:$0xff] }
 0x2ed   :  { %1943 = vst.msk [vmem:[#allocation2 + $0x120] sm:$0xff] %vm1906_vm7, %v1787_v18  ;;  %2015 = vrot.lane.b32.xlu1 %v6884_v48, %s3453_s11  ;;  %v6887_v18 = vld [vmem:[#allocation28_spill] sm:$0xff] }
 0x2f0   :  { %2011 = vrot.lane.b32.xlu2 %v6883_v59, %s3453_s11 }
 0x2f1   :  { %2013 = vrot.lane.b32.xlu0 %v6882_v57, %s3453_s11 }
 0x2f2   :  { %v1807_v4 = vpop.permute.xlu2 %1806 }
 0x2f3   :  { %v1791_v16 = vpop.permute.xlu0 %1790  ;;  %1953 = vst.msk [vmem:[#allocation2 + $0x170] sm:$0xff] %vm1906_vm7, %v1807_v4  ;;  %v6888_v4 = vld [vmem:[#allocation31_spill] sm:$0xff] }
 0x2f4   :  { %1945 = vst.msk [vmem:[#allocation2 + $0x130] sm:$0xff] %vm1906_vm7, %v1791_v16  ;;  %v1793_v28 = vpop.permute.xlu1 %1792  ;;  %v6889_v16 = vld [vmem:[#allocation27_spill] sm:$0xff] }
 0x2f5   :  { %1946 = vst.msk [vmem:[#allocation2 + $0x138] sm:$0xff] %vm1906_vm7, %v1793_v28  ;;  %2021 = vrot.lane.b32.xlu1 %v6887_v18, %s3453_s11  ;;  %v6890_v28 = vld [vmem:[#allocation33_spill] sm:$0xff] }
 0x2f8   :  { %2017 = vrot.lane.b32.xlu2 %v6886_v23, %s3453_s11 }
 0x2f9   :  { %2019 = vrot.lane.b32.xlu0 %v6885_v14, %s3453_s11 }
 0x2fa   :  { %v1813_v57 = vpop.permute.xlu2 %1812 }
 0x2fb   :  { %v1797_v59 = vpop.permute.xlu0 %1796  ;;  %1956 = vst.msk [vmem:[#allocation2 + $0x188] sm:$0xff] %vm1906_vm7, %v1813_v57  ;;  %v6891_v57 = vld [vmem:[#allocation37_spill] sm:$0xff] }
 0x2fc   :  { %1948 = vst.msk [vmem:[#allocation2 + $0x148] sm:$0xff] %vm1906_vm7, %v1797_v59  ;;  %v1799_v48 = vpop.permute.xlu1 %1798  ;;  %v6892_v59 = vld [vmem:[#allocation34_spill] sm:$0xff] }
 0x2fd   :  { %1949 = vst.msk [vmem:[#allocation2 + $0x150] sm:$0xff] %vm1906_vm7, %v1799_v48  ;;  %2027 = vrot.lane.b32.xlu1 %v6890_v28, %s3453_s11  ;;  %v6893_v48 = vld [vmem:[#allocation40_spill] sm:$0xff] }
 0x300   :  { %2023 = vrot.lane.b32.xlu2 %v6889_v16, %s3453_s11 }
 0x301   :  { %2025 = vrot.lane.b32.xlu0 %v6888_v4, %s3453_s11 }
 0x302   :  { %v1819_v14 = vpop.permute.xlu2 %1818 }
 0x303   :  { %v1803_v23 = vpop.permute.xlu0 %1802  ;;  %1959 = vst.msk [vmem:[#allocation2 + $0x1a0] sm:$0xff] %vm1906_vm7, %v1819_v14  ;;  %v6894_v14 = vld [vmem:[#allocation41_spill] sm:$0xff] }
 0x304   :  { %1951 = vst.msk [vmem:[#allocation2 + $0x160] sm:$0xff] %vm1906_vm7, %v1803_v23  ;;  %v1805_v18 = vpop.permute.xlu1 %1804  ;;  %v6895_v23 = vld [vmem:[#allocation38_spill] sm:$0xff] }
 0x305   :  { %1952 = vst.msk [vmem:[#allocation2 + $0x168] sm:$0xff] %vm1906_vm7, %v1805_v18  ;;  %2033 = vrot.lane.b32.xlu1 %v6893_v48, %s3453_s11  ;;  %v1971_v18 = vrot.slane %v5036_v2, 2 }
 0x308   :  { %2029 = vrot.lane.b32.xlu2 %v6892_v59, %s3453_s11  ;;  %v1972_v59 = vrot.slane %v5042_v56, 2 }
 0x309   :  { %2031 = vrot.lane.b32.xlu0 %v6891_v57, %s3453_s11  ;;  %v6896_v57 = vld [vmem:[#allocation49_spill] sm:$0xff] }
 0x30a   :  { %v1825_v4 = vpop.permute.xlu2 %1824 }
 0x30b   :  { %v1809_v16 = vpop.permute.xlu0 %1808  ;;  %1962 = vst.msk [vmem:[#allocation2 + $0x1b8] sm:$0xff] %vm1906_vm7, %v1825_v4 }
 0x30c   :  { %1954 = vst.msk [vmem:[#allocation2 + $0x178] sm:$0xff] %vm1906_vm7, %v1809_v16  ;;  %v1811_v28 = vpop.permute.xlu1 %1810  ;;  %v1974_v16 = vrot.slane %v5259_v22, 2  ;;  %v6899_v22 = vld [vmem:[#allocation53_spill] sm:$0xff] }
 0x30d   :  { %1955 = vst.msk [vmem:[#allocation2 + $0x180] sm:$0xff] %vm1906_vm7, %v1811_v28  ;;  %2039 = vrot.lane.b32.xlu1 %v6896_v57, %s3453_s11 }
 0x30e   :  { %v5481_v28 = vsel %vm1047_vm4, %v1972_v59, %v1974_v16 }
 0x30f   :  { %6897 = vst [vmem:[#allocation67_spill] sm:$0xff] %v5481_v28 }
 0x310   :  { %2035 = vrot.lane.b32.xlu2 %v6895_v23, %s3453_s11  ;;  %v5485_v23 = vsel %vm1047_vm4, %v1971_v18, %v1972_v59  ;;  %v6901_v59 = vld [vmem:[#allocation52_spill] sm:$0xff]  ;;  %v6902_v18 = vld [vmem:[#allocation50_spill] sm:$0xff] }
 0x311   :  { %2037 = vrot.lane.b32.xlu0 %v6894_v14, %s3453_s11  ;;  %6898 = vst [vmem:[#allocation72_spill] sm:$0xff] %v5485_v23 }
 0x312   :  { %v1831_v19 = vpop.permute.xlu2 %1830 }
 0x313   :  { %v1815_v48 = vpop.permute.xlu0 %1814  ;;  %1965 = vst.msk [vmem:[#allocation2 + $0x1d0] sm:$0xff] %vm1906_vm7, %v1831_v19  ;;  %v6900_v19 = vld [vmem:[#allocation44_spill] sm:$0xff] }
 0x314   :  { %1957 = vst.msk [vmem:[#allocation2 + $0x190] sm:$0xff] %vm1906_vm7, %v1815_v48  ;;  %v1817_v4 = vpop.permute.xlu1 %1816 }
 0x315   :  { %1958 = vst.msk [vmem:[#allocation2 + $0x198] sm:$0xff] %vm1906_vm7, %v1817_v4  ;;  %2045 = vrot.lane.b32.xlu1 %v6899_v22, %s3453_s11 }
 0x318   :  { %2041 = vrot.lane.b32.xlu2 %v5485_v23, %s3453_s11 }
 0x319   :  { %2043 = vrot.lane.b32.xlu0 %v5481_v28, %s3453_s11 }
 0x31a   :  { %v1837_v14 = vpop.permute.xlu2 %1836 }
 0x31b   :  { %v1821_v48 = vpop.permute.xlu0 %1820  ;;  %1968 = vst.msk [vmem:[#allocation2 + $0x1e8] sm:$0xff] %vm1906_vm7, %v1837_v14  ;;  %v6903_v14 = vld [vmem:[#allocation65_spill] sm:$0xff] }
 0x31c   :  { %1960 = vst.msk [vmem:[#allocation2 + $0x1a8] sm:$0xff] %vm1906_vm7, %v1821_v48  ;;  %v1823_v16 = vpop.permute.xlu1 %1822 }
 0x31d   :  { %1961 = vst.msk [vmem:[#allocation2 + $0x1b0] sm:$0xff] %vm1906_vm7, %v1823_v16  ;;  %2051 = vrot.lane.b32.xlu1 %v6902_v18, %s3453_s11  ;;  %v6904_v16 = vld [vmem:[#allocation56_spill] sm:$0xff] }
 0x320   :  { %2047 = vrot.lane.b32.xlu2 %v6901_v59, %s3453_s11  ;;  %v6905_v59 = vld [vmem:[#allocation64_spill] sm:$0xff] }
 0x321   :  { %2049 = vrot.lane.b32.xlu0 %v6900_v19, %s3453_s11 }
 0x322   :  { %v1982_v22 = vpop.permute.xlu2 %1981 }
 0x323   :  { %v1827_v4 = vpop.permute.xlu0 %1826  ;;  %2174 = vst.msk [vmem:[#allocation2] sm:$0xff] %vm2173_vm8, %v1982_v22  ;;  %v6907_v22 = vld [vmem:[#allocation137_spill] sm:$0xff] }
 0x324   :  { %1963 = vst.msk [vmem:[#allocation2 + $0x1c0] sm:$0xff] %vm1906_vm7, %v1827_v4  ;;  %v1829_v48 = vpop.permute.xlu1 %1828  ;;  %v6906_v4 = vld [vmem:[#allocation138_spill] sm:$0xff] }
 0x325   :  { %1964 = vst.msk [vmem:[#allocation2 + $0x1c8] sm:$0xff] %vm1906_vm7, %v1829_v48  ;;  %2057 = vrot.lane.b32.xlu1 %v6905_v59, %s3453_s11  ;;  %v6908_v48 = vld [vmem:[#allocation68_spill] sm:$0xff] }
 0x328   :  { %2053 = vrot.lane.b32.xlu2 %v6904_v16, %s3453_s11 }
 0x329   :  { %2055 = vrot.lane.b32.xlu0 %v6903_v14, %s3453_s11 }
 0x32a   :  { %v1988_v18 = vpop.permute.xlu2 %1987 }
 0x32b   :  { %v1833_v19 = vpop.permute.xlu0 %1832  ;;  %2177 = vst.msk [vmem:[#allocation2 + $0x18] sm:$0xff] %vm2173_vm8, %v1988_v18  ;;  %v6911_v18 = vld [vmem:[#allocation79_spill] sm:$0xff] }
 0x32c   :  { %1966 = vst.msk [vmem:[#allocation2 + $0x1d8] sm:$0xff] %vm1906_vm7, %v1833_v19  ;;  %v1835_v23 = vpop.permute.xlu1 %1834  ;;  %v6910_v19 = vld [vmem:[#allocation139_spill] sm:$0xff] }
 0x32d   :  { %1967 = vst.msk [vmem:[#allocation2 + $0x1e0] sm:$0xff] %vm1906_vm7, %v1835_v23  ;;  %2063 = vrot.lane.b32.xlu1 %v6908_v48, %s3453_s11  ;;  %v6909_v23 = vld [vmem:[#allocation80_spill] sm:$0xff] }
 0x330   :  { %2059 = vrot.lane.b32.xlu2 %v6907_v22, %s3453_s11 }
 0x331   :  { %2061 = vrot.lane.b32.xlu0 %v6906_v4, %s3453_s11 }
 0x332   :  { %v1994_v14 = vpop.permute.xlu2 %1993 }
 0x333   :  { %v1839_v16 = vpop.permute.xlu0 %1838  ;;  %2180 = vst.msk [vmem:[#allocation2 + $0x30] sm:$0xff] %vm2173_vm8, %v1994_v14  ;;  %v6912_v14 = vld [vmem:[#allocation141_spill] sm:$0xff] }
 0x334   :  { %1969 = vst.msk [vmem:[#allocation2 + $0x1f0] sm:$0xff] %vm1906_vm7, %v1839_v16  ;;  %v1841_v59 = vpop.permute.xlu1 %1840  ;;  %v6913_v16 = vld [vmem:[#allocation140_spill] sm:$0xff] }
 0x335   :  { %1970 = vst.msk [vmem:[#allocation2 + $0x1f8] sm:$0xff] %vm1906_vm7, %v1841_v59  ;;  %2069 = vrot.lane.b32.xlu1 %v6911_v18, %s3453_s11  ;;  %v6914_v59 = vld [vmem:[#allocation83_spill] sm:$0xff] }
 0x338   :  { %2065 = vrot.lane.b32.xlu2 %v6910_v19, %s3453_s11 }
 0x339   :  { %2067 = vrot.lane.b32.xlu0 %v6909_v23, %s3453_s11 }
 0x33a   :  { %v2000_v4 = vpop.permute.xlu2 %1999 }
 0x33b   :  { %v1984_v22 = vpop.permute.xlu0 %1983  ;;  %2183 = vst.msk [vmem:[#allocation2 + $0x48] sm:$0xff] %vm2173_vm8, %v2000_v4  ;;  %v6915_v4 = vld [vmem:[#allocation90_spill] sm:$0xff] }
 0x33c   :  { %2175 = vst.msk [vmem:[#allocation2 + $0x8] sm:$0xff] %vm2173_vm8, %v1984_v22  ;;  %v1986_v48 = vpop.permute.xlu1 %1985  ;;  %v6916_v22 = vld [vmem:[#allocation142_spill] sm:$0xff] }
 0x33d   :  { %2176 = vst.msk [vmem:[#allocation2 + $0x10] sm:$0xff] %vm2173_vm8, %v1986_v48  ;;  %2075 = vrot.lane.b32.xlu1 %v6914_v59, %s3453_s11  ;;  %v6917_v48 = vld [vmem:[#allocation91_spill] sm:$0xff] }
 0x340   :  { %2071 = vrot.lane.b32.xlu2 %v6913_v16, %s3453_s11 }
 0x341   :  { %2073 = vrot.lane.b32.xlu0 %v6912_v14, %s3453_s11 }
 0x342   :  { %v2006_v23 = vpop.permute.xlu2 %2005 }
 0x343   :  { %v1990_v19 = vpop.permute.xlu0 %1989  ;;  %2186 = vst.msk [vmem:[#allocation2 + $0x60] sm:$0xff] %vm2173_vm8, %v2006_v23  ;;  %v6918_v23 = vld [vmem:[#allocation97_spill] sm:$0xff] }
 0x344   :  { %2178 = vst.msk [vmem:[#allocation2 + $0x20] sm:$0xff] %vm2173_vm8, %v1990_v19  ;;  %v1992_v18 = vpop.permute.xlu1 %1991  ;;  %v6919_v19 = vld [vmem:[#allocation95_spill] sm:$0xff] }
 0x345   :  { %2179 = vst.msk [vmem:[#allocation2 + $0x28] sm:$0xff] %vm2173_vm8, %v1992_v18  ;;  %2081 = vrot.lane.b32.xlu1 %v6917_v48, %s3453_s11  ;;  %v6920_v18 = vld [vmem:[#allocation92_spill] sm:$0xff] }
 0x348   :  { %2077 = vrot.lane.b32.xlu2 %v6916_v22, %s3453_s11 }
 0x349   :  { %2079 = vrot.lane.b32.xlu0 %v6915_v4, %s3453_s11 }
 0x34a   :  { %v2012_v28 = vpop.permute.xlu2 %2011 }
 0x34b   :  { %v1996_v16 = vpop.permute.xlu0 %1995  ;;  %2189 = vst.msk [vmem:[#allocation2 + $0x78] sm:$0xff] %vm2173_vm8, %v2012_v28  ;;  %v6921_v28 = vld [vmem:[#allocation143_spill] sm:$0xff] }
 0x34c   :  { %2181 = vst.msk [vmem:[#allocation2 + $0x38] sm:$0xff] %vm2173_vm8, %v1996_v16  ;;  %v1998_v14 = vpop.permute.xlu1 %1997 }
 0x34d   :  { %2182 = vst.msk [vmem:[#allocation2 + $0x40] sm:$0xff] %vm2173_vm8, %v1998_v14  ;;  %2087 = vrot.lane.b32.xlu1 %v6920_v18, %s3453_s11 }
 0x350   :  { %2083 = vrot.lane.b32.xlu2 %v6919_v19, %s3453_s11 }
 0x351   :  { %2085 = vrot.lane.b32.xlu0 %v6918_v23, %s3453_s11  ;;  %v1979_v23 = vrot.slane %v5359_v49, 2 }
 0x352   :  { %v2018_v48 = vpop.permute.xlu2 %2017 }
 0x353   :  { %v2002_v59 = vpop.permute.xlu0 %2001  ;;  %2192 = vst.msk [vmem:[#allocation2 + $0x90] sm:$0xff] %vm2173_vm8, %v2018_v48 }
 0x354   :  { %2184 = vst.msk [vmem:[#allocation2 + $0x50] sm:$0xff] %vm2173_vm8, %v2002_v59  ;;  %v2004_v57 = vpop.permute.xlu1 %2003  ;;  %v1976_v59 = vrot.slane %v5158_v63, 2 }
 0x355   :  { %2185 = vst.msk [vmem:[#allocation2 + $0x58] sm:$0xff] %vm2173_vm8, %v2004_v57  ;;  %2093 = vrot.lane.b32.xlu1 %v4890_v39, %s3453_s11  ;;  %v1977_v57 = vrot.slane %v5154_v53, 2 }
 0x358   :  { %2089 = vrot.lane.b32.xlu2 %v6921_v28, %s3453_s11 }
 0x359   :  { %2091 = vrot.lane.b32.xlu0 %v4894_v42, %s3453_s11 }
 0x35a   :  { %v2024_v16 = vpop.permute.xlu2 %2023 }
 0x35b   :  { %v2008_v14 = vpop.permute.xlu0 %2007  ;;  %2195 = vst.msk [vmem:[#allocation2 + $0xa8] sm:$0xff] %vm2173_vm8, %v2024_v16  ;;  %v5580_v16 = vsel %vm1047_vm4, %v1976_v59, %v1977_v57  ;;  %v5593_v59 = vsel %vm1047_vm4, %v1977_v57, %v1979_v23 }
 0x35c   :  { %2187 = vst.msk [vmem:[#allocation2 + $0x68] sm:$0xff] %vm2173_vm8, %v2008_v14  ;;  %v2010_v19 = vpop.permute.xlu1 %2009 }
 0x35d   :  { %2188 = vst.msk [vmem:[#allocation2 + $0x70] sm:$0xff] %vm2173_vm8, %v2010_v19  ;;  %2099 = vrot.lane.b32.xlu1 %v4913_v54, %s3453_s11 }
 0x360   :  { %2095 = vrot.lane.b32.xlu2 %v4897_v27, %s3453_s11 }
 0x361   :  { %2097 = vrot.lane.b32.xlu0 %v4917_v25, %s3453_s11 }
 0x362   :  { %v2030_v14 = vpop.permute.xlu2 %2029 }
 0x363   :  { %v2014_v48 = vpop.permute.xlu0 %2013  ;;  %2198 = vst.msk [vmem:[#allocation2 + $0xc0] sm:$0xff] %vm2173_vm8, %v2030_v14 }
 0x364   :  { %2190 = vst.msk [vmem:[#allocation2 + $0x80] sm:$0xff] %vm2173_vm8, %v2014_v48  ;;  %v2016_v19 = vpop.permute.xlu1 %2015 }
 0x365   :  { %2191 = vst.msk [vmem:[#allocation2 + $0x88] sm:$0xff] %vm2173_vm8, %v2016_v19  ;;  %2105 = vrot.lane.b32.xlu1 %v5580_v16, %s3453_s11 }
 0x368   :  { %2101 = vrot.lane.b32.xlu2 %v4920_v3, %s3453_s11 }
 0x369   :  { %2103 = vrot.lane.b32.xlu0 %v4933_v21, %s3453_s11 }
 0x36a   :  { %v2036_v18 = vpop.permute.xlu2 %2035 }
 0x36b   :  { %v2020_v48 = vpop.permute.xlu0 %2019  ;;  %2201 = vst.msk [vmem:[#allocation2 + $0xd8] sm:$0xff] %vm2173_vm8, %v2036_v18 }
 0x36c   :  { %2193 = vst.msk [vmem:[#allocation2 + $0x98] sm:$0xff] %vm2173_vm8, %v2020_v48  ;;  %v2022_v19 = vpop.permute.xlu1 %2021 }
 0x36d   :  { %2194 = vst.msk [vmem:[#allocation2 + $0xa0] sm:$0xff] %vm2173_vm8, %v2022_v19  ;;  %2240 = vrot.lane.b32.xlu1 %v3493_v12, %s3454_s12  ;;  %v6924_v19 = vld [vmem:[#allocation71_spill] sm:$0xff] }
 0x370   :  { %2107 = vrot.lane.b32.xlu2 %v5593_v59, %s3453_s11 }
 0x371   :  { %2238 = vrot.lane.b32.xlu0 %v3496_v13, %s3454_s12 }
 0x372   :  { %v2042_v14 = vpop.permute.xlu2 %2041 }
 0x373   :  { %v2026_v49 = vpop.permute.xlu0 %2025  ;;  %2204 = vst.msk [vmem:[#allocation2 + $0xf0] sm:$0xff] %vm2173_vm8, %v2042_v14 }
 0x374   :  { %2196 = vst.msk [vmem:[#allocation2 + $0xb0] sm:$0xff] %vm2173_vm8, %v2026_v49  ;;  %v2028_v48 = vpop.permute.xlu1 %2027 }
 0x375   :  { %2197 = vst.msk [vmem:[#allocation2 + $0xb8] sm:$0xff] %vm2173_vm8, %v2028_v48  ;;  %2246 = vrot.lane.b32.xlu1 %v3548_v40, %s3454_s12 }
 0x378   :  { %2242 = vrot.lane.b32.xlu2 %v3542_v38, %s3454_s12 }
 0x379   :  { %2244 = vrot.lane.b32.xlu0 %v3539_v37, %s3454_s12 }
 0x37a   :  { %v2048_v12 = vpop.permute.xlu2 %2047 }
 0x37b   :  { %v2032_v13 = vpop.permute.xlu0 %2031  ;;  %2207 = vst.msk [vmem:[#allocation2 + $0x108] sm:$0xff] %vm2173_vm8, %v2048_v12  ;;  %v6927_v12 = vld [vmem:[#allocation76_spill] sm:$0xff] }
 0x37c   :  { %2199 = vst.msk [vmem:[#allocation2 + $0xc8] sm:$0xff] %vm2173_vm8, %v2032_v13  ;;  %v2034_v23 = vpop.permute.xlu1 %2033  ;;  %v6926_v13 = vld [vmem:[#allocation73_spill] sm:$0xff] }
 0x37d   :  { %2200 = vst.msk [vmem:[#allocation2 + $0xd0] sm:$0xff] %vm2173_vm8, %v2034_v23  ;;  %2252 = vrot.lane.b32.xlu1 %v3593_v1, %s3454_s12 }
 0x380   :  { %2248 = vrot.lane.b32.xlu2 %v3556_v44, %s3454_s12 }
 0x381   :  { %2250 = vrot.lane.b32.xlu0 %v3608_v6, %s3454_s12 }
 0x382   :  { %v2054_v38 = vpop.permute.xlu2 %2053 }
 0x383   :  { %v2038_v37 = vpop.permute.xlu0 %2037  ;;  %2210 = vst.msk [vmem:[#allocation2 + $0x120] sm:$0xff] %vm2173_vm8, %v2054_v38  ;;  %v6928_v38 = vld [vmem:[#allocation86_spill] sm:$0xff] }
 0x384   :  { %2202 = vst.msk [vmem:[#allocation2 + $0xe0] sm:$0xff] %vm2173_vm8, %v2038_v37  ;;  %v2040_v40 = vpop.permute.xlu1 %2039 }
 0x385   :  { %2203 = vst.msk [vmem:[#allocation2 + $0xe8] sm:$0xff] %vm2173_vm8, %v2040_v40  ;;  %2258 = vrot.lane.b32.xlu1 %v3634_v29, %s3454_s12 }
 0x388   :  { %2254 = vrot.lane.b32.xlu2 %v3614_v8, %s3454_s12 }
 0x389   :  { %2256 = vrot.lane.b32.xlu0 %v3611_v7, %s3454_s12 }
 0x38a   :  { %v2060_v1 = vpop.permute.xlu2 %2059 }
 0x38b   :  { %v2044_v44 = vpop.permute.xlu0 %2043  ;;  %2213 = vst.msk [vmem:[#allocation2 + $0x138] sm:$0xff] %vm2173_vm8, %v2060_v1 }
 0x38c   :  { %2205 = vst.msk [vmem:[#allocation2 + $0xf8] sm:$0xff] %vm2173_vm8, %v2044_v44  ;;  %v2046_v6 = vpop.permute.xlu1 %2045 }
 0x38d   :  { %2206 = vst.msk [vmem:[#allocation2 + $0x100] sm:$0xff] %vm2173_vm8, %v2046_v6  ;;  %2264 = vrot.lane.b32.xlu1 %v3677_v60, %s3454_s12 }
 0x390   :  { %2260 = vrot.lane.b32.xlu2 %v3643_v32, %s3454_s12 }
 0x391   :  { %2262 = vrot.lane.b32.xlu0 %v3692_v9, %s3454_s12 }
 0x392   :  { %v2066_v8 = vpop.permute.xlu2 %2065 }
 0x393   :  { %v2050_v7 = vpop.permute.xlu0 %2049  ;;  %2216 = vst.msk [vmem:[#allocation2 + $0x150] sm:$0xff] %vm2173_vm8, %v2066_v8  ;;  %v6930_v8 = vld [vmem:[#allocation100_spill] sm:$0xff] }
 0x394   :  { %2208 = vst.msk [vmem:[#allocation2 + $0x110] sm:$0xff] %vm2173_vm8, %v2050_v7  ;;  %v2052_v29 = vpop.permute.xlu1 %2051 }
 0x395   :  { %2209 = vst.msk [vmem:[#allocation2 + $0x118] sm:$0xff] %vm2173_vm8, %v2052_v29  ;;  %2270 = vrot.lane.b32.xlu1 %v3718_v46, %s3454_s12 }
 0x398   :  { %2266 = vrot.lane.b32.xlu2 %v3698_v11, %s3454_s12 }
 0x399   :  { %2268 = vrot.lane.b32.xlu0 %v3695_v10, %s3454_s12 }
 0x39a   :  { %v2072_v60 = vpop.permute.xlu2 %2071 }
 0x39b   :  { %v2056_v32 = vpop.permute.xlu0 %2055  ;;  %2219 = vst.msk [vmem:[#allocation2 + $0x168] sm:$0xff] %vm2173_vm8, %v2072_v60  ;;  %v6933_v60 = vld [vmem:[#allocation113_spill] sm:$0xff] }
 0x39c   :  { %2211 = vst.msk [vmem:[#allocation2 + $0x128] sm:$0xff] %vm2173_vm8, %v2056_v32  ;;  %v2058_v9 = vpop.permute.xlu1 %2057 }
 0x39d   :  { %2212 = vst.msk [vmem:[#allocation2 + $0x130] sm:$0xff] %vm2173_vm8, %v2058_v9  ;;  %2276 = vrot.lane.b32.xlu1 %v6717_v47, %s3454_s12  ;;  %v6934_v9 = vld [vmem:[#allocation105_spill] sm:$0xff] }
 0x3a0   :  { %2272 = vrot.lane.b32.xlu2 %v3730_v52, %s3454_s12 }
 0x3a1   :  { %2274 = vrot.lane.b32.xlu0 %v6719_v20, %s3454_s12 }
 0x3a2   :  { %v2078_v11 = vpop.permute.xlu2 %2077 }
 0x3a3   :  { %v2062_v10 = vpop.permute.xlu0 %2061  ;;  %2222 = vst.msk [vmem:[#allocation2 + $0x180] sm:$0xff] %vm2173_vm8, %v2078_v11 }
 0x3a4   :  { %2214 = vst.msk [vmem:[#allocation2 + $0x140] sm:$0xff] %vm2173_vm8, %v2062_v10  ;;  %v2064_v46 = vpop.permute.xlu1 %2063  ;;  %v6935_v10 = vld [vmem:[#allocation112_spill] sm:$0xff] }
 0x3a5   :  { %2215 = vst.msk [vmem:[#allocation2 + $0x148] sm:$0xff] %vm2173_vm8, %v2064_v46  ;;  %2282 = vrot.lane.b32.xlu1 %v6723_v61, %s3454_s12 }
 0x3a8   :  { %2278 = vrot.lane.b32.xlu2 %v3785_v26, %s3454_s12 }
 0x3a9   :  { %2280 = vrot.lane.b32.xlu0 %v3782_v15, %s3454_s12 }
 0x3aa   :  { %v2084_v47 = vpop.permute.xlu2 %2083 }
 0x3ab   :  { %v2068_v52 = vpop.permute.xlu0 %2067  ;;  %2225 = vst.msk [vmem:[#allocation2 + $0x198] sm:$0xff] %vm2173_vm8, %v2084_v47  ;;  %v6936_v47 = vld [vmem:[#allocation114_spill] sm:$0xff] }
 0x3ac   :  { %2217 = vst.msk [vmem:[#allocation2 + $0x158] sm:$0xff] %vm2173_vm8, %v2068_v52  ;;  %v2070_v20 = vpop.permute.xlu1 %2069 }
 0x3ad   :  { %2218 = vst.msk [vmem:[#allocation2 + $0x160] sm:$0xff] %vm2173_vm8, %v2070_v20  ;;  %2288 = vrot.lane.b32.xlu1 %v6730_v24, %s3454_s12  ;;  %v6937_v20 = vld [vmem:[#allocation115_spill] sm:$0xff] }
 0x3b0   :  { %2284 = vrot.lane.b32.xlu2 %v6724_v62, %s3454_s12 }
 0x3b1   :  { %2286 = vrot.lane.b32.xlu0 %v6732_v51, %s3454_s12 }
 0x3b2   :  { %v2090_v26 = vpop.permute.xlu2 %2089 }
 0x3b3   :  { %v2074_v15 = vpop.permute.xlu0 %2073  ;;  %2228 = vst.msk [vmem:[#allocation2 + $0x1b0] sm:$0xff] %vm2173_vm8, %v2090_v26 }
 0x3b4   :  { %2220 = vst.msk [vmem:[#allocation2 + $0x170] sm:$0xff] %vm2173_vm8, %v2074_v15  ;;  %v2076_v61 = vpop.permute.xlu1 %2075 }
 0x3b5   :  { %2221 = vst.msk [vmem:[#allocation2 + $0x178] sm:$0xff] %vm2173_vm8, %v2076_v61  ;;  %2294 = vrot.lane.b32.xlu1 %v5036_v2, %s3454_s12 }
 0x3b8   :  { %2290 = vrot.lane.b32.xlu2 %v3869_v33, %s3454_s12 }
 0x3b9   :  { %2292 = vrot.lane.b32.xlu0 %v3866_v41, %s3454_s12 }
 0x3ba   :  { %v2096_v24 = vpop.permute.xlu2 %2095 }
 0x3bb   :  { %v2080_v62 = vpop.permute.xlu0 %2079  ;;  %2231 = vst.msk [vmem:[#allocation2 + $0x1c8] sm:$0xff] %vm2173_vm8, %v2096_v24  ;;  %v6939_v24 = vld [vmem:[#allocation8_spill] sm:$0xff] }
 0x3bc   :  { %2223 = vst.msk [vmem:[#allocation2 + $0x188] sm:$0xff] %vm2173_vm8, %v2080_v62  ;;  %v2082_v51 = vpop.permute.xlu1 %2081  ;;  %v6938_v62 = vld [vmem:[#allocation6_spill] sm:$0xff] }
 0x3bd   :  { %2224 = vst.msk [vmem:[#allocation2 + $0x190] sm:$0xff] %vm2173_vm8, %v2082_v51  ;;  %2300 = vrot.lane.b32.xlu1 %v6790_v55, %s3454_s12 }
 0x3c0   :  { %2296 = vrot.lane.b32.xlu2 %v5042_v56, %s3454_s12  ;;  %v6923_v56 = vld [vmem:[#allocation61_spill] sm:$0xff] }
 0x3c1   :  { %2298 = vrot.lane.b32.xlu0 %v3889_v45, %s3454_s12  ;;  %v6922_v45 = vld [vmem:[#allocation58_spill] sm:$0xff] }
 0x3c2   :  { %v2102_v33 = vpop.permute.xlu2 %2101 }
 0x3c3   :  { %v2086_v41 = vpop.permute.xlu0 %2085  ;;  %2234 = vst.msk [vmem:[#allocation2 + $0x1e0] sm:$0xff] %vm2173_vm8, %v2102_v33  ;;  %v6940_v33 = vld [vmem:[#allocation12_spill] sm:$0xff] }
 0x3c4   :  { %2226 = vst.msk [vmem:[#allocation2 + $0x1a0] sm:$0xff] %vm2173_vm8, %v2086_v41  ;;  %v2088_v2 = vpop.permute.xlu1 %2087 }
 0x3c5   :  { %2227 = vst.msk [vmem:[#allocation2 + $0x1a8] sm:$0xff] %vm2173_vm8, %v2088_v2  ;;  %2306 = vrot.lane.b32.xlu1 %v6923_v56, %s3454_s12  ;;  %v6941_v2 = vld [vmem:[#allocation10_spill] sm:$0xff] }
 0x3c8   :  { %2302 = vrot.lane.b32.xlu2 %v6922_v45, %s3454_s12 }
 0x3c9   :  { %2304 = vrot.lane.b32.xlu0 %v6791_v50, %s3454_s12  ;;  %v6925_v50 = vld [vmem:[#allocation60_spill] sm:$0xff] }
 0x3ca   :  { %v2108_v55 = vpop.permute.xlu2 %2107 }
 0x3cb   :  { %v2092_v18 = vpop.permute.xlu0 %2091  ;;  %2237 = vst.msk [vmem:[#allocation2 + $0x1f8] sm:$0xff] %vm2173_vm8, %v2108_v55  ;;  %v6943_v55 = vld [vmem:[#allocation15_spill] sm:$0xff] }
 0x3cc   :  { %2229 = vst.msk [vmem:[#allocation2 + $0x1b8] sm:$0xff] %vm2173_vm8, %v2092_v18  ;;  %v2094_v57 = vpop.permute.xlu1 %2093 }
 0x3cd   :  { %2230 = vst.msk [vmem:[#allocation2 + $0x1c0] sm:$0xff] %vm2173_vm8, %v2094_v57  ;;  %2312 = vrot.lane.b32.xlu1 %v6795_v35, %s3454_s12  ;;  %v6944_v57 = vld [vmem:[#allocation13_spill] sm:$0xff] }
 0x3d0   :  { %2308 = vrot.lane.b32.xlu2 %v6925_v50, %s3454_s12 }
 0x3d1   :  { %2310 = vrot.lane.b32.xlu0 %v6924_v19, %s3454_s12  ;;  %v6945_v19 = vld [vmem:[#allocation14_spill] sm:$0xff] }
 0x3d2   :  { %v2243_v14 = vpop.permute.xlu2 %2242 }
 0x3d3   :  { %v2098_v49 = vpop.permute.xlu0 %2097  ;;  %2421 = vst.msk [vmem:[#allocation2 + $0x10] sm:$0xff] %vm2418_vm9, %v2243_v14 }
 0x3d4   :  { %2232 = vst.msk [vmem:[#allocation2 + $0x1d0] sm:$0xff] %vm2173_vm8, %v2098_v49  ;;  %v2100_v48 = vpop.permute.xlu1 %2099 }
 0x3d5   :  { %2233 = vst.msk [vmem:[#allocation2 + $0x1d8] sm:$0xff] %vm2173_vm8, %v2100_v48  ;;  %2318 = vrot.lane.b32.xlu1 %v6927_v12, %s3454_s12  ;;  %v6946_v48 = vld [vmem:[#allocation18_spill] sm:$0xff]  ;;  %v6948_v12 = vld [vmem:[#allocation17_spill] sm:$0xff] }
 0x3d8   :  { %2314 = vrot.lane.b32.xlu2 %v6926_v13, %s3454_s12  ;;  %v6947_v13 = vld [vmem:[#allocation16_spill] sm:$0xff] }
 0x3d9   :  { %2316 = vrot.lane.b32.xlu0 %v6796_v58, %s3454_s12  ;;  %v6929_v58 = vld [vmem:[#allocation75_spill] sm:$0xff] }
 0x3da   :  { %v2249_v23 = vpop.permute.xlu2 %2248 }
 0x3db   :  { %v2104_v35 = vpop.permute.xlu0 %2103  ;;  %2424 = vst.msk [vmem:[#allocation2 + $0x28] sm:$0xff] %vm2418_vm9, %v2249_v23 }
 0x3dc   :  { %2235 = vst.msk [vmem:[#allocation2 + $0x1e8] sm:$0xff] %vm2173_vm8, %v2104_v35  ;;  %v2106_v37 = vpop.permute.xlu1 %2105 }
 0x3dd   :  { %2236 = vst.msk [vmem:[#allocation2 + $0x1f0] sm:$0xff] %vm2173_vm8, %v2106_v37  ;;  %2324 = vrot.lane.b32.xlu1 %v6799_v31, %s3454_s12 }
 0x3e0   :  { %2320 = vrot.lane.b32.xlu2 %v6929_v58, %s3454_s12  ;;  %v6950_v58 = vld [vmem:[#allocation19_spill] sm:$0xff] }
 0x3e1   :  { %2322 = vrot.lane.b32.xlu0 %v6928_v38, %s3454_s12  ;;  %v6949_v38 = vld [vmem:[#allocation22_spill] sm:$0xff] }
 0x3e2   :  { %v2255_v44 = vpop.permute.xlu2 %2254 }
 0x3e3   :  { %v2239_v40 = vpop.permute.xlu0 %2238  ;;  %2427 = vst.msk [vmem:[#allocation2 + $0x40] sm:$0xff] %vm2418_vm9, %v2255_v44 }
 0x3e4   :  { %2419 = vst.msk [vmem:[#allocation2] sm:$0xff] %vm2418_vm9, %v2239_v40  ;;  %v2241_v1 = vpop.permute.xlu1 %2240  ;;  %v6951_v40 = vld [vmem:[#allocation21_spill] sm:$0xff] }
 0x3e5   :  { %2420 = vst.msk [vmem:[#allocation2 + $0x8] sm:$0xff] %vm2418_vm9, %v2241_v1  ;;  %2330 = vrot.lane.b32.xlu1 %v6777_v36, %s3454_s12 }
 0x3e8   :  { %2326 = vrot.lane.b32.xlu2 %v6798_v30, %s3454_s12 }
 0x3e9   :  { %2328 = vrot.lane.b32.xlu0 %v6800_v17, %s3454_s12 }
 0x3ea   :  { %v2261_v31 = vpop.permute.xlu2 %2260 }
 0x3eb   :  { %v2245_v6 = vpop.permute.xlu0 %2244  ;;  %2430 = vst.msk [vmem:[#allocation2 + $0x58] sm:$0xff] %vm2418_vm9, %v2261_v31  ;;  %v6952_v31 = vld [vmem:[#allocation29_spill] sm:$0xff] }
 0x3ec   :  { %2422 = vst.msk [vmem:[#allocation2 + $0x18] sm:$0xff] %vm2418_vm9, %v2245_v6  ;;  %v2247_v7 = vpop.permute.xlu1 %2246 }
 0x3ed   :  { %2423 = vst.msk [vmem:[#allocation2 + $0x20] sm:$0xff] %vm2418_vm9, %v2247_v7  ;;  %2336 = vrot.lane.b32.xlu1 %v4290_v0, %s3454_s12  ;;  %v6953_v7 = vld [vmem:[#allocation23_spill] sm:$0xff] }
 0x3f0   :  { %2332 = vrot.lane.b32.xlu2 %v6778_v34, %s3454_s12  ;;  %v6932_v34 = vld [vmem:[#allocation106_spill] sm:$0xff] }
 0x3f1   :  { %2334 = vrot.lane.b32.xlu0 %v4313_v43, %s3454_s12  ;;  %v6931_v43 = vld [vmem:[#allocation101_spill] sm:$0xff] }
 0x3f2   :  { %v2267_v36 = vpop.permute.xlu2 %2266 }
 0x3f3   :  { %v2251_v30 = vpop.permute.xlu0 %2250  ;;  %2433 = vst.msk [vmem:[#allocation2 + $0x70] sm:$0xff] %vm2418_vm9, %v2267_v36 }
 0x3f4   :  { %2425 = vst.msk [vmem:[#allocation2 + $0x30] sm:$0xff] %vm2418_vm9, %v2251_v30  ;;  %v2253_v17 = vpop.permute.xlu1 %2252  ;;  %v6954_v30 = vld [vmem:[#allocation26_spill] sm:$0xff] }
 0x3f5   :  { %2426 = vst.msk [vmem:[#allocation2 + $0x38] sm:$0xff] %vm2418_vm9, %v2253_v17  ;;  %2342 = vrot.lane.b32.xlu1 %v6932_v34, %s3454_s12  ;;  %v6956_v34 = vld [vmem:[#allocation30_spill] sm:$0xff] }
 0x3f8   :  { %2338 = vrot.lane.b32.xlu2 %v6931_v43, %s3454_s12  ;;  %v6955_v43 = vld [vmem:[#allocation35_spill] sm:$0xff] }
 0x3f9   :  { %2340 = vrot.lane.b32.xlu0 %v6930_v8, %s3454_s12 }
 0x3fa   :  { %v2273_v0 = vpop.permute.xlu2 %2272 }
 0x3fb   :  { %v2257_v29 = vpop.permute.xlu0 %2256  ;;  %2436 = vst.msk [vmem:[#allocation2 + $0x88] sm:$0xff] %vm2418_vm9, %v2273_v0 }
 0x3fc   :  { %2428 = vst.msk [vmem:[#allocation2 + $0x48] sm:$0xff] %vm2418_vm9, %v2257_v29  ;;  %v2259_v32 = vpop.permute.xlu1 %2258  ;;  %v6957_v29 = vld [vmem:[#allocation32_spill] sm:$0xff] }
 0x3fd   :  { %2429 = vst.msk [vmem:[#allocation2 + $0x50] sm:$0xff] %vm2418_vm9, %v2259_v32  ;;  %2348 = vrot.lane.b32.xlu1 %v6935_v10, %s3454_s12  ;;  %v6959_v10 = vld [vmem:[#allocation36_spill] sm:$0xff] }
 0x400   :  { %2344 = vrot.lane.b32.xlu2 %v6934_v9, %s3454_s12  ;;  %v6958_v9 = vld [vmem:[#allocation42_spill] sm:$0xff] }
 0x401   :  { %2346 = vrot.lane.b32.xlu0 %v6933_v60, %s3454_s12 }
 0x402   :  { %v2279_v46 = vpop.permute.xlu2 %2278 }
 0x403   :  { %v2263_v11 = vpop.permute.xlu0 %2262  ;;  %2439 = vst.msk [vmem:[#allocation2 + $0xa0] sm:$0xff] %vm2418_vm9, %v2279_v46 }
 0x404   :  { %2431 = vst.msk [vmem:[#allocation2 + $0x60] sm:$0xff] %vm2418_vm9, %v2263_v11  ;;  %v2265_v52 = vpop.permute.xlu1 %2264  ;;  %v6960_v11 = vld [vmem:[#allocation39_spill] sm:$0xff] }
 0x405   :  { %2432 = vst.msk [vmem:[#allocation2 + $0x68] sm:$0xff] %vm2418_vm9, %v2265_v52  ;;  %2354 = vrot.lane.b32.xlu1 %v5158_v63, %s3454_s12 }
 0x408   :  { %2350 = vrot.lane.b32.xlu2 %v6937_v20, %s3454_s12  ;;  %v6961_v20 = vld [vmem:[#allocation47_spill] sm:$0xff] }
 0x409   :  { %2352 = vrot.lane.b32.xlu0 %v6936_v47, %s3454_s12 }
 0x40a   :  { %v2285_v26 = vpop.permute.xlu2 %2284 }
 0x40b   :  { %v2269_v15 = vpop.permute.xlu0 %2268  ;;  %2442 = vst.msk [vmem:[#allocation2 + $0xb8] sm:$0xff] %vm2418_vm9, %v2285_v26  ;;  %v6963_v26 = vld [vmem:[#allocation45_spill] sm:$0xff] }
 0x40c   :  { %2434 = vst.msk [vmem:[#allocation2 + $0x78] sm:$0xff] %vm2418_vm9, %v2269_v15  ;;  %v2271_v61 = vpop.permute.xlu1 %2270  ;;  %v6962_v15 = vld [vmem:[#allocation43_spill] sm:$0xff] }
 0x40d   :  { %2435 = vst.msk [vmem:[#allocation2 + $0x80] sm:$0xff] %vm2418_vm9, %v2271_v61  ;;  %2485 = vrot.lane.b32.xlu1 %v6939_v24, %s3455_s13 }
 0x410   :  { %2356 = vrot.lane.b32.xlu2 %v5154_v53, %s3454_s12  ;;  %v6942_v53 = vld [vmem:[#allocation11_spill] sm:$0xff] }
 0x411   :  { %2483 = vrot.lane.b32.xlu0 %v6938_v62, %s3455_s13 }
 0x412   :  { %v2291_v51 = vpop.permute.xlu2 %2290 }
 0x413   :  { %v2275_v63 = vpop.permute.xlu0 %2274  ;;  %2445 = vst.msk [vmem:[#allocation2 + $0xd0] sm:$0xff] %vm2418_vm9, %v2291_v51 }
 0x414   :  { %2437 = vst.msk [vmem:[#allocation2 + $0x90] sm:$0xff] %vm2418_vm9, %v2275_v63  ;;  %v2277_v41 = vpop.permute.xlu1 %2276  ;;  %v6964_v63 = vld [vmem:[#allocation48_spill] sm:$0xff] }
 0x415   :  { %2438 = vst.msk [vmem:[#allocation2 + $0x98] sm:$0xff] %vm2418_vm9, %v2277_v41  ;;  %2491 = vrot.lane.b32.xlu1 %v6942_v53, %s3455_s13  ;;  %v6966_v53 = vld [vmem:[#allocation51_spill] sm:$0xff] }
 0x416   :  { %2449 = vst.msk [vmem:[#allocation2 + $0xf0] sm:$0xff] %vm2418_vm9, %v2291_v51  ;;  %v6965_v51 = vld [vmem:[#allocation108_spill] sm:$0xff] }
 0x418   :  { %2487 = vrot.lane.b32.xlu2 %v6941_v2, %s3455_s13 }
 0x419   :  { %2489 = vrot.lane.b32.xlu0 %v6940_v33, %s3455_s13 }
 0x41a   :  { %v2297_v56 = vpop.permute.xlu2 %2296 }
 0x41b   :  { %v2281_v45 = vpop.permute.xlu0 %2280  ;;  %2448 = vst.msk [vmem:[#allocation2 + $0xe8] sm:$0xff] %vm2418_vm9, %v2297_v56 }
 0x41c   :  { %2440 = vst.msk [vmem:[#allocation2 + $0xa8] sm:$0xff] %vm2418_vm9, %v2281_v45  ;;  %v2283_v18 = vpop.permute.xlu1 %2282  ;;  %v6968_v45 = vld [vmem:[#allocation55_spill] sm:$0xff] }
 0x41d   :  { %2441 = vst.msk [vmem:[#allocation2 + $0xb0] sm:$0xff] %vm2418_vm9, %v2283_v18  ;;  %2497 = vrot.lane.b32.xlu1 %v6945_v19, %s3455_s13  ;;  %v6970_v19 = vld [vmem:[#allocation63_spill] sm:$0xff] }
 0x420   :  { %2493 = vrot.lane.b32.xlu2 %v6944_v57, %s3455_s13  ;;  %v6969_v57 = vld [vmem:[#allocation69_spill] sm:$0xff] }
 0x421   :  { %2495 = vrot.lane.b32.xlu0 %v6943_v55, %s3455_s13 }
 0x422   :  { %v2303_v49 = vpop.permute.xlu2 %2302 }
 0x423   :  { %v2287_v50 = vpop.permute.xlu0 %2286  ;;  %2453 = vst.msk [vmem:[#allocation2 + $0x110] sm:$0xff] %vm2418_vm9, %v2303_v49 }
 0x424   :  { %2443 = vst.msk [vmem:[#allocation2 + $0xc0] sm:$0xff] %vm2418_vm9, %v2287_v50  ;;  %v2289_v14 = vpop.permute.xlu1 %2288  ;;  %v6971_v50 = vld [vmem:[#allocation66_spill] sm:$0xff] }
 0x425   :  { %2444 = vst.msk [vmem:[#allocation2 + $0xc8] sm:$0xff] %vm2418_vm9, %v2289_v14  ;;  %2503 = vrot.lane.b32.xlu1 %v6948_v12, %s3455_s13  ;;  %v6973_v12 = vld [vmem:[#allocation70_spill] sm:$0xff] }
 0x428   :  { %2499 = vrot.lane.b32.xlu2 %v6947_v13, %s3455_s13  ;;  %v6972_v13 = vld [vmem:[#allocation77_spill] sm:$0xff] }
 0x429   :  { %2501 = vrot.lane.b32.xlu0 %v6946_v48, %s3455_s13 }
 0x42a   :  { %v2309_v23 = vpop.permute.xlu2 %2308 }
 0x42b   :  { %v2293_v35 = vpop.permute.xlu0 %2292  ;;  %2456 = vst.msk [vmem:[#allocation2 + $0x128] sm:$0xff] %vm2418_vm9, %v2309_v23 }
 0x42c   :  { %2446 = vst.msk [vmem:[#allocation2 + $0xd8] sm:$0xff] %vm2418_vm9, %v2293_v35  ;;  %v2295_v37 = vpop.permute.xlu1 %2294 }
 0x42d   :  { %2450 = vst.msk [vmem:[#allocation2 + $0xf8] sm:$0xff] %vm2418_vm9, %v2293_v35  ;;  %2509 = vrot.lane.b32.xlu1 %v6951_v40, %s3455_s13  ;;  %v6974_v35 = vld [vmem:[#allocation74_spill] sm:$0xff] }
 0x42e   :  { %2447 = vst.msk [vmem:[#allocation2 + $0xe0] sm:$0xff] %vm2418_vm9, %v2295_v37  ;;  %v6976_v40 = vld [vmem:[#allocation78_spill] sm:$0xff] }
 0x430   :  { %2505 = vrot.lane.b32.xlu2 %v6950_v58, %s3455_s13  ;;  %v6975_v58 = vld [vmem:[#allocation84_spill] sm:$0xff] }
 0x431   :  { %2507 = vrot.lane.b32.xlu0 %v6949_v38, %s3455_s13 }
 0x432   :  { %v2315_v1 = vpop.permute.xlu2 %2314 }
 0x433   :  { %v2299_v44 = vpop.permute.xlu0 %2298  ;;  %2459 = vst.msk [vmem:[#allocation2 + $0x140] sm:$0xff] %vm2418_vm9, %v2315_v1 }
 0x434   :  { %2451 = vst.msk [vmem:[#allocation2 + $0x100] sm:$0xff] %vm2418_vm9, %v2299_v44  ;;  %v2301_v6 = vpop.permute.xlu1 %2300  ;;  %v6977_v44 = vld [vmem:[#allocation98_spill] sm:$0xff] }
 0x435   :  { %2452 = vst.msk [vmem:[#allocation2 + $0x108] sm:$0xff] %vm2418_vm9, %v2301_v6  ;;  %2515 = vrot.lane.b32.xlu1 %v6954_v30, %s3455_s13 }
 0x438   :  { %2511 = vrot.lane.b32.xlu2 %v6953_v7, %s3455_s13  ;;  %v6978_v7 = vld [vmem:[#allocation120_spill] sm:$0xff] }
 0x439   :  { %2513 = vrot.lane.b32.xlu0 %v6952_v31, %s3455_s13 }
 0x43a   :  { %v2321_v17 = vpop.permute.xlu2 %2320 }
 0x43b   :  { %v2305_v36 = vpop.permute.xlu0 %2304  ;;  %2462 = vst.msk [vmem:[#allocation2 + $0x158] sm:$0xff] %vm2418_vm9, %v2321_v17 }
 0x43c   :  { %2454 = vst.msk [vmem:[#allocation2 + $0x118] sm:$0xff] %vm2418_vm9, %v2305_v36  ;;  %v2307_v8 = vpop.permute.xlu1 %2306 }
 0x43d   :  { %2455 = vst.msk [vmem:[#allocation2 + $0x120] sm:$0xff] %vm2418_vm9, %v2307_v8  ;;  %2521 = vrot.lane.b32.xlu1 %v6957_v29, %s3455_s13  ;;  %v6979_v8 = vld [vmem:[#allocation118_spill] sm:$0xff]  ;;  %v6981_v29 = vld [vmem:[#allocation25_spill] sm:$0xff] }
 0x440   :  { %2517 = vrot.lane.b32.xlu2 %v6956_v34, %s3455_s13 }
 0x441   :  { %2519 = vrot.lane.b32.xlu0 %v6955_v43, %s3455_s13 }
 0x442   :  { %v2327_v32 = vpop.permute.xlu2 %2326 }
 0x443   :  { %v2311_v0 = vpop.permute.xlu0 %2310  ;;  %2465 = vst.msk [vmem:[#allocation2 + $0x170] sm:$0xff] %vm2418_vm9, %v2327_v32 }
 0x444   :  { %2457 = vst.msk [vmem:[#allocation2 + $0x130] sm:$0xff] %vm2418_vm9, %v2311_v0  ;;  %v2313_v60 = vpop.permute.xlu1 %2312  ;;  %v6982_v0 = vld [vmem:[#allocation49_spill] sm:$0xff] }
 0x445   :  { %2458 = vst.msk [vmem:[#allocation2 + $0x138] sm:$0xff] %vm2418_vm9, %v2313_v60  ;;  %2527 = vrot.lane.b32.xlu1 %v6960_v11, %s3455_s13 }
 0x448   :  { %2523 = vrot.lane.b32.xlu2 %v6959_v10, %s3455_s13  ;;  %v6984_v10 = vld [vmem:[#allocation89_spill] sm:$0xff] }
 0x449   :  { %2525 = vrot.lane.b32.xlu0 %v6958_v9, %s3455_s13  ;;  %v6983_v9 = vld [vmem:[#allocation57_spill] sm:$0xff] }
 0x44a   :  { %v2333_v52 = vpop.permute.xlu2 %2332 }
 0x44b   :  { %v2317_v46 = vpop.permute.xlu0 %2316  ;;  %2468 = vst.msk [vmem:[#allocation2 + $0x188] sm:$0xff] %vm2418_vm9, %v2333_v52 }
 0x44c   :  { %2460 = vst.msk [vmem:[#allocation2 + $0x148] sm:$0xff] %vm2418_vm9, %v2317_v46  ;;  %v2319_v47 = vpop.permute.xlu1 %2318 }
 0x44d   :  { %2461 = vst.msk [vmem:[#allocation2 + $0x150] sm:$0xff] %vm2418_vm9, %v2319_v47  ;;  %2533 = vrot.lane.b32.xlu1 %v6963_v26, %s3455_s13  ;;  %v6986_v47 = vld [vmem:[#allocation135_spill] sm:$0xff] }
 0x450   :  { %2529 = vrot.lane.b32.xlu2 %v6962_v15, %s3455_s13 }
 0x451   :  { %2531 = vrot.lane.b32.xlu0 %v6961_v20, %s3455_s13  ;;  %v6987_v20 = vld [vmem:[#allocation41_spill] sm:$0xff] }
 0x452   :  { %v2339_v62 = vpop.permute.xlu2 %2338 }
 0x453   :  { %v2323_v61 = vpop.permute.xlu0 %2322  ;;  %2471 = vst.msk [vmem:[#allocation2 + $0x1a0] sm:$0xff] %vm2418_vm9, %v2339_v62  ;;  %v6988_v62 = vld [vmem:[#allocation46_spill] sm:$0xff] }
 0x454   :  { %2463 = vst.msk [vmem:[#allocation2 + $0x160] sm:$0xff] %vm2418_vm9, %v2323_v61  ;;  %v2325_v24 = vpop.permute.xlu1 %2324 }
 0x455   :  { %2464 = vst.msk [vmem:[#allocation2 + $0x168] sm:$0xff] %vm2418_vm9, %v2325_v24  ;;  %2539 = vrot.lane.b32.xlu1 %v6965_v51, %s3455_s13  ;;  %v6989_v24 = vld [vmem:[#allocation93_spill] sm:$0xff] }
 0x458   :  { %2535 = vrot.lane.b32.xlu2 %v6964_v63, %s3455_s13 }
 0x459   :  { %2537 = vrot.lane.b32.xlu0 %v6831_v5, %s3455_s13  ;;  %v6967_v5 = vld [vmem:[#allocation107_spill] sm:$0xff] }
 0x45a   :  { %v2345_v33 = vpop.permute.xlu2 %2344 }
 0x45b   :  { %v2329_v41 = vpop.permute.xlu0 %2328  ;;  %2474 = vst.msk [vmem:[#allocation2 + $0x1b8] sm:$0xff] %vm2418_vm9, %v2345_v33  ;;  %v6991_v33 = vld [vmem:[#allocation20_spill] sm:$0xff] }
 0x45c   :  { %2466 = vst.msk [vmem:[#allocation2 + $0x178] sm:$0xff] %vm2418_vm9, %v2329_v41  ;;  %v2331_v2 = vpop.permute.xlu1 %2330 }
 0x45d   :  { %2467 = vst.msk [vmem:[#allocation2 + $0x180] sm:$0xff] %vm2418_vm9, %v2331_v2  ;;  %2545 = vrot.lane.b32.xlu1 %v6968_v45, %s3455_s13  ;;  %v6992_v2 = vld [vmem:[#allocation67_spill] sm:$0xff] }
 0x460   :  { %2541 = vrot.lane.b32.xlu2 %v6967_v5, %s3455_s13 }
 0x461   :  { %2543 = vrot.lane.b32.xlu0 %v6966_v53, %s3455_s13 }
 0x462   :  { %v2351_v18 = vpop.permute.xlu2 %2350 }
 0x463   :  { %v2335_v56 = vpop.permute.xlu0 %2334  ;;  %2477 = vst.msk [vmem:[#allocation2 + $0x1d0] sm:$0xff] %vm2418_vm9, %v2351_v18 }
 0x464   :  { %2469 = vst.msk [vmem:[#allocation2 + $0x190] sm:$0xff] %vm2418_vm9, %v2335_v56  ;;  %v2337_v55 = vpop.permute.xlu1 %2336  ;;  %v6993_v56 = vld [vmem:[#allocation140_spill] sm:$0xff] }
 0x465   :  { %2470 = vst.msk [vmem:[#allocation2 + $0x198] sm:$0xff] %vm2418_vm9, %v2337_v55  ;;  %2551 = vrot.lane.b32.xlu1 %v6971_v50, %s3455_s13  ;;  %v6996_v50 = vld [vmem:[#allocation81_spill] sm:$0xff] }
 0x466   :  { %2481 = vst.msk [vmem:[#allocation2 + $0x1f0] sm:$0xff] %vm2418_vm9, %v2351_v18  ;;  %v6994_v18 = vld [vmem:[#allocation85_spill] sm:$0xff] }
 0x468   :  { %2547 = vrot.lane.b32.xlu2 %v6970_v19, %s3455_s13 }
 0x469   :  { %2549 = vrot.lane.b32.xlu0 %v6969_v57, %s3455_s13 }
 0x46a   :  { %v2357_v14 = vpop.permute.xlu2 %2356 }
 0x46b   :  { %v2341_v49 = vpop.permute.xlu0 %2340  ;;  %2480 = vst.msk [vmem:[#allocation2 + $0x1e8] sm:$0xff] %vm2418_vm9, %v2357_v14  ;;  %v6998_v14 = vld [vmem:[#allocation79_spill] sm:$0xff] }
 0x46c   :  { %2472 = vst.msk [vmem:[#allocation2 + $0x1a8] sm:$0xff] %vm2418_vm9, %v2341_v49  ;;  %v2343_v48 = vpop.permute.xlu1 %2342  ;;  %v6997_v49 = vld [vmem:[#allocation72_spill] sm:$0xff] }
 0x46d   :  { %2473 = vst.msk [vmem:[#allocation2 + $0x1b0] sm:$0xff] %vm2418_vm9, %v2343_v48  ;;  %2557 = vrot.lane.b32.xlu1 %v6974_v35, %s3455_s13  ;;  %v6999_v35 = vld [vmem:[#allocation116_spill] sm:$0xff] }
 0x470   :  { %2553 = vrot.lane.b32.xlu2 %v6973_v12, %s3455_s13 }
 0x471   :  { %2555 = vrot.lane.b32.xlu0 %v6972_v13, %s3455_s13 }
 0x472   :  { %v2488_v37 = vpop.permute.xlu2 %2487 }
 0x473   :  { %v2347_v23 = vpop.permute.xlu0 %2346  ;;  %2666 = vst.msk [vmem:[#allocation2 + $0x10] sm:$0xff] %vm2663_vm10, %v2488_v37  ;;  %v7001_v37 = vld [vmem:[#allocation80_spill] sm:$0xff] }
 0x474   :  { %2475 = vst.msk [vmem:[#allocation2 + $0x1c0] sm:$0xff] %vm2418_vm9, %v2347_v23  ;;  %v2349_v38 = vpop.permute.xlu1 %2348  ;;  %v7000_v23 = vld [vmem:[#allocation133_spill] sm:$0xff] }
 0x475   :  { %2476 = vst.msk [vmem:[#allocation2 + $0x1c8] sm:$0xff] %vm2418_vm9, %v2349_v38  ;;  %2573 = vrot.lane.b32.xlu1 %v6977_v44, %s3455_s13  ;;  %v7002_v44 = vld [vmem:[#allocation131_spill] sm:$0xff] }
 0x478   :  { %2559 = vrot.lane.b32.xlu2 %v6976_v40, %s3455_s13 }
 0x479   :  { %2561 = vrot.lane.b32.xlu0 %v6975_v58, %s3455_s13 }
 0x47a   :  { %v2494_v6 = vpop.permute.xlu2 %2493 }
 0x47b   :  { %v2353_v1 = vpop.permute.xlu0 %2352  ;;  %2669 = vst.msk [vmem:[#allocation2 + $0x28] sm:$0xff] %vm2663_vm10, %v2494_v6 }
 0x47c   :  { %2478 = vst.msk [vmem:[#allocation2 + $0x1d8] sm:$0xff] %vm2418_vm9, %v2353_v1  ;;  %v2355_v31 = vpop.permute.xlu1 %2354 }
 0x47d   :  { %2482 = vst.msk [vmem:[#allocation2 + $0x1f8] sm:$0xff] %vm2418_vm9, %v2353_v1  ;;  %2842 = vrot.lane.b32.xlu1 %v4933_v21, %s3456_s14  ;;  %v7003_v1 = vld [vmem:[#allocation117_spill] sm:$0xff] }
 0x47e   :  { %2479 = vst.msk [vmem:[#allocation2 + $0x1e0] sm:$0xff] %vm2418_vm9, %v2355_v31 }
 0x480   :  { %2597 = vrot.lane.b32.xlu2 %v6978_v7, %s3455_s13 }
 0x481   :  { %2818 = vrot.lane.b32.xlu0 %v6915_v4, %s3456_s14  ;;  %v6980_v4 = vld [vmem:[#allocation94_spill] sm:$0xff] }
 0x482   :  { %v2500_v36 = vpop.permute.xlu2 %2499 }
 0x483   :  { %v2484_v30 = vpop.permute.xlu0 %2483  ;;  %2672 = vst.msk [vmem:[#allocation2 + $0x40] sm:$0xff] %vm2663_vm10, %v2500_v36 }
 0x484   :  { %2664 = vst.msk [vmem:[#allocation2] sm:$0xff] %vm2663_vm10, %v2484_v30  ;;  %v2486_v17 = vpop.permute.xlu1 %2485  ;;  %v7004_v30 = vld [vmem:[#allocation139_spill] sm:$0xff] }
 0x485   :  { %2665 = vst.msk [vmem:[#allocation2 + $0x8] sm:$0xff] %vm2663_vm10, %v2486_v17  ;;  %2816 = vrot.lane.b32.xlu1 %v6916_v22, %s3456_s14 }
 0x488   :  { %2571 = vrot.lane.b32.xlu2 %v6980_v4, %s3455_s13  ;;  %v7006_v4 = vld [vmem:[#allocation111_spill] sm:$0xff] }
 0x489   :  { %2595 = vrot.lane.b32.xlu0 %v6979_v8, %s3455_s13 }
 0x48a   :  { %v2506_v21 = vpop.permute.xlu2 %2505 }
 0x48b   :  { %v2490_v43 = vpop.permute.xlu0 %2489  ;;  %2675 = vst.msk [vmem:[#allocation2 + $0x58] sm:$0xff] %vm2663_vm10, %v2506_v21 }
 0x48c   :  { %2667 = vst.msk [vmem:[#allocation2 + $0x18] sm:$0xff] %vm2663_vm10, %v2490_v43  ;;  %v2492_v34 = vpop.permute.xlu1 %2491  ;;  %v7008_v43 = vld [vmem:[#allocation68_spill] sm:$0xff] }
 0x48d   :  { %2668 = vst.msk [vmem:[#allocation2 + $0x20] sm:$0xff] %vm2663_vm10, %v2492_v34  ;;  %2782 = vrot.lane.b32.xlu1 %v6982_v0, %s3456_s14  ;;  %v7009_v0 = vld [vmem:[#allocation130_spill] sm:$0xff] }
 0x490   :  { %2840 = vrot.lane.b32.xlu2 %v4920_v3, %s3456_s14  ;;  %v6985_v3 = vld [vmem:[#allocation83_spill] sm:$0xff] }
 0x491   :  { %2758 = vrot.lane.b32.xlu0 %v6981_v29, %s3456_s14 }
 0x492   :  { %v2512_v22 = vpop.permute.xlu2 %2511 }
 0x493   :  { %v2496_v32 = vpop.permute.xlu0 %2495  ;;  %2678 = vst.msk [vmem:[#allocation2 + $0x70] sm:$0xff] %vm2663_vm10, %v2512_v22 }
 0x494   :  { %2670 = vst.msk [vmem:[#allocation2 + $0x30] sm:$0xff] %vm2663_vm10, %v2496_v32  ;;  %v2498_v60 = vpop.permute.xlu1 %2497  ;;  %v7010_v32 = vld [vmem:[#allocation40_spill] sm:$0xff] }
 0x495   :  { %2671 = vst.msk [vmem:[#allocation2 + $0x38] sm:$0xff] %vm2663_vm10, %v2498_v60  ;;  %2814 = vrot.lane.b32.xlu1 %v6985_v3, %s3456_s14  ;;  %v7012_v3 = vld [vmem:[#allocation109_spill] sm:$0xff] }
 0x498   :  { %2569 = vrot.lane.b32.xlu2 %v6984_v10, %s3455_s13  ;;  %v7011_v10 = vld [vmem:[#allocation138_spill] sm:$0xff] }
 0x499   :  { %2601 = vrot.lane.b32.xlu0 %v6983_v9, %s3455_s13 }
 0x49a   :  { %v2518_v46 = vpop.permute.xlu2 %2517 }
 0x49b   :  { %v2502_v11 = vpop.permute.xlu0 %2501  ;;  %2681 = vst.msk [vmem:[#allocation2 + $0x88] sm:$0xff] %vm2663_vm10, %v2518_v46 }
 0x49c   :  { %2673 = vst.msk [vmem:[#allocation2 + $0x48] sm:$0xff] %vm2663_vm10, %v2502_v11  ;;  %v2504_v52 = vpop.permute.xlu1 %2503 }
 0x49d   :  { %2674 = vst.msk [vmem:[#allocation2 + $0x50] sm:$0xff] %vm2663_vm10, %v2504_v52  ;;  %2780 = vrot.lane.b32.xlu1 %v6987_v20, %s3456_s14  ;;  %v7013_v52 = vld [vmem:[#allocation37_spill] sm:$0xff] }
 0x4a0   :  { %2846 = vrot.lane.b32.xlu2 %v5593_v59, %s3456_s14  ;;  %v6990_v59 = vld [vmem:[#allocation141_spill] sm:$0xff] }
 0x4a1   :  { %2756 = vrot.lane.b32.xlu0 %v6986_v47, %s3456_s14  ;;  %v7014_v47 = vld [vmem:[#allocation128_spill] sm:$0xff] }
 0x4a2   :  { %v2524_v26 = vpop.permute.xlu2 %2523 }
 0x4a3   :  { %v2508_v15 = vpop.permute.xlu0 %2507  ;;  %2684 = vst.msk [vmem:[#allocation2 + $0xa0] sm:$0xff] %vm2663_vm10, %v2524_v26 }
 0x4a4   :  { %2676 = vst.msk [vmem:[#allocation2 + $0x60] sm:$0xff] %vm2663_vm10, %v2508_v15  ;;  %v2510_v61 = vpop.permute.xlu1 %2509 }
 0x4a5   :  { %2677 = vst.msk [vmem:[#allocation2 + $0x68] sm:$0xff] %vm2663_vm10, %v2510_v61  ;;  %2812 = vrot.lane.b32.xlu1 %v6990_v59, %s3456_s14  ;;  %v7017_v59 = vld [vmem:[#allocation129_spill] sm:$0xff] }
 0x4a8   :  { %2567 = vrot.lane.b32.xlu2 %v6989_v24, %s3455_s13  ;;  %v7016_v24 = vld [vmem:[#allocation137_spill] sm:$0xff] }
 0x4a9   :  { %2599 = vrot.lane.b32.xlu0 %v6988_v62, %s3455_s13 }
 0x4aa   :  { %v2530_v51 = vpop.permute.xlu2 %2529 }
 0x4ab   :  { %v2514_v63 = vpop.permute.xlu0 %2513  ;;  %2687 = vst.msk [vmem:[#allocation2 + $0xb8] sm:$0xff] %vm2663_vm10, %v2530_v51 }
 0x4ac   :  { %2679 = vst.msk [vmem:[#allocation2 + $0x78] sm:$0xff] %vm2663_vm10, %v2514_v63  ;;  %v2516_v41 = vpop.permute.xlu1 %2515 }
 0x4ad   :  { %2680 = vst.msk [vmem:[#allocation2 + $0x80] sm:$0xff] %vm2663_vm10, %v2516_v41  ;;  %2786 = vrot.lane.b32.xlu1 %v6992_v2, %s3456_s14 }
 0x4b0   :  { %2844 = vrot.lane.b32.xlu2 %v5580_v16, %s3456_s14  ;;  %v6995_v16 = vld [vmem:[#allocation134_spill] sm:$0xff] }
 0x4b1   :  { %2754 = vrot.lane.b32.xlu0 %v6991_v33, %s3456_s14 }
 0x4b2   :  { %v2536_v5 = vpop.permute.xlu2 %2535 }
 0x4b3   :  { %v2520_v53 = vpop.permute.xlu0 %2519  ;;  %2690 = vst.msk [vmem:[#allocation2 + $0xd0] sm:$0xff] %vm2663_vm10, %v2536_v5 }
 0x4b4   :  { %2682 = vst.msk [vmem:[#allocation2 + $0x90] sm:$0xff] %vm2663_vm10, %v2520_v53  ;;  %v2522_v45 = vpop.permute.xlu1 %2521  ;;  %v7019_v53 = vld [vmem:[#allocation34_spill] sm:$0xff] }
 0x4b5   :  { %2683 = vst.msk [vmem:[#allocation2 + $0x98] sm:$0xff] %vm2663_vm10, %v2522_v45  ;;  %2752 = vrot.lane.b32.xlu1 %v6995_v16, %s3456_s14 }
 0x4b6   :  { %2694 = vst.msk [vmem:[#allocation2 + $0xf0] sm:$0xff] %vm2663_vm10, %v2536_v5  ;;  %v7020_v5 = vld [vmem:[#allocation64_spill] sm:$0xff] }
 0x4b8   :  { %2565 = vrot.lane.b32.xlu2 %v6994_v18, %s3455_s13 }
 0x4b9   :  { %2810 = vrot.lane.b32.xlu0 %v6993_v56, %s3456_s14 }
 0x4ba   :  { %v2542_v57 = vpop.permute.xlu2 %2541 }
 0x4bb   :  { %v2526_v55 = vpop.permute.xlu0 %2525  ;;  %2693 = vst.msk [vmem:[#allocation2 + $0xe8] sm:$0xff] %vm2663_vm10, %v2542_v57  ;;  %v7021_v57 = vld [vmem:[#allocation127_spill] sm:$0xff] }
 0x4bc   :  { %2685 = vst.msk [vmem:[#allocation2 + $0xa8] sm:$0xff] %vm2663_vm10, %v2526_v55  ;;  %v2528_v19 = vpop.permute.xlu1 %2527 }
 0x4bd   :  { %2686 = vst.msk [vmem:[#allocation2 + $0xb0] sm:$0xff] %vm2663_vm10, %v2528_v19  ;;  %2808 = vrot.lane.b32.xlu1 %v6998_v14, %s3456_s14  ;;  %v7022_v19 = vld [vmem:[#allocation33_spill] sm:$0xff] }
 0x4c0   :  { %2784 = vrot.lane.b32.xlu2 %v6997_v49, %s3456_s14 }
 0x4c1   :  { %2563 = vrot.lane.b32.xlu0 %v6996_v50, %s3455_s13 }
 0x4c2   :  { %v2548_v13 = vpop.permute.xlu2 %2547 }
 0x4c3   :  { %v2532_v48 = vpop.permute.xlu0 %2531  ;;  %2698 = vst.msk [vmem:[#allocation2 + $0x110] sm:$0xff] %vm2663_vm10, %v2548_v13 }
 0x4c4   :  { %2688 = vst.msk [vmem:[#allocation2 + $0xc0] sm:$0xff] %vm2663_vm10, %v2532_v48  ;;  %v2534_v12 = vpop.permute.xlu1 %2533 }
 0x4c5   :  { %2689 = vst.msk [vmem:[#allocation2 + $0xc8] sm:$0xff] %vm2663_vm10, %v2534_v12  ;;  %2806 = vrot.lane.b32.xlu1 %v7001_v37, %s3456_s14  ;;  %v7024_v12 = vld [vmem:[#allocation102_spill] sm:$0xff] }
 0x4c8   :  { %2750 = vrot.lane.b32.xlu2 %v7000_v23, %s3456_s14 }
 0x4c9   :  { %2593 = vrot.lane.b32.xlu0 %v6999_v35, %s3455_s13  ;;  %v7025_v35 = vld [vmem:[#allocation92_spill] sm:$0xff] }
 0x4ca   :  { %v2554_v58 = vpop.permute.xlu2 %2553 }
 0x4cb   :  { %v2538_v38 = vpop.permute.xlu0 %2537  ;;  %2701 = vst.msk [vmem:[#allocation2 + $0x128] sm:$0xff] %vm2663_vm10, %v2554_v58 }
 0x4cc   :  { %2691 = vst.msk [vmem:[#allocation2 + $0xd8] sm:$0xff] %vm2663_vm10, %v2538_v38  ;;  %v2540_v40 = vpop.permute.xlu1 %2539 }
 0x4cd   :  { %2695 = vst.msk [vmem:[#allocation2 + $0xf8] sm:$0xff] %vm2663_vm10, %v2538_v38  ;;  %2591 = vrot.lane.b32.xlu1 %v7003_v1, %s3455_s13  ;;  %v7027_v1 = vld [vmem:[#allocation125_spill] sm:$0xff] }
 0x4ce   :  { %2692 = vst.msk [vmem:[#allocation2 + $0xe0] sm:$0xff] %vm2663_vm10, %v2540_v40 }
 0x4d0   :  { %2838 = vrot.lane.b32.xlu2 %v4913_v54, %s3456_s14  ;;  %v7005_v54 = vld [vmem:[#allocation132_spill] sm:$0xff] }
 0x4d1   :  { %2748 = vrot.lane.b32.xlu0 %v7002_v44, %s3456_s14  ;;  %v7026_v44 = vld [vmem:[#allocation31_spill] sm:$0xff] }
 0x4d2   :  { %v2560_v31 = vpop.permute.xlu2 %2559 }
 0x4d3   :  { %v2544_v6 = vpop.permute.xlu0 %2543  ;;  %2704 = vst.msk [vmem:[#allocation2 + $0x140] sm:$0xff] %vm2663_vm10, %v2560_v31 }
 0x4d4   :  { %2696 = vst.msk [vmem:[#allocation2 + $0x100] sm:$0xff] %vm2663_vm10, %v2544_v6  ;;  %v2546_v7 = vpop.permute.xlu1 %2545  ;;  %v7028_v6 = vld [vmem:[#allocation104_spill] sm:$0xff] }
 0x4d5   :  { %2697 = vst.msk [vmem:[#allocation2 + $0x108] sm:$0xff] %vm2663_vm10, %v2546_v7  ;;  %2746 = vrot.lane.b32.xlu1 %v7005_v54, %s3456_s14 }
 0x4d8   :  { %2804 = vrot.lane.b32.xlu2 %v7004_v30, %s3456_s14 }
 0x4d9   :  { %2836 = vrot.lane.b32.xlu0 %v4917_v25, %s3456_s14  ;;  %v7007_v25 = vld [vmem:[#allocation38_spill] sm:$0xff] }
 0x4da   :  { %v2598_v17 = vpop.permute.xlu2 %2597 }
 0x4db   :  { %v2550_v36 = vpop.permute.xlu0 %2549  ;;  %2723 = vst.msk [vmem:[#allocation2 + $0x1d8] sm:$0xff] %vm2663_vm10, %v2598_v17 }
 0x4dc   :  { %2699 = vst.msk [vmem:[#allocation2 + $0x118] sm:$0xff] %vm2663_vm10, %v2550_v36  ;;  %v2552_v8 = vpop.permute.xlu1 %2551 }
 0x4dd   :  { %2700 = vst.msk [vmem:[#allocation2 + $0x120] sm:$0xff] %vm2663_vm10, %v2552_v8  ;;  %2802 = vrot.lane.b32.xlu1 %v7008_v43, %s3456_s14  ;;  %v7029_v8 = vld [vmem:[#allocation97_spill] sm:$0xff] }
 0x4de   :  { %2727 = vst.msk [vmem:[#allocation2 + $0x1f8] sm:$0xff] %vm2663_vm10, %v2598_v17 }
 0x4e0   :  { %2778 = vrot.lane.b32.xlu2 %v7007_v25, %s3456_s14  ;;  %v7031_v25 = vld [vmem:[#allocation56_spill] sm:$0xff] }
 0x4e1   :  { %2589 = vrot.lane.b32.xlu0 %v7006_v4, %s3455_s13  ;;  %v7030_v4 = vld [vmem:[#allocation126_spill] sm:$0xff] }
 0x4e2   :  { %v2572_v34 = vpop.permute.xlu2 %2571 }
 0x4e3   :  { %v2556_v21 = vpop.permute.xlu0 %2555  ;;  %2710 = vst.msk [vmem:[#allocation2 + $0x170] sm:$0xff] %vm2663_vm10, %v2572_v34 }
 0x4e4   :  { %2702 = vst.msk [vmem:[#allocation2 + $0x130] sm:$0xff] %vm2663_vm10, %v2556_v21  ;;  %v2558_v29 = vpop.permute.xlu1 %2557 }
 0x4e5   :  { %2703 = vst.msk [vmem:[#allocation2 + $0x138] sm:$0xff] %vm2663_vm10, %v2558_v29  ;;  %2776 = vrot.lane.b32.xlu1 %v7010_v32, %s3456_s14 }
 0x4e8   :  { %2834 = vrot.lane.b32.xlu2 %v4897_v27, %s3456_s14 }
 0x4e9   :  { %2744 = vrot.lane.b32.xlu0 %v7009_v0, %s3456_s14 }
 0x4ea   :  { %v2841_v60 = vpop.permute.xlu2 %2840 }
 0x4eb   :  { %v2562_v22 = vpop.permute.xlu0 %2561 }
 0x4ec   :  { %2705 = vst.msk [vmem:[#allocation2 + $0x148] sm:$0xff] %vm2663_vm10, %v2562_v22  ;;  %v2574_v9 = vpop.permute.xlu1 %2573 }
 0x4ed   :  { %2711 = vst.msk [vmem:[#allocation2 + $0x178] sm:$0xff] %vm2663_vm10, %v2574_v9  ;;  %2832 = vrot.lane.b32.xlu1 %v4890_v39, %s3456_s14  ;;  %v7015_v39 = vld [vmem:[#allocation110_spill] sm:$0xff] }
 0x4ee   :  { %v7033_v9 = vld [vmem:[#allocation50_spill] sm:$0xff] }
 0x4f0   :  { %2587 = vrot.lane.b32.xlu2 %v7012_v3, %s3455_s13 }
 0x4f1   :  { %2800 = vrot.lane.b32.xlu0 %v7011_v10, %s3456_s14  ;;  %v7034_v10 = vld [vmem:[#allocation27_spill] sm:$0xff] }
 0x4f2   :  { %v2570_v11 = vpop.permute.xlu2 %2569 }
 0x4f3   :  { %v2819_v27 = vpop.permute.xlu0 %2818  ;;  %2709 = vst.msk [vmem:[#allocation2 + $0x168] sm:$0xff] %vm2663_vm10, %v2570_v11 }
 0x4f4   :  { %2956 = vst.msk [vmem:[#allocation2 + $0x178] sm:$0xff] %vm2908_vm11, %v2819_v27  ;;  %v2843_v46 = vpop.permute.xlu1 %2842 }
 0x4f5   :  { %2968 = vst.msk [vmem:[#allocation2 + $0x1d8] sm:$0xff] %vm2908_vm11, %v2843_v46  ;;  %2585 = vrot.lane.b32.xlu1 %v7015_v39, %s3455_s13 }
 0x4f6   :  { %2972 = vst.msk [vmem:[#allocation2 + $0x1f8] sm:$0xff] %vm2908_vm11, %v2843_v46 }
 0x4f8   :  { %2742 = vrot.lane.b32.xlu2 %v7014_v47, %s3456_s14 }
 0x4f9   :  { %2774 = vrot.lane.b32.xlu0 %v7013_v52, %s3456_s14 }
 0x4fa   :  { %v2847_v26 = vpop.permute.xlu2 %2846 }
 0x4fb   :  { %v2596_v20 = vpop.permute.xlu0 %2595  ;;  %v3021_v15 = vld [vmem:[#allocation2 + $0x178] sm:$0xff] }
 0x4fc   :  { %2722 = vst.msk [vmem:[#allocation2 + $0x1d0] sm:$0xff] %vm2663_vm10, %v2596_v20  ;;  %v2817_v61 = vpop.permute.xlu1 %2816  ;;  %3377 = vmatpush.xpose.msk.msra.mxu2 %vm3044_vm12, %v3021_v15  ;;  %v3033_v17 = vld [vmem:[#allocation2 + $0x1d8] sm:$0xff]  ;;  %v7035_v15 = vld [vmem:[#allocation124_spill] sm:$0xff] }
 0x4fd   :  { %2726 = vst.msk [vmem:[#allocation2 + $0x1f0] sm:$0xff] %vm2663_vm10, %v2596_v20  ;;  %v3037_v62 = vld [vmem:[#allocation2 + $0x1f8] sm:$0xff]  ;;  %2740 = vrot.lane.b32.xlu1 %v7017_v59, %s3456_s14 }
 0x4fe   :  { %2967 = vst.msk [vmem:[#allocation2 + $0x1d0] sm:$0xff] %vm2908_vm11, %v2841_v60  ;;  %3394 = vmatpush.xpose.msk.msra.mxu3 %vm3044_vm12, %v3037_v62  ;;  %v7037_v62 = vld [vmem:[#allocation95_spill] sm:$0xff] }
 0x4ff   :  { %2971 = vst.msk [vmem:[#allocation2 + $0x1f0] sm:$0xff] %vm2908_vm11, %v2841_v60  ;;  %v7032_v60 = vld [vmem:[#allocation99_spill] sm:$0xff] }
 0x500   :  { %2955 = vst.msk [vmem:[#allocation2 + $0x170] sm:$0xff] %vm2908_vm11, %v2817_v61  ;;  %2798 = vrot.lane.b32.xlu2 %v7016_v24, %s3456_s14 }
 0x501   :  { %2830 = vrot.lane.b32.xlu0 %v4894_v42, %s3456_s14  ;;  %v7018_v42 = vld [vmem:[#allocation103_spill] sm:$0xff] }
 0x502   :  { %v2568_v51 = vpop.permute.xlu2 %2567 }
 0x503   :  { %v2759_v63 = vpop.permute.xlu0 %2758  ;;  %2708 = vst.msk [vmem:[#allocation2 + $0x160] sm:$0xff] %vm2663_vm10, %v2568_v51  ;;  %v7038_v51 = vld [vmem:[#allocation44_spill] sm:$0xff] }
 0x504   :  { %2924 = vst.msk [vmem:[#allocation2 + $0x78] sm:$0xff] %vm2908_vm11, %v2759_v63  ;;  %v2783_v41 = vpop.permute.xlu1 %2782 }
 0x505   :  { %2936 = vst.msk [vmem:[#allocation2 + $0xd8] sm:$0xff] %vm2908_vm11, %v2783_v41  ;;  %2796 = vrot.lane.b32.xlu1 %v7020_v5, %s3456_s14  ;;  %v3032_v0 = vld [vmem:[#allocation2 + $0x1d0] sm:$0xff] }
 0x506   :  { %2940 = vst.msk [vmem:[#allocation2 + $0xf8] sm:$0xff] %vm2908_vm11, %v2783_v41  ;;  %v3036_v33 = vld [vmem:[#allocation2 + $0x1f0] sm:$0xff]  ;;  %v7039_v41 = vld [vmem:[#allocation91_spill] sm:$0xff] }
 0x507   :  { %v3020_v2 = vld [vmem:[#allocation2 + $0x170] sm:$0xff]  ;;  %3395 = vmatpush.xpose.msk.msra.mxu3 %vm3044_vm12, %v3036_v33 }
 0x508   :  { %3378 = vmatpush.xpose.msk.msra.mxu2 %vm3044_vm12, %v3020_v2  ;;  %2772 = vrot.lane.b32.xlu2 %v7019_v53, %s3456_s14  ;;  %v7040_v2 = vld [vmem:[#allocation96_spill] sm:$0xff] }
 0x509   :  { %2583 = vrot.lane.b32.xlu0 %v7018_v42, %s3455_s13 }
 0x50a   :  { %v2845_v18 = vpop.permute.xlu2 %2844 }
 0x50b   :  { %v2602_v45 = vpop.permute.xlu0 %2601  ;;  %v2989_v56 = vld [vmem:[#allocation2 + $0x78] sm:$0xff] }
 0x50c   :  { %2725 = vst.msk [vmem:[#allocation2 + $0x1e8] sm:$0xff] %vm2663_vm10, %v2602_v45  ;;  %v2815_v16 = vpop.permute.xlu1 %2814  ;;  %3343 = vmatpush.xpose.msk.msra.mxu0 %vm3044_vm12, %v2989_v56  ;;  %v3001_v46 = vld [vmem:[#allocation2 + $0xd8] sm:$0xff] }
 0x50d   :  { %2970 = vst.msk [vmem:[#allocation2 + $0x1e8] sm:$0xff] %vm2908_vm11, %v2847_v26  ;;  %v3005_v55 = vld [vmem:[#allocation2 + $0xf8] sm:$0xff]  ;;  %2770 = vrot.lane.b32.xlu1 %v7022_v19, %s3456_s14  ;;  %v7036_v26 = vld [vmem:[#allocation28_spill] sm:$0xff] }
 0x50e   :  { %2954 = vst.msk [vmem:[#allocation2 + $0x168] sm:$0xff] %vm2908_vm11, %v2815_v16  ;;  %3360 = vmatpush.xpose.msk.msra.mxu1 %vm3044_vm12, %v3005_v55  ;;  %v7041_v16 = vld [vmem:[#allocation136_spill] sm:$0xff]  ;;  %v7042_v55 = vld [vmem:[#allocation119_spill] sm:$0xff] }
 0x510   :  { %2828 = vrot.lane.b32.xlu2 %v6921_v28, %s3456_s14  ;;  %v7023_v28 = vld [vmem:[#allocation65_spill] sm:$0xff] }
 0x511   :  { %2738 = vrot.lane.b32.xlu0 %v7021_v57, %s3456_s14 }
 0x512   :  { %v2566_v49 = vpop.permute.xlu2 %2565 }
 0x513   :  { %v2757_v50 = vpop.permute.xlu0 %2756  ;;  %2707 = vst.msk [vmem:[#allocation2 + $0x158] sm:$0xff] %vm2663_vm10, %v2566_v49 }
 0x514   :  { %2923 = vst.msk [vmem:[#allocation2 + $0x70] sm:$0xff] %vm2908_vm11, %v2757_v50  ;;  %v2781_v14 = vpop.permute.xlu1 %2780  ;;  %v3035_v48 = vld [vmem:[#allocation2 + $0x1e8] sm:$0xff]  ;;  %v7043_v50 = vld [vmem:[#allocation121_spill] sm:$0xff] }
 0x515   :  { %2935 = vst.msk [vmem:[#allocation2 + $0xd0] sm:$0xff] %vm2908_vm11, %v2781_v14  ;;  %v3019_v13 = vld [vmem:[#allocation2 + $0x168] sm:$0xff]  ;;  %3396 = vmatpush.xpose.msk.msra.mxu3 %vm3044_vm12, %v3035_v48  ;;  %2826 = vrot.lane.b32.xlu1 %v7025_v35, %s3456_s14 }
 0x516   :  { %2939 = vst.msk [vmem:[#allocation2 + $0xf0] sm:$0xff] %vm2908_vm11, %v2781_v14  ;;  %3379 = vmatpush.xpose.msk.msra.mxu2 %vm3044_vm12, %v3019_v13 }
 0x518   :  { %2581 = vrot.lane.b32.xlu2 %v7024_v12, %s3455_s13 }
 0x519   :  { %2794 = vrot.lane.b32.xlu0 %v7023_v28, %s3456_s14  ;;  %v7044_v28 = vld [vmem:[#allocation24_spill] sm:$0xff] }
 0x51a   :  { %v2785_v38 = vpop.permute.xlu2 %2784 }
 0x51b   :  { %v2600_v23 = vpop.permute.xlu0 %2599  ;;  %v2988_v37 = vld [vmem:[#allocation2 + $0x70] sm:$0xff]  ;;  %2937 = vst.msk [vmem:[#allocation2 + $0xe0] sm:$0xff] %vm2908_vm11, %v2785_v38 }
 0x51c   :  { %2724 = vst.msk [vmem:[#allocation2 + $0x1e0] sm:$0xff] %vm2663_vm10, %v2600_v23  ;;  %v2813_v58 = vpop.permute.xlu1 %2812  ;;  %3344 = vmatpush.xpose.msk.msra.mxu0 %vm3044_vm12, %v2988_v37  ;;  %v3000_v20 = vld [vmem:[#allocation2 + $0xd0] sm:$0xff] }
 0x51d   :  { %2969 = vst.msk [vmem:[#allocation2 + $0x1e0] sm:$0xff] %vm2908_vm11, %v2845_v18  ;;  %v3004_v40 = vld [vmem:[#allocation2 + $0xf0] sm:$0xff]  ;;  %2579 = vrot.lane.b32.xlu1 %v7028_v6, %s3455_s13 }
 0x51e   :  { %2953 = vst.msk [vmem:[#allocation2 + $0x160] sm:$0xff] %vm2908_vm11, %v2813_v58  ;;  %3361 = vmatpush.xpose.msk.msra.mxu1 %vm3044_vm12, %v3004_v40 }
 0x520   :  { %2736 = vrot.lane.b32.xlu2 %v7027_v1, %s3456_s14 }
 0x521   :  { %2768 = vrot.lane.b32.xlu0 %v7026_v44, %s3456_s14 }
 0x522   :  { %v2751_v7 = vpop.permute.xlu2 %2750  ;;  %v3002_v22 = vld [vmem:[#allocation2 + $0xe0] sm:$0xff] }
 0x523   :  { %v2755_v31 = vpop.permute.xlu0 %2754  ;;  %2920 = vst.msk [vmem:[#allocation2 + $0x58] sm:$0xff] %vm2908_vm11, %v2751_v7 }
 0x524   :  { %2922 = vst.msk [vmem:[#allocation2 + $0x68] sm:$0xff] %vm2908_vm11, %v2755_v31  ;;  %v2787_v30 = vpop.permute.xlu1 %2786  ;;  %v3034_v54 = vld [vmem:[#allocation2 + $0x1e0] sm:$0xff] }
 0x525   :  { %2938 = vst.msk [vmem:[#allocation2 + $0xe8] sm:$0xff] %vm2908_vm11, %v2787_v30  ;;  %3397 = vmatpush.xpose.msk.msra.mxu3 %vm3044_vm12, %v3034_v54  ;;  %v3018_v36 = vld [vmem:[#allocation2 + $0x160] sm:$0xff]  ;;  %2734 = vrot.lane.b32.xlu1 %v7030_v4, %s3456_s14 }
 0x526   :  { %3380 = vmatpush.xpose.msk.msra.mxu2 %vm3044_vm12, %v3018_v36 }
 0x528   :  { %2792 = vrot.lane.b32.xlu2 %v7031_v25, %s3456_s14 }
 0x529   :  { %2824 = vrot.lane.b32.xlu0 %v7029_v8, %s3456_s14  ;;  %3398 = vmatpush.xpose.msk.msra.mxu3 %vm3044_vm12, %v3033_v17 }
 0x52a   :  { %v2839_v34 = vpop.permute.xlu2 %2838  ;;  %v2985_v39 = vld [vmem:[#allocation2 + $0x58] sm:$0xff] }
 0x52b   :  { %v2811_v43 = vpop.permute.xlu0 %2810  ;;  %v2987_v21 = vld [vmem:[#allocation2 + $0x68] sm:$0xff] }
 0x52c   :  { %2952 = vst.msk [vmem:[#allocation2 + $0x158] sm:$0xff] %vm2908_vm11, %v2811_v43  ;;  %3345 = vmatpush.xpose.msk.msra.mxu0 %vm3044_vm12, %v2987_v21  ;;  %v3003_v29 = vld [vmem:[#allocation2 + $0xe8] sm:$0xff]  ;;  %v2753_v32 = vpop.permute.xlu1 %2752 }
 0x52d   :  { %3362 = vmatpush.xpose.msk.msra.mxu1 %vm3044_vm12, %v3003_v29  ;;  %3399 = vmatpush.xpose.msk.msra.mxu3 %vm3044_vm12, %v3032_v0  ;;  %2921 = vst.msk [vmem:[#allocation2 + $0x60] sm:$0xff] %vm2908_vm11, %v2753_v32 }
 0x52e   :  { %2790 = vrot.lane.b32.xlu1 %v7033_v9, %s3456_s14 }
 0x530   :  { %2766 = vrot.lane.b32.xlu2 %v7034_v10, %s3456_s14 }
 0x531   :  { %3363 = vmatpush.xpose.msk.msra.mxu1 %vm3044_vm12, %v3002_v22  ;;  %2577 = vrot.lane.b32.xlu0 %v7032_v60, %s3455_s13 }
 0x532   :  { %v2805_v11 = vpop.permute.xlu2 %2804 }
 0x533   :  { %v2564_v3 = vpop.permute.xlu0 %2563  ;;  %v3017_v27 = vld [vmem:[#allocation2 + $0x158] sm:$0xff]  ;;  %2949 = vst.msk [vmem:[#allocation2 + $0x140] sm:$0xff] %vm2908_vm11, %v2805_v11 }
 0x534   :  { %2706 = vst.msk [vmem:[#allocation2 + $0x150] sm:$0xff] %vm2663_vm10, %v2564_v3  ;;  %3381 = vmatpush.xpose.msk.msra.mxu2 %vm3044_vm12, %v3017_v27  ;;  %v2809_v52 = vpop.permute.xlu1 %2808  ;;  %v2986_v47 = vld [vmem:[#allocation2 + $0x60] sm:$0xff] }
 0x535   :  { %3364 = vmatpush.xpose.msk.msra.mxu1 %vm3044_vm12, %v3001_v46  ;;  %2951 = vst.msk [vmem:[#allocation2 + $0x150] sm:$0xff] %vm2908_vm11, %v2809_v52  ;;  %3346 = vmatpush.xpose.msk.msra.mxu0 %vm3044_vm12, %v2986_v47 }
 0x536   :  { %2764 = vrot.lane.b32.xlu1 %v7036_v26, %s3456_s14 }
 0x538   :  { %2822 = vrot.lane.b32.xlu2 %v7037_v62, %s3456_s14 }
 0x539   :  { %3365 = vmatpush.xpose.msk.msra.mxu1 %vm3044_vm12, %v3000_v20  ;;  %2732 = vrot.lane.b32.xlu0 %v7035_v15, %s3456_s14 }
 0x53a   :  { %3347 = vmatpush.xpose.msk.msra.mxu0 %vm3044_vm12, %v2985_v39  ;;  %v2779_v24 = vpop.permute.xlu2 %2778  ;;  %v3014_v18 = vld [vmem:[#allocation2 + $0x140] sm:$0xff] }
 0x53b   :  { %v2594_v61 = vpop.permute.xlu0 %2593  ;;  %2934 = vst.msk [vmem:[#allocation2 + $0xc8] sm:$0xff] %vm2908_vm11, %v2779_v24 }
 0x53c   :  { %2721 = vst.msk [vmem:[#allocation2 + $0x1c8] sm:$0xff] %vm2663_vm10, %v2594_v61  ;;  %v2807_v59 = vpop.permute.xlu1 %2806  ;;  %v3016_v63 = vld [vmem:[#allocation2 + $0x150] sm:$0xff] }
 0x53d   :  { %2966 = vst.msk [vmem:[#allocation2 + $0x1c8] sm:$0xff] %vm2908_vm11, %v2839_v34  ;;  %3382 = vmatpush.xpose.msk.msra.mxu2 %vm3044_vm12, %v3016_v63 }
 0x53e   :  { %2950 = vst.msk [vmem:[#allocation2 + $0x148] sm:$0xff] %vm2908_vm11, %v2807_v59  ;;  %2820 = vrot.lane.b32.xlu1 %v7039_v41, %s3456_s14 }
 0x540   :  { %2575 = vrot.lane.b32.xlu2 %v7040_v2, %s3455_s13 }
 0x541   :  { %2788 = vrot.lane.b32.xlu0 %v7038_v51, %s3456_s14 }
 0x542   :  { %v2835_v42 = vpop.permute.xlu2 %2834  ;;  %v2999_v56 = vld [vmem:[#allocation2 + $0xc8] sm:$0xff] }
 0x543   :  { %v2749_v33 = vpop.permute.xlu0 %2748  ;;  %3366 = vmatpush.xpose.msk.msra.mxu1 %vm3044_vm12, %v2999_v56 }
 0x544   :  { %2919 = vst.msk [vmem:[#allocation2 + $0x50] sm:$0xff] %vm2908_vm11, %v2749_v33  ;;  %v2592_v53 = vpop.permute.xlu1 %2591  ;;  %v3031_v5 = vld [vmem:[#allocation2 + $0x1c8] sm:$0xff] }
 0x545   :  { %2720 = vst.msk [vmem:[#allocation2 + $0x1c0] sm:$0xff] %vm2663_vm10, %v2592_v53  ;;  %v3015_v45 = vld [vmem:[#allocation2 + $0x148] sm:$0xff]  ;;  %3400 = vmatpush.xpose.msk.msra.mxu3 %vm3044_vm12, %v3031_v5 }
 0x546   :  { %3383 = vmatpush.xpose.msk.msra.mxu2 %vm3044_vm12, %v3015_v45  ;;  %2728 = vrot.lane.b32.xlu1 %v7042_v55, %s3456_s14 }
 0x548   :  { %2730 = vrot.lane.b32.xlu2 %v7043_v50, %s3456_s14  ;;  %v3038_v50 = vld [vmem:[%s6269_s2] sm:$0xff] }
 0x549   :  { %2762 = vrot.lane.b32.xlu0 %v7041_v16, %s3456_s14 }
 0x54a   :  { %3384 = vmatpush.xpose.msk.msra.mxu2 %vm3044_vm12, %v3014_v18  ;;  %v2588_v49 = vpop.permute.xlu2 %2587 }
 0x54b   :  { %v2837_v57 = vpop.permute.xlu0 %2836  ;;  %v2984_v19 = vld [vmem:[#allocation2 + $0x50] sm:$0xff]  ;;  %2718 = vst.msk [vmem:[#allocation2 + $0x1b0] sm:$0xff] %vm2663_vm10, %v2588_v49 }
 0x54c   :  { %2965 = vst.msk [vmem:[#allocation2 + $0x1c0] sm:$0xff] %vm2908_vm11, %v2837_v57  ;;  %3348 = vmatpush.xpose.msk.msra.mxu0 %vm3044_vm12, %v2984_v19  ;;  %v2747_v14 = vpop.permute.xlu1 %2746 }
 0x54d   :  { %2918 = vst.msk [vmem:[#allocation2 + $0x48] sm:$0xff] %vm2908_vm11, %v2747_v14 }
 0x550   :  { %2760 = vrot.lane.b32.xlu2 %v7044_v28, %s3456_s14 }
 0x552   :  { %v2743_v12 = vpop.permute.xlu2 %2742 }
 0x553   :  { %v2590_v48 = vpop.permute.xlu0 %2589  ;;  %v3030_v13 = vld [vmem:[#allocation2 + $0x1c0] sm:$0xff]  ;;  %2916 = vst.msk [vmem:[#allocation2 + $0x38] sm:$0xff] %vm2908_vm11, %v2743_v12 }
 0x554   :  { %2719 = vst.msk [vmem:[#allocation2 + $0x1b8] sm:$0xff] %vm2663_vm10, %v2590_v48  ;;  %3401 = vmatpush.xpose.msk.msra.mxu3 %vm3044_vm12, %v3030_v13  ;;  %v2803_v35 = vpop.permute.xlu1 %2802  ;;  %v2983_v23 = vld [vmem:[#allocation2 + $0x48] sm:$0xff]  ;;  %v3457_v48 = vmov 0  }
 0x555   :  { %2964 = vst.msk [vmem:[#allocation2 + $0x1b8] sm:$0xff] %vm2908_vm11, %v2835_v42  ;;  %3349 = vmatpush.xpose.msk.msra.mxu0 %vm3044_vm12, %v2983_v23  ;;  %3422 = vset.pattern.permute.xlu0 %v3457_v48 }
 0x556   :  { %2948 = vst.msk [vmem:[#allocation2 + $0x138] sm:$0xff] %vm2908_vm11, %v2803_v35  ;;  %3041 = vperm.xlu0 %3422, %v3038_v50  }
 0x55a   :  { %v2799_v38 = vpop.permute.xlu2 %2798  ;;  %v2981_v54 = vld [vmem:[#allocation2 + $0x38] sm:$0xff] }
 0x55b   :  { %v2745_v37 = vpop.permute.xlu0 %2744  ;;  %2946 = vst.msk [vmem:[#allocation2 + $0x128] sm:$0xff] %vm2908_vm11, %v2799_v38 }
 0x55c   :  { %2917 = vst.msk [vmem:[#allocation2 + $0x40] sm:$0xff] %vm2908_vm11, %v2745_v37  ;;  %v2777_v58 = vpop.permute.xlu1 %2776  ;;  %v3029_v40 = vld [vmem:[#allocation2 + $0x1b8] sm:$0xff] }
 0x55d   :  { %2933 = vst.msk [vmem:[#allocation2 + $0xc0] sm:$0xff] %vm2908_vm11, %v2777_v58  ;;  %v3013_v44 = vld [vmem:[#allocation2 + $0x138] sm:$0xff]  ;;  %3402 = vmatpush.xpose.msk.msra.mxu3 %vm3044_vm12, %v3029_v40 }
 0x55e   :  { %3385 = vmatpush.xpose.msk.msra.mxu2 %vm3044_vm12, %v3013_v44 }
 0x562   :  { %v2773_v31 = vpop.permute.xlu2 %2772  ;;  %v3011_v43 = vld [vmem:[#allocation2 + $0x128] sm:$0xff] }
 0x563   :  { %v2801_v1 = vpop.permute.xlu0 %2800  ;;  %v2982_v6 = vld [vmem:[#allocation2 + $0x40] sm:$0xff]  ;;  %2931 = vst.msk [vmem:[#allocation2 + $0xb0] sm:$0xff] %vm2908_vm11, %v2773_v31 }
 0x564   :  { %2947 = vst.msk [vmem:[#allocation2 + $0x130] sm:$0xff] %vm2908_vm11, %v2801_v1  ;;  %3350 = vmatpush.xpose.msk.msra.mxu0 %vm3044_vm12, %v2982_v6  ;;  %v2833_v7 = vpop.permute.xlu1 %2832  ;;  %v2998_v30 = vld [vmem:[#allocation2 + $0xc0] sm:$0xff] }
 0x565   :  { %2963 = vst.msk [vmem:[#allocation2 + $0x1b0] sm:$0xff] %vm2908_vm11, %v2833_v7  ;;  %3367 = vmatpush.xpose.msk.msra.mxu1 %vm3044_vm12, %v2998_v30  ;;  %v2973_v6 = vld [vmem:[%s6268_s1] sm:$0xff] }
 0x568   :  { %3351 = vmatpush.xpose.msk.msra.mxu0 %vm3044_vm12, %v2981_v54 }
 0x56a   :  { %v2829_v8 = vpop.permute.xlu2 %2828  ;;  %v2996_v32 = vld [vmem:[#allocation2 + $0xb0] sm:$0xff] }
 0x56b   :  { %v2775_v36 = vpop.permute.xlu0 %2774  ;;  %v3012_v17 = vld [vmem:[#allocation2 + $0x130] sm:$0xff] }
 0x56c   :  { %2932 = vst.msk [vmem:[#allocation2 + $0xb8] sm:$0xff] %vm2908_vm11, %v2775_v36  ;;  %3386 = vmatpush.xpose.msk.msra.mxu2 %vm3044_vm12, %v3012_v17  ;;  %v2586_v4 = vpop.permute.xlu1 %2585  ;;  %v3028_v25 = vld [vmem:[#allocation2 + $0x1b0] sm:$0xff] }
 0x56d   :  { %2717 = vst.msk [vmem:[#allocation2 + $0x1a8] sm:$0xff] %vm2663_vm10, %v2586_v4  ;;  %3403 = vmatpush.xpose.msk.msra.mxu3 %vm3044_vm12, %v3028_v25 }
 0x570   :  { %3387 = vmatpush.xpose.msk.msra.mxu2 %vm3044_vm12, %v3011_v43 }
 0x572   :  { %v2582_v29 = vpop.permute.xlu2 %2581 }
 0x573   :  { %v2831_v21 = vpop.permute.xlu0 %2830  ;;  %v2997_v34 = vld [vmem:[#allocation2 + $0xb8] sm:$0xff]  ;;  %2715 = vst.msk [vmem:[#allocation2 + $0x198] sm:$0xff] %vm2663_vm10, %v2582_v29 }
 0x574   :  { %2962 = vst.msk [vmem:[#allocation2 + $0x1a8] sm:$0xff] %vm2908_vm11, %v2831_v21  ;;  %3368 = vmatpush.xpose.msk.msra.mxu1 %vm3044_vm12, %v2997_v34  ;;  %v2741_v0 = vpop.permute.xlu1 %2740 }
 0x575   :  { %2915 = vst.msk [vmem:[#allocation2 + $0x30] sm:$0xff] %vm2908_vm11, %v2741_v0 }
 0x578   :  { %3369 = vmatpush.xpose.msk.msra.mxu1 %vm3044_vm12, %v2996_v32 }
 0x57a   :  { %v2737_v9 = vpop.permute.xlu2 %2736 }
 0x57b   :  { %v2584_v22 = vpop.permute.xlu0 %2583  ;;  %v3027_v60 = vld [vmem:[#allocation2 + $0x1a8] sm:$0xff]  ;;  %2913 = vst.msk [vmem:[#allocation2 + $0x20] sm:$0xff] %vm2908_vm11, %v2737_v9 }
 0x57c   :  { %2716 = vst.msk [vmem:[#allocation2 + $0x1a0] sm:$0xff] %vm2663_vm10, %v2584_v22  ;;  %3404 = vmatpush.xpose.msk.msra.mxu3 %vm3044_vm12, %v3027_v60  ;;  %v2797_v10 = vpop.permute.xlu1 %2796  ;;  %v2980_v3 = vld [vmem:[#allocation2 + $0x30] sm:$0xff] }
 0x57d   :  { %2961 = vst.msk [vmem:[#allocation2 + $0x1a0] sm:$0xff] %vm2908_vm11, %v2829_v8  ;;  %3352 = vmatpush.xpose.msk.msra.mxu0 %vm3044_vm12, %v2980_v3 }
 0x57e   :  { %2945 = vst.msk [vmem:[#allocation2 + $0x120] sm:$0xff] %vm2908_vm11, %v2797_v10 }
 0x582   :  { %v2793_v52 = vpop.permute.xlu2 %2792  ;;  %v2978_v62 = vld [vmem:[#allocation2 + $0x20] sm:$0xff] }
 0x583   :  { %v2739_v27 = vpop.permute.xlu0 %2738  ;;  %2943 = vst.msk [vmem:[#allocation2 + $0x110] sm:$0xff] %vm2908_vm11, %v2793_v52 }
 0x584   :  { %2914 = vst.msk [vmem:[#allocation2 + $0x28] sm:$0xff] %vm2908_vm11, %v2739_v27  ;;  %v2771_v11 = vpop.permute.xlu1 %2770  ;;  %v3026_v46 = vld [vmem:[#allocation2 + $0x1a0] sm:$0xff] }
 0x585   :  { %2930 = vst.msk [vmem:[#allocation2 + $0xa8] sm:$0xff] %vm2908_vm11, %v2771_v11  ;;  %v3010_v47 = vld [vmem:[#allocation2 + $0x120] sm:$0xff]  ;;  %3405 = vmatpush.xpose.msk.msra.mxu3 %vm3044_vm12, %v3026_v46 }
 0x586   :  { %3388 = vmatpush.xpose.msk.msra.mxu2 %vm3044_vm12, %v3010_v47 }
 0x58a   :  { %v2767_v61 = vpop.permute.xlu2 %2766  ;;  %v3008_v41 = vld [vmem:[#allocation2 + $0x110] sm:$0xff] }
 0x58b   :  { %v2795_v39 = vpop.permute.xlu0 %2794  ;;  %v2979_v20 = vld [vmem:[#allocation2 + $0x28] sm:$0xff]  ;;  %2928 = vst.msk [vmem:[#allocation2 + $0x98] sm:$0xff] %vm2908_vm11, %v2767_v61 }
 0x58c   :  { %2944 = vst.msk [vmem:[#allocation2 + $0x118] sm:$0xff] %vm2908_vm11, %v2795_v39  ;;  %3353 = vmatpush.xpose.msk.msra.mxu0 %vm3044_vm12, %v2979_v20  ;;  %v2827_v15 = vpop.permute.xlu1 %2826  ;;  %v2995_v26 = vld [vmem:[#allocation2 + $0xa8] sm:$0xff] }
 0x58d   :  { %2960 = vst.msk [vmem:[#allocation2 + $0x198] sm:$0xff] %vm2908_vm11, %v2827_v15  ;;  %3370 = vmatpush.xpose.msk.msra.mxu1 %vm3044_vm12, %v2995_v26 }
 0x590   :  { %3354 = vmatpush.xpose.msk.msra.mxu0 %vm3044_vm12, %v2978_v62 }
 0x592   :  { %v2823_v33 = vpop.permute.xlu2 %2822  ;;  %v2993_v5 = vld [vmem:[#allocation2 + $0x98] sm:$0xff] }
 0x593   :  { %v2769_v24 = vpop.permute.xlu0 %2768  ;;  %v3009_v59 = vld [vmem:[#allocation2 + $0x118] sm:$0xff] }
 0x594   :  { %2929 = vst.msk [vmem:[#allocation2 + $0xa0] sm:$0xff] %vm2908_vm11, %v2769_v24  ;;  %3389 = vmatpush.xpose.msk.msra.mxu2 %vm3044_vm12, %v3009_v59  ;;  %v2580_v63 = vpop.permute.xlu1 %2579  ;;  %v3025_v51 = vld [vmem:[#allocation2 + $0x198] sm:$0xff] }
 0x595   :  { %2714 = vst.msk [vmem:[#allocation2 + $0x190] sm:$0xff] %vm2663_vm10, %v2580_v63  ;;  %3406 = vmatpush.xpose.msk.msra.mxu3 %vm3044_vm12, %v3025_v51 }
 0x598   :  { %3390 = vmatpush.xpose.msk.msra.mxu2 %vm3044_vm12, %v3008_v41 }
 0x59a   :  { %v2576_v45 = vpop.permute.xlu2 %2575 }
 0x59b   :  { %v2825_v2 = vpop.permute.xlu0 %2824  ;;  %v2994_v42 = vld [vmem:[#allocation2 + $0xa0] sm:$0xff]  ;;  %2712 = vst.msk [vmem:[#allocation2 + $0x180] sm:$0xff] %vm2663_vm10, %v2576_v45 }
 0x59c   :  { %2959 = vst.msk [vmem:[#allocation2 + $0x190] sm:$0xff] %vm2908_vm11, %v2825_v2  ;;  %3371 = vmatpush.xpose.msk.msra.mxu1 %vm3044_vm12, %v2994_v42  ;;  %v2735_v53 = vpop.permute.xlu1 %2734 }
 0x59d   :  { %2912 = vst.msk [vmem:[#allocation2 + $0x18] sm:$0xff] %vm2908_vm11, %v2735_v53 }
 0x5a0   :  { %3372 = vmatpush.xpose.msk.msra.mxu1 %vm3044_vm12, %v2993_v5 }
 0x5a2   :  { %v2731_v57 = vpop.permute.xlu2 %2730 }
 0x5a3   :  { %v2578_v56 = vpop.permute.xlu0 %2577  ;;  %v3024_v18 = vld [vmem:[#allocation2 + $0x190] sm:$0xff]  ;;  %2910 = vst.msk [vmem:[#allocation2 + $0x8] sm:$0xff] %vm2908_vm11, %v2731_v57 }
 0x5a4   :  { %2713 = vst.msk [vmem:[#allocation2 + $0x188] sm:$0xff] %vm2663_vm10, %v2578_v56  ;;  %3407 = vmatpush.xpose.msk.msra.mxu3 %vm3044_vm12, %v3024_v18  ;;  %v2791_v16 = vpop.permute.xlu1 %2790  ;;  %v2977_v55 = vld [vmem:[#allocation2 + $0x18] sm:$0xff] }
 0x5a5   :  { %2958 = vst.msk [vmem:[#allocation2 + $0x188] sm:$0xff] %vm2908_vm11, %v2823_v33  ;;  %3355 = vmatpush.xpose.msk.msra.mxu0 %vm3044_vm12, %v2977_v55 }
 0x5a6   :  { %2942 = vst.msk [vmem:[#allocation2 + $0x108] sm:$0xff] %vm2908_vm11, %v2791_v16 }
 0x5aa   :  { %v2761_v28 = vpop.permute.xlu2 %2760  ;;  %v2975_v38 = vld [vmem:[#allocation2 + $0x8] sm:$0xff] }
 0x5ab   :  { %v2733_v19 = vpop.permute.xlu0 %2732  ;;  %2925 = vst.msk [vmem:[#allocation2 + $0x80] sm:$0xff] %vm2908_vm11, %v2761_v28 }
 0x5ac   :  { %2911 = vst.msk [vmem:[#allocation2 + $0x10] sm:$0xff] %vm2908_vm11, %v2733_v19  ;;  %v2765_v49 = vpop.permute.xlu1 %2764  ;;  %v3023_v14 = vld [vmem:[#allocation2 + $0x188] sm:$0xff] }
 0x5ad   :  { %2927 = vst.msk [vmem:[#allocation2 + $0x90] sm:$0xff] %vm2908_vm11, %v2765_v49  ;;  %v3007_v13 = vld [vmem:[#allocation2 + $0x108] sm:$0xff]  ;;  %3408 = vmatpush.xpose.msk.msra.mxu3 %vm3044_vm12, %v3023_v14 }
 0x5ae   :  { %3391 = vmatpush.xpose.msk.msra.mxu2 %vm3044_vm12, %v3007_v13 }
 0x5b2   :  { %v2990_v30 = vld [vmem:[#allocation2 + $0x80] sm:$0xff] }
 0x5b3   :  { %v2789_v12 = vpop.permute.xlu0 %2788  ;;  %v2976_v35 = vld [vmem:[#allocation2 + $0x10] sm:$0xff] }
 0x5b4   :  { %2941 = vst.msk [vmem:[#allocation2 + $0x100] sm:$0xff] %vm2908_vm11, %v2789_v12  ;;  %3356 = vmatpush.xpose.msk.msra.mxu0 %vm3044_vm12, %v2976_v35  ;;  %v2821_v23 = vpop.permute.xlu1 %2820  ;;  %v2992_v37 = vld [vmem:[#allocation2 + $0x90] sm:$0xff] }
 0x5b5   :  { %2957 = vst.msk [vmem:[#allocation2 + $0x180] sm:$0xff] %vm2908_vm11, %v2821_v23  ;;  %3373 = vmatpush.xpose.msk.msra.mxu1 %vm3044_vm12, %v2992_v37 }
 0x5b8   :  { %3357 = vmatpush.xpose.msk.msra.mxu0 %vm3044_vm12, %v2975_v38 }
 0x5bb   :  { %v2763_v58 = vpop.permute.xlu0 %2762  ;;  %v3006_v40 = vld [vmem:[#allocation2 + $0x100] sm:$0xff] }
 0x5bc   :  { %2926 = vst.msk [vmem:[#allocation2 + $0x88] sm:$0xff] %vm2908_vm11, %v2763_v58  ;;  %3392 = vmatpush.xpose.msk.msra.mxu2 %vm3044_vm12, %v3006_v40  ;;  %v2729_v44 = vpop.permute.xlu1 %2728  ;;  %v3022_v1 = vld [vmem:[#allocation2 + $0x180] sm:$0xff] }
 0x5bd   :  { %2909 = vst.msk [vmem:[#allocation2] sm:$0xff] %vm2908_vm11, %v2729_v44  ;;  %3409 = vmatpush.xpose.msk.msra.mxu3 %vm3044_vm12, %v3022_v1 }
 0x5bf   :  { %3393 = vmatmul.msk.f32.vlgmr.msra.gmra.mxu2 %vm3044_vm12, %v2973_v6 }
 0x5c0   :  { %3410 = vmatmul.msk.f32.vlgmr.msra.gmra.mxu3 %vm3044_vm12, %v2973_v6 }
 0x5c3   :  { %v2991_v31 = vld [vmem:[#allocation2 + $0x88] sm:$0xff] }
 0x5c4   :  { %3374 = vmatpush.xpose.msk.msra.mxu1 %vm3044_vm12, %v2991_v31  ;;  %v2974_v7 = vld [vmem:[#allocation2] sm:$0xff] }
 0x5c5   :  { %3358 = vmatpush.xpose.msk.msra.mxu0 %vm3044_vm12, %v2974_v7 }
 0x5c8   :  { %3375 = vmatpush.xpose.msk.msra.mxu1 %vm3044_vm12, %v2990_v30  ;;  %3359 = vmatmul.msk.f32.vlgmr.msra.gmra.mxu0 %vm3044_vm12, %v2973_v6  ;;  %v3042_v54 = vpop.permute.xlu0 %3041 }
 0x5cb   :  { %3376 = vmatmul.msk.f32.vlgmr.msra.gmra.mxu1 %vm3044_vm12, %v2973_v6 }
 0x642   :  { %v3297_v36 = vpop.f32.mrf.mxu2 }
 0x643   :  { %v3298_v17 = vadd.f32 %v3297_v36, %v3042_v54  ;;  %v3317_v8 = vpop.f32.mrf.mxu3 }
 0x644   :  { %v3318_v4 = vadd.f32 %v3317_v8, %v3042_v54 }
 0x645   :  { %v3257_v25 = vpop.f32.mrf.mxu0  ;;  %3323 = vst [vmem:[#allocation3 + $0x10] sm:$0xff] %v3298_v17 }
 0x646   :  { %v3258_v43 = vadd.f32 %v3257_v25, %v3042_v54  ;;  %3324 = vst [vmem:[#allocation3 + $0x18] sm:$0xff] %v3318_v4 }
 0x648   :  { %3320 = vst [vmem:[#allocation3] sm:$0xff] %v3258_v43  ;;  %v3277_v21 = vpop.f32.mrf.mxu1 }
 0x649   :  { %v3278_v34 = vadd.f32 %v3277_v21, %v3042_v54 }
 0x64b   :  { %3321 = vst [vmem:[#allocation3 + $0x8] sm:$0xff] %v3278_v34 }
 0x64c   :  { %3337 = dma.vmem_to_hbm [thread:$0]  %s3330_s21, 512, %s3332_s19, [#allocation4], %s3459_s22, %s3459_s22, %s3452_s0  }
 0x64d   :  { %3447 = dma.done.wait [#allocation4], 512  }
 0x64e   :  { %3448 = vsyncadd [#allocation4], 4294966784 }
 0x64f   :  { %3342 = vsyncpa [#allocation4], 1 }

</bundles_post_ra>
